<compile_context>
chip_gen: v5e
topology: v5e:2x2
jax: 0.10.0
libtpu: 0.0.40
codegen_flags: <defaults>
</compile_context>

<pallas_src>
import jax
import jax.numpy as jnp
from jax import lax
from jax.experimental import pallas as pl
from jax.experimental.pallas import tpu as pltpu


def lstm_disc_kernel(x_ref, w_ih_ref, w_hh_ref, b_ref, w_lin_ref,
                     w_prob_ref, bias_ref, out_ref, gx_ref):
    # x_ref:      (T, D, B_blk)  bf16  VMEM  time-major, batch in lanes
    # w_ih_ref:   (4H, D)        bf16  VMEM  gate rows ordered (i, f, o, g)
    # w_hh_ref:   (4H, H)        bf16  VMEM  gate rows ordered (i, f, o, g)
    # b_ref:      (4H, 1)        f32   VMEM  b_ih + b_hh (reordered)
    # w_lin_ref:  (H, 1)         f32   VMEM  Linear(H->1) weight column
    # w_prob_ref: (T,)           f32   SMEM  Linear(T->1) weight
    # bias_ref:   (1,)           f32   SMEM  = b_lin*sum(w_prob) + b_prob
    # out_ref:    (1, B_blk)     f32   VMEM  lane-dense output
    # gx_ref:     (T, 4H, B_blk) f32   VMEM scratch (hoisted input projection)
    T, D, B = x_ref.shape
    H = w_hh_ref.shape[1]

    # Hoist weight reads out of the loops.
    w_ih = w_ih_ref[...]
    w_hh = w_hh_ref[...]
    b = b_ref[...]

    # Hoisted input projection: T independent matmuls issued up-front (the MXU
    # pipelines them), stored time-major so each recurrence step reads a
    # contiguous (4H, B) tile.
    for t in range(T):
        gx_ref[t] = (jnp.dot(w_ih, x_ref[t],
                             preferred_element_type=jnp.float32) + b)

    def gate_update(gates, c):
        # gate rows (i, f, o, g): one contiguous sigmoid over 3H sublanes,
        # one tanh over H sublanes; all slices are sublane-aligned.
        sig = jax.nn.sigmoid(gates[:3 * H])
        i = sig[0 * H:1 * H]
        f = sig[1 * H:2 * H]
        o = sig[2 * H:3 * H]
        g = jnp.tanh(gates[3 * H:])
        c_new = f * c + i * g
        h_new = o * jnp.tanh(c_new)
        return h_new, c_new

    # Peeled step t = 0: h = c = 0, so no recurrent matmul is needed.
    zero = jnp.zeros((H, B), jnp.float32)
    h1, c1 = gate_update(gx_ref[0], zero)
    acc1 = w_prob_ref[0] * h1

    def step(t, carry):
        h, c, acc = carry
        gates = gx_ref[t] + jnp.dot(w_hh, h.astype(jnp.bfloat16),
                                    preferred_element_type=jnp.float32)
        h_new, c_new = gate_update(gates, c)
        # Fold Linear(T->1) weight into a (H, B) accumulator (VPU FMA only).
        acc_new = acc + w_prob_ref[t] * h_new
        return h_new, c_new, acc_new

    _, _, acc = lax.fori_loop(1, T, step, (h1, c1, acc1),
                              unroll=max(1, min(T - 1, 8)))

    # Linear(H->1) applied once (cross-sublane reduce); both output-head biases
    # pre-folded into bias_ref.
    logit = jnp.sum(acc * w_lin_ref[...], axis=0, keepdims=True) + bias_ref[0]
    out_ref[...] = jax.nn.sigmoid(logit)


def _pick_batch_block(B):
    # Batch lives on the lane axis: blocks must be multiples of 128.
    # Prefer >=2 grid blocks so v7x's second TensorCore gets work.
    for blk in (512, 256, 128):
        if B >= 2 * blk:
            return blk
    return 128


def lstm_discriminator_forward(x, kparams):
    """x: (B, ts_dim, n_steps) float32 (matches the PyTorch module input)."""
    w_ih_fm, w_hh_fm, b_col, w_lin_col, w_prob, bias = kparams
    B, D, T = x.shape
    H = w_hh_fm.shape[1]

    B_blk = _pick_batch_block(B)
    n_blk = max(2, pl.cdiv(B, B_blk))      # always >=2 blocks (v7x megacore)
    B_pad = n_blk * B_blk

    # PyTorch's permute(0,2,1) folded into the feature-major/batch-in-lanes
    # layout (T, D, B); matmul operands in bf16.
    x_tdb = jnp.transpose(x, (2, 1, 0)).astype(jnp.bfloat16)
    if B_pad != B:
        x_tdb = jnp.pad(x_tdb, ((0, 0), (0, 0), (0, B_pad - B)))

    smem = pl.BlockSpec(memory_space=pltpu.MemorySpace.SMEM)

    out = pl.pallas_call(
        lstm_disc_kernel,
        out_shape=jax.ShapeDtypeStruct((1, B_pad), jnp.float32),
        grid=(n_blk,),
        in_specs=[
            pl.BlockSpec((T, D, B_blk), lambda i: (0, 0, i)),   # x (batch-tiled)
            pl.BlockSpec((4 * H, D), lambda i: (0, 0)),         # w_ih (resident)
            pl.BlockSpec((4 * H, H), lambda i: (0, 0)),         # w_hh (resident)
            pl.BlockSpec((4 * H, 1), lambda i: (0, 0)),         # bias column
            pl.BlockSpec((H, 1), lambda i: (0, 0)),             # w_lin column
            smem,                                               # w_prob (T,)
            smem,                                               # folded scalar bias
        ],
        out_specs=pl.BlockSpec((1, B_blk), lambda i: (0, i)),   # lane-dense out
        scratch_shapes=[pltpu.VMEM((T, 4 * H, B_blk), jnp.float32)],
        compiler_params=pltpu.CompilerParams(
            dimension_semantics=("parallel",),
            # Footprint is ~3 MiB at the largest block; 32 MiB is safe on
            # every generation (v5e default is only 16 MiB scoped).
            vmem_limit_bytes=32 * 1024 * 1024),
    )(x_tdb, w_ih_fm, w_hh_fm, b_col, w_lin_col, w_prob, bias)

    return out[0, :B].reshape(B, 1)


def make_params(key, ts_dim, n_steps, hidden_dim):
    """PyTorch-style parameters (LSTM gate order i, f, g, o)."""
    ks = jax.random.split(key, 8)
    k = 1.0 / jnp.sqrt(hidden_dim)
    u = lambda kk, shp, s: jax.random.uniform(kk, shp, jnp.float32, -s, s)
    w_ih = u(ks[0], (4 * hidden_dim, ts_dim), k)      # weight_ih_l0
    w_hh = u(ks[1], (4 * hidden_dim, hidden_dim), k)  # weight_hh_l0
    b_ih = u(ks[2], (4 * hidden_dim,), k)
    b_hh = u(ks[3], (4 * hidden_dim,), k)
    w_lin = u(ks[4], (1, hidden_dim), k)              # Linear(hidden, 1).weight
    b_lin = u(ks[5], (1,), k)
    kp = 1.0 / jnp.sqrt(n_steps)
    w_prob = u(ks[6], (1, n_steps), kp)               # Linear(n_steps, 1).weight
    b_prob = u(ks[7], (1,), kp)
    return dict(w_ih=w_ih, w_hh=w_hh, b_ih=b_ih, b_hh=b_hh,
                w_lin=w_lin, b_lin=b_lin, w_prob=w_prob, b_prob=b_prob)


def prepare_kernel_params(p):
    """Repack PyTorch-style params into the kernel layout.

    Feature-major: weights stay (4H, in) as in PyTorch; gate rows reordered
    (i, f, g, o) -> (i, f, o, g); matmul operands cast to bf16.
    """
    H = p["w_hh"].shape[1]

    def reorder(a):  # rows (i, f, g, o) -> (i, f, o, g)
        return jnp.concatenate(
            [a[:H], a[H:2 * H], a[3 * H:4 * H], a[2 * H:3 * H]], axis=0)

    w_ih_fm = reorder(p["w_ih"]).astype(jnp.bfloat16)             # (4H, D)
    w_hh_fm = reorder(p["w_hh"]).astype(jnp.bfloat16)             # (4H, H)
    b_col = reorder(p["b_ih"] + p["b_hh"]).reshape(4 * H, 1)      # (4H, 1) f32
    w_lin_col = p["w_lin"].reshape(H, 1)                          # (H, 1)  f32
    w_prob = p["w_prob"][0]                                       # (T,)    f32
    # sum_t w_prob[t]*(h_t@w_lin + b_lin) + b_prob  ==>  fold biases to a scalar
    bias = (p["b_lin"][0] * jnp.sum(w_prob) + p["b_prob"][0]).reshape(1)
    return (w_ih_fm, w_hh_fm, b_col, w_lin_col, w_prob, bias)


def reference_forward(x, p):
    """Pure-JAX f32 reference mirroring the PyTorch module exactly."""
    B = x.shape[0]
    H = p["w_hh"].shape[1]
    x_seq = jnp.transpose(x, (0, 2, 1))                  # (B, T, D)
    w_ih_t = p["w_ih"].T
    w_hh_t = p["w_hh"].T
    bias = p["b_ih"] + p["b_hh"]

    def step(carry, x_t):
        h, c = carry
        gates = x_t @ w_ih_t + h @ w_hh_t + bias
        i = jax.nn.sigmoid(gates[:, 0 * H:1 * H])
        f = jax.nn.sigmoid(gates[:, 1 * H:2 * H])
        g = jnp.tanh(gates[:, 2 * H:3 * H])
        o = jax.nn.sigmoid(gates[:, 3 * H:4 * H])
        c_new = f * c + i * g
        h_new = o * jnp.tanh(c_new)
        return (h_new, c_new), h_new

    init = (jnp.zeros((B, H), jnp.float32), jnp.zeros((B, H), jnp.float32))
    _, hs = lax.scan(step, init, jnp.transpose(x_seq, (1, 0, 2)))     # (T, B, H)
    lin = jnp.einsum("tbh,h->bt", hs, p["w_lin"][0]) + p["b_lin"][0]  # (B, T)
    logits = lin @ p["w_prob"].T + p["b_prob"]                        # (B, 1)
    return jax.nn.sigmoid(logits)


if __name__ == "__main__":
    B, ts_dim, n_steps, hidden_dim = 2, 4, 8, 32

    key = jax.random.PRNGKey(0)
    kx, kp = jax.random.split(key)
    x = jax.random.normal(kx, (B, ts_dim, n_steps), jnp.float32)
    params = make_params(kp, ts_dim, n_steps, hidden_dim)
    kparams = prepare_kernel_params(params)

    out = lstm_discriminator_forward(x, kparams)
    out = jax.block_until_ready(out)

    ref = reference_forward(x, params)
    assert out.shape == (B, 1)
    # bf16 matmul operands (f32 accumulation) -> looser tolerance vs f32 ref.
    assert jnp.allclose(out, ref, rtol=1e-2, atol=1e-2), (out, ref)

    print("KERNEL_OK")
</pallas_src>

<mosaic_0001>
module attributes {stable_mosaic.version = 11 : i64} {
  func.func @lstm_disc_kernel(%arg0: i32, %arg1: memref<8x4x128xbf16, #tpu.memory_space<vmem>>, %arg2: memref<128x4xbf16, #tpu.memory_space<vmem>>, %arg3: memref<128x32xbf16, #tpu.memory_space<vmem>>, %arg4: memref<128x1xf32, #tpu.memory_space<vmem>>, %arg5: memref<32x1xf32, #tpu.memory_space<vmem>>, %arg6: memref<8xf32, #tpu.memory_space<smem>>, %arg7: memref<1xf32, #tpu.memory_space<smem>>, %arg8: memref<1x128xf32, #tpu.memory_space<vmem>>, %arg9: memref<8x128x128xf32, #tpu.memory_space<vmem>>) attributes {dimension_semantics = [#tpu.dimension_semantics<parallel>], iteration_bounds = array<i64: 2>, scalar_prefetch = 0 : i64, scratch_operands = 1 : i64, tpu.core_type = #tpu.core_type<tc>, window_params = [{transform_indices = @transform_0, window_bounds = array<i64: 8, 4, 128>}, {pipeline_mode = #tpu.pipeline_mode<synchronous>, transform_indices = @transform_1, window_bounds = array<i64: 128, 4>}, {pipeline_mode = #tpu.pipeline_mode<synchronous>, transform_indices = @transform_2, window_bounds = array<i64: 128, 32>}, {pipeline_mode = #tpu.pipeline_mode<synchronous>, transform_indices = @transform_3, window_bounds = array<i64: 128, 1>}, {pipeline_mode = #tpu.pipeline_mode<synchronous>, transform_indices = @transform_4, window_bounds = array<i64: 32, 1>}, {transform_indices = @transform_5, window_bounds = array<i64: 8>}, {transform_indices = @transform_6, window_bounds = array<i64: 1>}, {transform_indices = @transform_7, window_bounds = array<i64: 1, 128>}]} {
    %c0 = arith.constant 0 : index
    %c0_0 = arith.constant 0 : index
    %0 = vector.load %arg2[%c0, %c0_0] : memref<128x4xbf16, #tpu.memory_space<vmem>>, vector<128x4xbf16>
    %c0_1 = arith.constant 0 : index
    %c0_2 = arith.constant 0 : index
    %1 = vector.load %arg3[%c0_1, %c0_2] : memref<128x32xbf16, #tpu.memory_space<vmem>>, vector<128x32xbf16>
    %c0_3 = arith.constant 0 : index
    %c0_4 = arith.constant 0 : index
    %2 = vector.load %arg4[%c0_3, %c0_4] : memref<128x1xf32, #tpu.memory_space<vmem>>, vector<128x1xf32>
    %c0_5 = arith.constant 0 : index
    %c0_6 = arith.constant 0 : index
    %c0_7 = arith.constant 0 : index
    %3 = vector.load %arg1[%c0_5, %c0_6, %c0_7] : memref<8x4x128xbf16, #tpu.memory_space<vmem>>, vector<1x4x128xbf16>
    %4 = vector.shape_cast %3 : vector<1x4x128xbf16> to vector<4x128xbf16>
    %cst = arith.constant dense<0.000000e+00> : vector<128x128xf32>
    %5 = tpu.matmul %0, %4, %cst {dimension_numbers = #tpu.dot_dimension_numbers<[1], [0], [0], [1], [0, 0, 1, 1], [], []>} : vector<128x4xbf16>, vector<4x128xbf16>, vector<128x128xf32> -> vector<128x128xf32>
    %6 = vector.broadcast %2 : vector<128x1xf32> to vector<128x128xf32>
    %7 = arith.addf %5, %6 : vector<128x128xf32>
    %c0_8 = arith.constant 0 : index
    %c0_9 = arith.constant 0 : index
    %c0_10 = arith.constant 0 : index
    %8 = vector.load %arg9[%c0_8, %c0_9, %c0_10] : memref<8x128x128xf32, #tpu.memory_space<vmem>>, vector<1x128x128xf32>
    %9 = vector.shape_cast %8 : vector<1x128x128xf32> to vector<128x128xf32>
    %10 = vector.shape_cast %7 : vector<128x128xf32> to vector<1x128x128xf32>
    tpu.vector_store %arg9[%c0_8, %c0_9, %c0_10], %10 {strides = array<i32>} : memref<8x128x128xf32, #tpu.memory_space<vmem>>, vector<1x128x128xf32>,
    %c1 = arith.constant 1 : index
    %c0_11 = arith.constant 0 : index
    %c0_12 = arith.constant 0 : index
    %11 = vector.load %arg1[%c1, %c0_11, %c0_12] : memref<8x4x128xbf16, #tpu.memory_space<vmem>>, vector<1x4x128xbf16>
    %12 = vector.shape_cast %11 : vector<1x4x128xbf16> to vector<4x128xbf16>
    %cst_13 = arith.constant dense<0.000000e+00> : vector<128x128xf32>
    %13 = tpu.matmul %0, %12, %cst_13 {dimension_numbers = #tpu.dot_dimension_numbers<[1], [0], [0], [1], [0, 0, 1, 1], [], []>} : vector<128x4xbf16>, vector<4x128xbf16>, vector<128x128xf32> -> vector<128x128xf32>
    %14 = vector.broadcast %2 : vector<128x1xf32> to vector<128x128xf32>
    %15 = arith.addf %13, %14 : vector<128x128xf32>
    %c1_14 = arith.constant 1 : index
    %c0_15 = arith.constant 0 : index
    %c0_16 = arith.constant 0 : index
    %16 = vector.load %arg9[%c1_14, %c0_15, %c0_16] : memref<8x128x128xf32, #tpu.memory_space<vmem>>, vector<1x128x128xf32>
    %17 = vector.shape_cast %16 : vector<1x128x128xf32> to vector<128x128xf32>
    %18 = vector.shape_cast %15 : vector<128x128xf32> to vector<1x128x128xf32>
    tpu.vector_store %arg9[%c1_14, %c0_15, %c0_16], %18 {strides = array<i32>} : memref<8x128x128xf32, #tpu.memory_space<vmem>>, vector<1x128x128xf32>,
    %c2 = arith.constant 2 : index
    %c0_17 = arith.constant 0 : index
    %c0_18 = arith.constant 0 : index
    %19 = vector.load %arg1[%c2, %c0_17, %c0_18] : memref<8x4x128xbf16, #tpu.memory_space<vmem>>, vector<1x4x128xbf16>
    %20 = vector.shape_cast %19 : vector<1x4x128xbf16> to vector<4x128xbf16>
    %cst_19 = arith.constant dense<0.000000e+00> : vector<128x128xf32>
    %21 = tpu.matmul %0, %20, %cst_19 {dimension_numbers = #tpu.dot_dimension_numbers<[1], [0], [0], [1], [0, 0, 1, 1], [], []>} : vector<128x4xbf16>, vector<4x128xbf16>, vector<128x128xf32> -> vector<128x128xf32>
    %22 = vector.broadcast %2 : vector<128x1xf32> to vector<128x128xf32>
    %23 = arith.addf %21, %22 : vector<128x128xf32>
    %c2_20 = arith.constant 2 : index
    %c0_21 = arith.constant 0 : index
    %c0_22 = arith.constant 0 : index
    %24 = vector.load %arg9[%c2_20, %c0_21, %c0_22] : memref<8x128x128xf32, #tpu.memory_space<vmem>>, vector<1x128x128xf32>
    %25 = vector.shape_cast %24 : vector<1x128x128xf32> to vector<128x128xf32>
    %26 = vector.shape_cast %23 : vector<128x128xf32> to vector<1x128x128xf32>
    tpu.vector_store %arg9[%c2_20, %c0_21, %c0_22], %26 {strides = array<i32>} : memref<8x128x128xf32, #tpu.memory_space<vmem>>, vector<1x128x128xf32>,
    %c3 = arith.constant 3 : index
    %c0_23 = arith.constant 0 : index
    %c0_24 = arith.constant 0 : index
    %27 = vector.load %arg1[%c3, %c0_23, %c0_24] : memref<8x4x128xbf16, #tpu.memory_space<vmem>>, vector<1x4x128xbf16>
    %28 = vector.shape_cast %27 : vector<1x4x128xbf16> to vector<4x128xbf16>
    %cst_25 = arith.constant dense<0.000000e+00> : vector<128x128xf32>
    %29 = tpu.matmul %0, %28, %cst_25 {dimension_numbers = #tpu.dot_dimension_numbers<[1], [0], [0], [1], [0, 0, 1, 1], [], []>} : vector<128x4xbf16>, vector<4x128xbf16>, vector<128x128xf32> -> vector<128x128xf32>
    %30 = vector.broadcast %2 : vector<128x1xf32> to vector<128x128xf32>
    %31 = arith.addf %29, %30 : vector<128x128xf32>
    %c3_26 = arith.constant 3 : index
    %c0_27 = arith.constant 0 : index
    %c0_28 = arith.constant 0 : index
    %32 = vector.load %arg9[%c3_26, %c0_27, %c0_28] : memref<8x128x128xf32, #tpu.memory_space<vmem>>, vector<1x128x128xf32>
    %33 = vector.shape_cast %32 : vector<1x128x128xf32> to vector<128x128xf32>
    %34 = vector.shape_cast %31 : vector<128x128xf32> to vector<1x128x128xf32>
    tpu.vector_store %arg9[%c3_26, %c0_27, %c0_28], %34 {strides = array<i32>} : memref<8x128x128xf32, #tpu.memory_space<vmem>>, vector<1x128x128xf32>,
    %c4 = arith.constant 4 : index
    %c0_29 = arith.constant 0 : index
    %c0_30 = arith.constant 0 : index
    %35 = vector.load %arg1[%c4, %c0_29, %c0_30] : memref<8x4x128xbf16, #tpu.memory_space<vmem>>, vector<1x4x128xbf16>
    %36 = vector.shape_cast %35 : vector<1x4x128xbf16> to vector<4x128xbf16>
    %cst_31 = arith.constant dense<0.000000e+00> : vector<128x128xf32>
    %37 = tpu.matmul %0, %36, %cst_31 {dimension_numbers = #tpu.dot_dimension_numbers<[1], [0], [0], [1], [0, 0, 1, 1], [], []>} : vector<128x4xbf16>, vector<4x128xbf16>, vector<128x128xf32> -> vector<128x128xf32>
    %38 = vector.broadcast %2 : vector<128x1xf32> to vector<128x128xf32>
    %39 = arith.addf %37, %38 : vector<128x128xf32>
    %c4_32 = arith.constant 4 : index
    %c0_33 = arith.constant 0 : index
    %c0_34 = arith.constant 0 : index
    %40 = vector.load %arg9[%c4_32, %c0_33, %c0_34] : memref<8x128x128xf32, #tpu.memory_space<vmem>>, vector<1x128x128xf32>
    %41 = vector.shape_cast %40 : vector<1x128x128xf32> to vector<128x128xf32>
    %42 = vector.shape_cast %39 : vector<128x128xf32> to vector<1x128x128xf32>
    tpu.vector_store %arg9[%c4_32, %c0_33, %c0_34], %42 {strides = array<i32>} : memref<8x128x128xf32, #tpu.memory_space<vmem>>, vector<1x128x128xf32>,
    %c5 = arith.constant 5 : index
    %c0_35 = arith.constant 0 : index
    %c0_36 = arith.constant 0 : index
    %43 = vector.load %arg1[%c5, %c0_35, %c0_36] : memref<8x4x128xbf16, #tpu.memory_space<vmem>>, vector<1x4x128xbf16>
    %44 = vector.shape_cast %43 : vector<1x4x128xbf16> to vector<4x128xbf16>
    %cst_37 = arith.constant dense<0.000000e+00> : vector<128x128xf32>
    %45 = tpu.matmul %0, %44, %cst_37 {dimension_numbers = #tpu.dot_dimension_numbers<[1], [0], [0], [1], [0, 0, 1, 1], [], []>} : vector<128x4xbf16>, vector<4x128xbf16>, vector<128x128xf32> -> vector<128x128xf32>
    %46 = vector.broadcast %2 : vector<128x1xf32> to vector<128x128xf32>
    %47 = arith.addf %45, %46 : vector<128x128xf32>
    %c5_38 = arith.constant 5 : index
    %c0_39 = arith.constant 0 : index
    %c0_40 = arith.constant 0 : index
    %48 = vector.load %arg9[%c5_38, %c0_39, %c0_40] : memref<8x128x128xf32, #tpu.memory_space<vmem>>, vector<1x128x128xf32>
    %49 = vector.shape_cast %48 : vector<1x128x128xf32> to vector<128x128xf32>
    %50 = vector.shape_cast %47 : vector<128x128xf32> to vector<1x128x128xf32>
    tpu.vector_store %arg9[%c5_38, %c0_39, %c0_40], %50 {strides = array<i32>} : memref<8x128x128xf32, #tpu.memory_space<vmem>>, vector<1x128x128xf32>,
    %c6 = arith.constant 6 : index
    %c0_41 = arith.constant 0 : index
    %c0_42 = arith.constant 0 : index
    %51 = vector.load %arg1[%c6, %c0_41, %c0_42] : memref<8x4x128xbf16, #tpu.memory_space<vmem>>, vector<1x4x128xbf16>
    %52 = vector.shape_cast %51 : vector<1x4x128xbf16> to vector<4x128xbf16>
    %cst_43 = arith.constant dense<0.000000e+00> : vector<128x128xf32>
    %53 = tpu.matmul %0, %52, %cst_43 {dimension_numbers = #tpu.dot_dimension_numbers<[1], [0], [0], [1], [0, 0, 1, 1], [], []>} : vector<128x4xbf16>, vector<4x128xbf16>, vector<128x128xf32> -> vector<128x128xf32>
    %54 = vector.broadcast %2 : vector<128x1xf32> to vector<128x128xf32>
    %55 = arith.addf %53, %54 : vector<128x128xf32>
    %c6_44 = arith.constant 6 : index
    %c0_45 = arith.constant 0 : index
    %c0_46 = arith.constant 0 : index
    %56 = vector.load %arg9[%c6_44, %c0_45, %c0_46] : memref<8x128x128xf32, #tpu.memory_space<vmem>>, vector<1x128x128xf32>
    %57 = vector.shape_cast %56 : vector<1x128x128xf32> to vector<128x128xf32>
    %58 = vector.shape_cast %55 : vector<128x128xf32> to vector<1x128x128xf32>
    tpu.vector_store %arg9[%c6_44, %c0_45, %c0_46], %58 {strides = array<i32>} : memref<8x128x128xf32, #tpu.memory_space<vmem>>, vector<1x128x128xf32>,
    %c7 = arith.constant 7 : index
    %c0_47 = arith.constant 0 : index
    %c0_48 = arith.constant 0 : index
    %59 = vector.load %arg1[%c7, %c0_47, %c0_48] : memref<8x4x128xbf16, #tpu.memory_space<vmem>>, vector<1x4x128xbf16>
    %60 = vector.shape_cast %59 : vector<1x4x128xbf16> to vector<4x128xbf16>
    %cst_49 = arith.constant dense<0.000000e+00> : vector<128x128xf32>
    %61 = tpu.matmul %0, %60, %cst_49 {dimension_numbers = #tpu.dot_dimension_numbers<[1], [0], [0], [1], [0, 0, 1, 1], [], []>} : vector<128x4xbf16>, vector<4x128xbf16>, vector<128x128xf32> -> vector<128x128xf32>
    %62 = vector.broadcast %2 : vector<128x1xf32> to vector<128x128xf32>
    %63 = arith.addf %61, %62 : vector<128x128xf32>
    %c7_50 = arith.constant 7 : index
    %c0_51 = arith.constant 0 : index
    %c0_52 = arith.constant 0 : index
    %64 = vector.load %arg9[%c7_50, %c0_51, %c0_52] : memref<8x128x128xf32, #tpu.memory_space<vmem>>, vector<1x128x128xf32>
    %65 = vector.shape_cast %64 : vector<1x128x128xf32> to vector<128x128xf32>
    %66 = vector.shape_cast %63 : vector<128x128xf32> to vector<1x128x128xf32>
    tpu.vector_store %arg9[%c7_50, %c0_51, %c0_52], %66 {strides = array<i32>} : memref<8x128x128xf32, #tpu.memory_space<vmem>>, vector<1x128x128xf32>,
    %cst_53 = arith.constant 0.000000e+00 : f32
    %67 = vector.broadcast %cst_53 : f32 to vector<32x128xf32>
    %c0_54 = arith.constant 0 : index
    %c0_55 = arith.constant 0 : index
    %c0_56 = arith.constant 0 : index
    %68 = vector.load %arg9[%c0_54, %c0_55, %c0_56] : memref<8x128x128xf32, #tpu.memory_space<vmem>>, vector<1x128x128xf32>
    %69 = vector.shape_cast %68 : vector<1x128x128xf32> to vector<128x128xf32>
    %70 = vector.extract_strided_slice %69 {offsets = [0, 0], sizes = [96, 128], strides = [1, 1]} : vector<128x128xf32> to vector<96x128xf32>
    %71 = arith.negf %70 : vector<96x128xf32>
    %72 = math.exp %71 : vector<96x128xf32>
    %cst_57 = arith.constant 1.000000e+00 : f32
    %73 = vector.broadcast %cst_57 : f32 to vector<96x128xf32>
    %74 = arith.addf %73, %72 : vector<96x128xf32>
    %75 = arith.divf %73, %74 : vector<96x128xf32>
    %76 = vector.extract_strided_slice %75 {offsets = [0, 0], sizes = [32, 128], strides = [1, 1]} : vector<96x128xf32> to vector<32x128xf32>
    %77 = vector.extract_strided_slice %75 {offsets = [32, 0], sizes = [32, 128], strides = [1, 1]} : vector<96x128xf32> to vector<32x128xf32>
    %78 = vector.extract_strided_slice %75 {offsets = [64, 0], sizes = [32, 128], strides = [1, 1]} : vector<96x128xf32> to vector<32x128xf32>
    %79 = vector.extract_strided_slice %69 {offsets = [96, 0], sizes = [32, 128], strides = [1, 1]} : vector<128x128xf32> to vector<32x128xf32>
    %80 = math.tanh %79 : vector<32x128xf32>
    %81 = arith.mulf %77, %67 : vector<32x128xf32>
    %82 = arith.mulf %76, %80 : vector<32x128xf32>
    %83 = arith.addf %81, %82 : vector<32x128xf32>
    %84 = math.tanh %83 : vector<32x128xf32>
    %85 = arith.mulf %78, %84 : vector<32x128xf32>
    %c0_58 = arith.constant 0 : index
    %86 = memref.load %arg6[%c0_58] : memref<8xf32, #tpu.memory_space<smem>>
    %87 = vector.broadcast %86 : f32 to vector<32x128xf32>
    %88 = arith.mulf %87, %85 : vector<32x128xf32>
    %c1_i32 = arith.constant 1 : i32
    %89 = arith.index_cast %c1_i32 : i32 to index
    %c0_59 = arith.constant 0 : index
    %c0_60 = arith.constant 0 : index
    %90 = vector.load %arg9[%89, %c0_59, %c0_60] : memref<8x128x128xf32, #tpu.memory_space<vmem>>, vector<1x128x128xf32>
    %91 = vector.shape_cast %90 : vector<1x128x128xf32> to vector<128x128xf32>
    %92 = arith.truncf %85 : vector<32x128xf32> to vector<32x128xbf16>
    %cst_61 = arith.constant dense<0.000000e+00> : vector<128x128xf32>
    %93 = tpu.matmul %1, %92, %cst_61 {dimension_numbers = #tpu.dot_dimension_numbers<[1], [0], [0], [1], [0, 0, 1, 1], [], []>} : vector<128x32xbf16>, vector<32x128xbf16>, vector<128x128xf32> -> vector<128x128xf32>
    %94 = arith.addf %91, %93 : vector<128x128xf32>
    %95 = vector.extract_strided_slice %94 {offsets = [0, 0], sizes = [96, 128], strides = [1, 1]} : vector<128x128xf32> to vector<96x128xf32>
    %96 = arith.negf %95 : vector<96x128xf32>
    %97 = math.exp %96 : vector<96x128xf32>
    %cst_62 = arith.constant 1.000000e+00 : f32
    %98 = vector.broadcast %cst_62 : f32 to vector<96x128xf32>
    %99 = arith.addf %98, %97 : vector<96x128xf32>
    %100 = arith.divf %98, %99 : vector<96x128xf32>
    %101 = vector.extract_strided_slice %100 {offsets = [0, 0], sizes = [32, 128], strides = [1, 1]} : vector<96x128xf32> to vector<32x128xf32>
    %102 = vector.extract_strided_slice %100 {offsets = [32, 0], sizes = [32, 128], strides = [1, 1]} : vector<96x128xf32> to vector<32x128xf32>
    %103 = vector.extract_strided_slice %100 {offsets = [64, 0], sizes = [32, 128], strides = [1, 1]} : vector<96x128xf32> to vector<32x128xf32>
    %104 = vector.extract_strided_slice %94 {offsets = [96, 0], sizes = [32, 128], strides = [1, 1]} : vector<128x128xf32> to vector<32x128xf32>
    %105 = math.tanh %104 : vector<32x128xf32>
    %106 = arith.mulf %102, %83 : vector<32x128xf32>
    %107 = arith.mulf %101, %105 : vector<32x128xf32>
    %108 = arith.addf %106, %107 : vector<32x128xf32>
    %109 = math.tanh %108 : vector<32x128xf32>
    %110 = arith.mulf %103, %109 : vector<32x128xf32>
    %111 = arith.index_cast %c1_i32 : i32 to index
    %112 = memref.load %arg6[%111] : memref<8xf32, #tpu.memory_space<smem>>
    %113 = vector.broadcast %112 : f32 to vector<32x128xf32>
    %114 = arith.mulf %113, %110 : vector<32x128xf32>
    %115 = arith.addf %88, %114 : vector<32x128xf32>
    %c2_i32 = arith.constant 2 : i32
    %116 = arith.index_cast %c2_i32 : i32 to index
    %c0_63 = arith.constant 0 : index
    %c0_64 = arith.constant 0 : index
    %117 = vector.load %arg9[%116, %c0_63, %c0_64] : memref<8x128x128xf32, #tpu.memory_space<vmem>>, vector<1x128x128xf32>
    %118 = vector.shape_cast %117 : vector<1x128x128xf32> to vector<128x128xf32>
    %119 = arith.truncf %110 : vector<32x128xf32> to vector<32x128xbf16>
    %cst_65 = arith.constant dense<0.000000e+00> : vector<128x128xf32>
    %120 = tpu.matmul %1, %119, %cst_65 {dimension_numbers = #tpu.dot_dimension_numbers<[1], [0], [0], [1], [0, 0, 1, 1], [], []>} : vector<128x32xbf16>, vector<32x128xbf16>, vector<128x128xf32> -> vector<128x128xf32>
    %121 = arith.addf %118, %120 : vector<128x128xf32>
    %122 = vector.extract_strided_slice %121 {offsets = [0, 0], sizes = [96, 128], strides = [1, 1]} : vector<128x128xf32> to vector<96x128xf32>
    %123 = arith.negf %122 : vector<96x128xf32>
    %124 = math.exp %123 : vector<96x128xf32>
    %cst_66 = arith.constant 1.000000e+00 : f32
    %125 = vector.broadcast %cst_66 : f32 to vector<96x128xf32>
    %126 = arith.addf %125, %124 : vector<96x128xf32>
    %127 = arith.divf %125, %126 : vector<96x128xf32>
    %128 = vector.extract_strided_slice %127 {offsets = [0, 0], sizes = [32, 128], strides = [1, 1]} : vector<96x128xf32> to vector<32x128xf32>
    %129 = vector.extract_strided_slice %127 {offsets = [32, 0], sizes = [32, 128], strides = [1, 1]} : vector<96x128xf32> to vector<32x128xf32>
    %130 = vector.extract_strided_slice %127 {offsets = [64, 0], sizes = [32, 128], strides = [1, 1]} : vector<96x128xf32> to vector<32x128xf32>
    %131 = vector.extract_strided_slice %121 {offsets = [96, 0], sizes = [32, 128], strides = [1, 1]} : vector<128x128xf32> to vector<32x128xf32>
    %132 = math.tanh %131 : vector<32x128xf32>
    %133 = arith.mulf %129, %108 : vector<32x128xf32>
    %134 = arith.mulf %128, %132 : vector<32x128xf32>
    %135 = arith.addf %133, %134 : vector<32x128xf32>
    %136 = math.tanh %135 : vector<32x128xf32>
    %137 = arith.mulf %130, %136 : vector<32x128xf32>
    %138 = arith.index_cast %c2_i32 : i32 to index
    %139 = memref.load %arg6[%138] : memref<8xf32, #tpu.memory_space<smem>>
    %140 = vector.broadcast %139 : f32 to vector<32x128xf32>
    %141 = arith.mulf %140, %137 : vector<32x128xf32>
    %142 = arith.addf %115, %141 : vector<32x128xf32>
    %c3_i32 = arith.constant 3 : i32
    %143 = arith.index_cast %c3_i32 : i32 to index
    %c0_67 = arith.constant 0 : index
    %c0_68 = arith.constant 0 : index
    %144 = vector.load %arg9[%143, %c0_67, %c0_68] : memref<8x128x128xf32, #tpu.memory_space<vmem>>, vector<1x128x128xf32>
    %145 = vector.shape_cast %144 : vector<1x128x128xf32> to vector<128x128xf32>
    %146 = arith.truncf %137 : vector<32x128xf32> to vector<32x128xbf16>
    %cst_69 = arith.constant dense<0.000000e+00> : vector<128x128xf32>
    %147 = tpu.matmul %1, %146, %cst_69 {dimension_numbers = #tpu.dot_dimension_numbers<[1], [0], [0], [1], [0, 0, 1, 1], [], []>} : vector<128x32xbf16>, vector<32x128xbf16>, vector<128x128xf32> -> vector<128x128xf32>
    %148 = arith.addf %145, %147 : vector<128x128xf32>
    %149 = vector.extract_strided_slice %148 {offsets = [0, 0], sizes = [96, 128], strides = [1, 1]} : vector<128x128xf32> to vector<96x128xf32>
    %150 = arith.negf %149 : vector<96x128xf32>
    %151 = math.exp %150 : vector<96x128xf32>
    %cst_70 = arith.constant 1.000000e+00 : f32
    %152 = vector.broadcast %cst_70 : f32 to vector<96x128xf32>
    %153 = arith.addf %152, %151 : vector<96x128xf32>
    %154 = arith.divf %152, %153 : vector<96x128xf32>
    %155 = vector.extract_strided_slice %154 {offsets = [0, 0], sizes = [32, 128], strides = [1, 1]} : vector<96x128xf32> to vector<32x128xf32>
    %156 = vector.extract_strided_slice %154 {offsets = [32, 0], sizes = [32, 128], strides = [1, 1]} : vector<96x128xf32> to vector<32x128xf32>
    %157 = vector.extract_strided_slice %154 {offsets = [64, 0], sizes = [32, 128], strides = [1, 1]} : vector<96x128xf32> to vector<32x128xf32>
    %158 = vector.extract_strided_slice %148 {offsets = [96, 0], sizes = [32, 128], strides = [1, 1]} : vector<128x128xf32> to vector<32x128xf32>
    %159 = math.tanh %158 : vector<32x128xf32>
    %160 = arith.mulf %156, %135 : vector<32x128xf32>
    %161 = arith.mulf %155, %159 : vector<32x128xf32>
    %162 = arith.addf %160, %161 : vector<32x128xf32>
    %163 = math.tanh %162 : vector<32x128xf32>
    %164 = arith.mulf %157, %163 : vector<32x128xf32>
    %165 = arith.index_cast %c3_i32 : i32 to index
    %166 = memref.load %arg6[%165] : memref<8xf32, #tpu.memory_space<smem>>
    %167 = vector.broadcast %166 : f32 to vector<32x128xf32>
    %168 = arith.mulf %167, %164 : vector<32x128xf32>
    %169 = arith.addf %142, %168 : vector<32x128xf32>
    %c4_i32 = arith.constant 4 : i32
    %170 = arith.index_cast %c4_i32 : i32 to index
    %c0_71 = arith.constant 0 : index
    %c0_72 = arith.constant 0 : index
    %171 = vector.load %arg9[%170, %c0_71, %c0_72] : memref<8x128x128xf32, #tpu.memory_space<vmem>>, vector<1x128x128xf32>
    %172 = vector.shape_cast %171 : vector<1x128x128xf32> to vector<128x128xf32>
    %173 = arith.truncf %164 : vector<32x128xf32> to vector<32x128xbf16>
    %cst_73 = arith.constant dense<0.000000e+00> : vector<128x128xf32>
    %174 = tpu.matmul %1, %173, %cst_73 {dimension_numbers = #tpu.dot_dimension_numbers<[1], [0], [0], [1], [0, 0, 1, 1], [], []>} : vector<128x32xbf16>, vector<32x128xbf16>, vector<128x128xf32> -> vector<128x128xf32>
    %175 = arith.addf %172, %174 : vector<128x128xf32>
    %176 = vector.extract_strided_slice %175 {offsets = [0, 0], sizes = [96, 128], strides = [1, 1]} : vector<128x128xf32> to vector<96x128xf32>
    %177 = arith.negf %176 : vector<96x128xf32>
    %178 = math.exp %177 : vector<96x128xf32>
    %cst_74 = arith.constant 1.000000e+00 : f32
    %179 = vector.broadcast %cst_74 : f32 to vector<96x128xf32>
    %180 = arith.addf %179, %178 : vector<96x128xf32>
    %181 = arith.divf %179, %180 : vector<96x128xf32>
    %182 = vector.extract_strided_slice %181 {offsets = [0, 0], sizes = [32, 128], strides = [1, 1]} : vector<96x128xf32> to vector<32x128xf32>
    %183 = vector.extract_strided_slice %181 {offsets = [32, 0], sizes = [32, 128], strides = [1, 1]} : vector<96x128xf32> to vector<32x128xf32>
    %184 = vector.extract_strided_slice %181 {offsets = [64, 0], sizes = [32, 128], strides = [1, 1]} : vector<96x128xf32> to vector<32x128xf32>
    %185 = vector.extract_strided_slice %175 {offsets = [96, 0], sizes = [32, 128], strides = [1, 1]} : vector<128x128xf32> to vector<32x128xf32>
    %186 = math.tanh %185 : vector<32x128xf32>
    %187 = arith.mulf %183, %162 : vector<32x128xf32>
    %188 = arith.mulf %182, %186 : vector<32x128xf32>
    %189 = arith.addf %187, %188 : vector<32x128xf32>
    %190 = math.tanh %189 : vector<32x128xf32>
    %191 = arith.mulf %184, %190 : vector<32x128xf32>
    %192 = arith.index_cast %c4_i32 : i32 to index
    %193 = memref.load %arg6[%192] : memref<8xf32, #tpu.memory_space<smem>>
    %194 = vector.broadcast %193 : f32 to vector<32x128xf32>
    %195 = arith.mulf %194, %191 : vector<32x128xf32>
    %196 = arith.addf %169, %195 : vector<32x128xf32>
    %c5_i32 = arith.constant 5 : i32
    %197 = arith.index_cast %c5_i32 : i32 to index
    %c0_75 = arith.constant 0 : index
    %c0_76 = arith.constant 0 : index
    %198 = vector.load %arg9[%197, %c0_75, %c0_76] : memref<8x128x128xf32, #tpu.memory_space<vmem>>, vector<1x128x128xf32>
    %199 = vector.shape_cast %198 : vector<1x128x128xf32> to vector<128x128xf32>
    %200 = arith.truncf %191 : vector<32x128xf32> to vector<32x128xbf16>
    %cst_77 = arith.constant dense<0.000000e+00> : vector<128x128xf32>
    %201 = tpu.matmul %1, %200, %cst_77 {dimension_numbers = #tpu.dot_dimension_numbers<[1], [0], [0], [1], [0, 0, 1, 1], [], []>} : vector<128x32xbf16>, vector<32x128xbf16>, vector<128x128xf32> -> vector<128x128xf32>
    %202 = arith.addf %199, %201 : vector<128x128xf32>
    %203 = vector.extract_strided_slice %202 {offsets = [0, 0], sizes = [96, 128], strides = [1, 1]} : vector<128x128xf32> to vector<96x128xf32>
    %204 = arith.negf %203 : vector<96x128xf32>
    %205 = math.exp %204 : vector<96x128xf32>
    %cst_78 = arith.constant 1.000000e+00 : f32
    %206 = vector.broadcast %cst_78 : f32 to vector<96x128xf32>
    %207 = arith.addf %206, %205 : vector<96x128xf32>
    %208 = arith.divf %206, %207 : vector<96x128xf32>
    %209 = vector.extract_strided_slice %208 {offsets = [0, 0], sizes = [32, 128], strides = [1, 1]} : vector<96x128xf32> to vector<32x128xf32>
    %210 = vector.extract_strided_slice %208 {offsets = [32, 0], sizes = [32, 128], strides = [1, 1]} : vector<96x128xf32> to vector<32x128xf32>
    %211 = vector.extract_strided_slice %208 {offsets = [64, 0], sizes = [32, 128], strides = [1, 1]} : vector<96x128xf32> to vector<32x128xf32>
    %212 = vector.extract_strided_slice %202 {offsets = [96, 0], sizes = [32, 128], strides = [1, 1]} : vector<128x128xf32> to vector<32x128xf32>
    %213 = math.tanh %212 : vector<32x128xf32>
    %214 = arith.mulf %210, %189 : vector<32x128xf32>
    %215 = arith.mulf %209, %213 : vector<32x128xf32>
    %216 = arith.addf %214, %215 : vector<32x128xf32>
    %217 = math.tanh %216 : vector<32x128xf32>
    %218 = arith.mulf %211, %217 : vector<32x128xf32>
    %219 = arith.index_cast %c5_i32 : i32 to index
    %220 = memref.load %arg6[%219] : memref<8xf32, #tpu.memory_space<smem>>
    %221 = vector.broadcast %220 : f32 to vector<32x128xf32>
    %222 = arith.mulf %221, %218 : vector<32x128xf32>
    %223 = arith.addf %196, %222 : vector<32x128xf32>
    %c6_i32 = arith.constant 6 : i32
    %224 = arith.index_cast %c6_i32 : i32 to index
    %c0_79 = arith.constant 0 : index
    %c0_80 = arith.constant 0 : index
    %225 = vector.load %arg9[%224, %c0_79, %c0_80] : memref<8x128x128xf32, #tpu.memory_space<vmem>>, vector<1x128x128xf32>
    %226 = vector.shape_cast %225 : vector<1x128x128xf32> to vector<128x128xf32>
    %227 = arith.truncf %218 : vector<32x128xf32> to vector<32x128xbf16>
    %cst_81 = arith.constant dense<0.000000e+00> : vector<128x128xf32>
    %228 = tpu.matmul %1, %227, %cst_81 {dimension_numbers = #tpu.dot_dimension_numbers<[1], [0], [0], [1], [0, 0, 1, 1], [], []>} : vector<128x32xbf16>, vector<32x128xbf16>, vector<128x128xf32> -> vector<128x128xf32>
    %229 = arith.addf %226, %228 : vector<128x128xf32>
    %230 = vector.extract_strided_slice %229 {offsets = [0, 0], sizes = [96, 128], strides = [1, 1]} : vector<128x128xf32> to vector<96x128xf32>
    %231 = arith.negf %230 : vector<96x128xf32>
    %232 = math.exp %231 : vector<96x128xf32>
    %cst_82 = arith.constant 1.000000e+00 : f32
    %233 = vector.broadcast %cst_82 : f32 to vector<96x128xf32>
    %234 = arith.addf %233, %232 : vector<96x128xf32>
    %235 = arith.divf %233, %234 : vector<96x128xf32>
    %236 = vector.extract_strided_slice %235 {offsets = [0, 0], sizes = [32, 128], strides = [1, 1]} : vector<96x128xf32> to vector<32x128xf32>
    %237 = vector.extract_strided_slice %235 {offsets = [32, 0], sizes = [32, 128], strides = [1, 1]} : vector<96x128xf32> to vector<32x128xf32>
    %238 = vector.extract_strided_slice %235 {offsets = [64, 0], sizes = [32, 128], strides = [1, 1]} : vector<96x128xf32> to vector<32x128xf32>
    %239 = vector.extract_strided_slice %229 {offsets = [96, 0], sizes = [32, 128], strides = [1, 1]} : vector<128x128xf32> to vector<32x128xf32>
    %240 = math.tanh %239 : vector<32x128xf32>
    %241 = arith.mulf %237, %216 : vector<32x128xf32>
    %242 = arith.mulf %236, %240 : vector<32x128xf32>
    %243 = arith.addf %241, %242 : vector<32x128xf32>
    %244 = math.tanh %243 : vector<32x128xf32>
    %245 = arith.mulf %238, %244 : vector<32x128xf32>
    %246 = arith.index_cast %c6_i32 : i32 to index
    %247 = memref.load %arg6[%246] : memref<8xf32, #tpu.memory_space<smem>>
    %248 = vector.broadcast %247 : f32 to vector<32x128xf32>
    %249 = arith.mulf %248, %245 : vector<32x128xf32>
    %250 = arith.addf %223, %249 : vector<32x128xf32>
    %c7_i32 = arith.constant 7 : i32
    %251 = arith.index_cast %c7_i32 : i32 to index
    %c0_83 = arith.constant 0 : index
    %c0_84 = arith.constant 0 : index
    %252 = vector.load %arg9[%251, %c0_83, %c0_84] : memref<8x128x128xf32, #tpu.memory_space<vmem>>, vector<1x128x128xf32>
    %253 = vector.shape_cast %252 : vector<1x128x128xf32> to vector<128x128xf32>
    %254 = arith.truncf %245 : vector<32x128xf32> to vector<32x128xbf16>
    %cst_85 = arith.constant dense<0.000000e+00> : vector<128x128xf32>
    %255 = tpu.matmul %1, %254, %cst_85 {dimension_numbers = #tpu.dot_dimension_numbers<[1], [0], [0], [1], [0, 0, 1, 1], [], []>} : vector<128x32xbf16>, vector<32x128xbf16>, vector<128x128xf32> -> vector<128x128xf32>
    %256 = arith.addf %253, %255 : vector<128x128xf32>
    %257 = vector.extract_strided_slice %256 {offsets = [0, 0], sizes = [96, 128], strides = [1, 1]} : vector<128x128xf32> to vector<96x128xf32>
    %258 = arith.negf %257 : vector<96x128xf32>
    %259 = math.exp %258 : vector<96x128xf32>
    %cst_86 = arith.constant 1.000000e+00 : f32
    %260 = vector.broadcast %cst_86 : f32 to vector<96x128xf32>
    %261 = arith.addf %260, %259 : vector<96x128xf32>
    %262 = arith.divf %260, %261 : vector<96x128xf32>
    %263 = vector.extract_strided_slice %262 {offsets = [0, 0], sizes = [32, 128], strides = [1, 1]} : vector<96x128xf32> to vector<32x128xf32>
    %264 = vector.extract_strided_slice %262 {offsets = [32, 0], sizes = [32, 128], strides = [1, 1]} : vector<96x128xf32> to vector<32x128xf32>
    %265 = vector.extract_strided_slice %262 {offsets = [64, 0], sizes = [32, 128], strides = [1, 1]} : vector<96x128xf32> to vector<32x128xf32>
    %266 = vector.extract_strided_slice %256 {offsets = [96, 0], sizes = [32, 128], strides = [1, 1]} : vector<128x128xf32> to vector<32x128xf32>
    %267 = math.tanh %266 : vector<32x128xf32>
    %268 = arith.mulf %264, %243 : vector<32x128xf32>
    %269 = arith.mulf %263, %267 : vector<32x128xf32>
    %270 = arith.addf %268, %269 : vector<32x128xf32>
    %271 = math.tanh %270 : vector<32x128xf32>
    %272 = arith.mulf %265, %271 : vector<32x128xf32>
    %273 = arith.index_cast %c7_i32 : i32 to index
    %274 = memref.load %arg6[%273] : memref<8xf32, #tpu.memory_space<smem>>
    %275 = vector.broadcast %274 : f32 to vector<32x128xf32>
    %276 = arith.mulf %275, %272 : vector<32x128xf32>
    %277 = arith.addf %250, %276 : vector<32x128xf32>
    %c7_i32_87 = arith.constant 7 : i32
    %c0_88 = arith.constant 0 : index
    %c0_89 = arith.constant 0 : index
    %278 = vector.load %arg5[%c0_88, %c0_89] : memref<32x1xf32, #tpu.memory_space<vmem>>, vector<32x1xf32>
    %279 = vector.broadcast %278 : vector<32x1xf32> to vector<32x128xf32>
    %280 = arith.mulf %277, %279 : vector<32x128xf32>
    %cst_90 = arith.constant dense<0.000000e+00> : vector<128xf32>
    %281 = vector.multi_reduction <add>, %280, %cst_90 [0] : vector<32x128xf32> to vector<128xf32>
    %282 = vector.shape_cast %281 : vector<128xf32> to vector<1x128xf32>
    %c0_91 = arith.constant 0 : index
    %283 = memref.load %arg7[%c0_91] : memref<1xf32, #tpu.memory_space<smem>>
    %284 = vector.broadcast %283 : f32 to vector<1x128xf32>
    %285 = arith.addf %282, %284 : vector<1x128xf32>
    %286 = arith.negf %285 : vector<1x128xf32>
    %287 = math.exp %286 : vector<1x128xf32>
    %cst_92 = arith.constant 1.000000e+00 : f32
    %288 = vector.broadcast %cst_92 : f32 to vector<1x128xf32>
    %289 = arith.addf %288, %287 : vector<1x128xf32>
    %290 = arith.divf %288, %289 : vector<1x128xf32>
    %c0_93 = arith.constant 0 : index
    %c0_94 = arith.constant 0 : index
    %291 = vector.load %arg8[%c0_93, %c0_94] : memref<1x128xf32, #tpu.memory_space<vmem>>, vector<1x128xf32>
    tpu.vector_store %arg8[%c0_93, %c0_94], %290 {strides = array<i32>} : memref<1x128xf32, #tpu.memory_space<vmem>>, vector<1x128xf32>,
    return
  }
  func.func @transform_0(%arg0: i32) -> (i32, i32, i32) {
    %c0_i32 = arith.constant 0 : i32
    %c0_i32_0 = arith.constant 0 : i32
    %c0_i32_1 = arith.constant 0 : i32
    return %c0_i32, %c0_i32_0, %arg0 : i32, i32, i32
  }
  func.func @transform_1(%arg0: i32) -> (i32, i32) {
    %c0_i32 = arith.constant 0 : i32
    %c0_i32_0 = arith.constant 0 : i32
    %c0_i32_1 = arith.constant 0 : i32
    return %c0_i32, %c0_i32_0 : i32, i32
  }
  func.func @transform_2(%arg0: i32) -> (i32, i32) {
    %c0_i32 = arith.constant 0 : i32
    %c0_i32_0 = arith.constant 0 : i32
    %c0_i32_1 = arith.constant 0 : i32
    return %c0_i32, %c0_i32_0 : i32, i32
  }
  func.func @transform_3(%arg0: i32) -> (i32, i32) {
    %c0_i32 = arith.constant 0 : i32
    %c0_i32_0 = arith.constant 0 : i32
    %c0_i32_1 = arith.constant 0 : i32
    return %c0_i32, %c0_i32_0 : i32, i32
  }
  func.func @transform_4(%arg0: i32) -> (i32, i32) {
    %c0_i32 = arith.constant 0 : i32
    %c0_i32_0 = arith.constant 0 : i32
    %c0_i32_1 = arith.constant 0 : i32
    return %c0_i32, %c0_i32_0 : i32, i32
  }
  func.func @transform_5(%arg0: i32) -> i32 {
    %c0_i32 = arith.constant 0 : i32
    %c0_i32_0 = arith.constant 0 : i32
    return %c0_i32 : i32
  }
  func.func @transform_6(%arg0: i32) -> i32 {
    %c0_i32 = arith.constant 0 : i32
    %c0_i32_0 = arith.constant 0 : i32
    return %c0_i32 : i32
  }
  func.func @transform_7(%arg0: i32) -> (i32, i32) {
    %c0_i32 = arith.constant 0 : i32
    %c0_i32_0 = arith.constant 0 : i32
    return %c0_i32, %arg0 : i32, i32
  }
}

</mosaic_0001>

<bundles_post_ra>
// kernel: tpu_custom_call.1
= control target key start
LH: loop header
LB: loop body
LE: loop exit
PB: predicated region body
PF: predicated region fallthrough
CT: control target
= control target key end

     0   :  { %s8663_s0 = inlined_call_operand.vmem [shape: bf16[8,4,256], index: 0, kind: input, shape index: {}]   ;;  %s8664_s1 = inlined_call_operand.vmem [shape: bf16[128,4], index: 1, kind: input, shape index: {}]   ;;  %s8665_s2 = inlined_call_operand.vmem [shape: bf16[128,32], index: 2, kind: input, shape index: {}]   ;;  %s8666_s3 = inlined_call_operand.vmem [shape: f32[128,1], index: 3, kind: input, shape index: {}]   ;;  %s8667_s4 = inlined_call_operand.vmem [shape: f32[32,1], index: 4, kind: input, shape index: {}]   ;;  %s8668_s5 = inlined_call_operand.vmem [shape: f32[8], index: 5, kind: input, shape index: {}]   ;;  %s8669_s6 = inlined_call_operand.<no memory space> [shape: f32[1], index: 6, kind: input, shape index: {}]   ;;  %s8670_s7 = inlined_call_operand.hbm [shape: f32[1,256], index: 7, kind: output, shape index: {}]  }
   0x1   :  { %12 = sst [smem:[#allocation3]] %s8669_s6 }
   0x2   :  { %13 = vsyncpa [#allocation7], 0 }
   0x3   :  { %14 = vsyncpa [#allocation6], 0 }
   0x4   :  { %16 = vsyncpa [#allocation6 + $0x1], 0  ;;  %s5070_s26 = smov 0   ;;  %s5072_s27 = smov 0  }
   0x5   :  { %s5074_s28 = smov 0   ;;  %s5076_s29 = smov 0  }
   0x6 LB: > { %s5091_s6 = sadd.s32 4294967295, %s5023_s29   ;;  %s4023_s30 = sadd.s32 4294967294, %s5023_s29   ;;  %s5023_s29 = sphi %s5076_s29, %s9173_s29   ;;  %s5019_s28 = sphi %s5074_s28, %s9172_s28   ;;  %s5015_s27 = sphi %s5072_s27, %s9171_s27   ;;  %s5011_s26 = sphi %s5070_s26, %s9170_s26  }
   0x7   : > { %s5095_s8 = sadd.s32 1, %s5023_s29   ;;  %s29_s9 = sadd.s32 1, %s5019_s28 }
   0x8   : > { %s26_s10 = ssub.s32 %s5023_s29, %s5095_s8  ;;  %p36_p0 = scmp.ne.s32.totalorder %s5019_s28, %s5015_s27 }
   0x9   : > { %p27_p1 = scmp.eq.s32.totalorder %s26_s10, 0  ;;  %p37_p2 = scmp.eq.s32.totalorder %s5023_s29, 0 }
   0xa   : > { %p192_p3 = scmp.eq.s32.totalorder %s5091_s6, 1  ;;  %p197_p4 = scmp.ne.s32.totalorder %s5015_s27, %s5011_s26 }
   0xb   : > { %s5107_s11 = scalar_select %p27_p1, %s5019_s28, %s29_s9  }
   0xc   : > { %p5109_p5 = por %p37_p2, %p36_p0  ;;  %p5113_p6 = por %p192_p3, %p36_p0 }
   0xd   : > { %p198_p7 = scmp.eq.s32.totalorder %s4023_s30, 1  ;;  %p4024_p8 = scmp.ge.s32.totalorder %s5023_s29, 1 }
   0xe   : > { %p205_p9 = scmp.lt.s32.totalorder %s5023_s29, 3  ;;  %p4362_p11 = scmp.eq.s32.totalorder %s5091_s6, 0 }
   0xf   : > { %p5119_p10 = por %p198_p7, %p197_p4  ;;  %s229_s18 = sshll.u32 %s8668_s5, 4  ;;  %s230_s18 = int_to_ptr.vmem [resolvable:$true] %s229_s18 }
  0x10   : > { %p5124_p12 = pnand %p4024_p8, %p205_p9  ;;  %s5025_s19 = smov [#allocation5]  }
  0x11   : > { %p4026_p1 = scmp.ge.s32.totalorder %s5023_s29, 2 }
  0x12   : > { %p4354_p13 = pneg %p5124_p12 }
  0x13   : > { %239 = sbr.rel (%p4026_p1) target bundleno = 36 (0x24), region = 40 }
  0x14   : > { %p4355_p0 = pnand %p4362_p11, %p4354_p13 }
  0x16   : > { %4357 = dma.vmem_to_smem (!%p4355_p0), %s230_s18, 16, %s5025_s19, [#allocation7]  }
  0x18   : > { %242 = sbr.rel (!%p5109_p5) target bundleno = 36 (0x24), region = 44  ;;  %s244_s20 = sand.u32 (%p5109_p5), 1, %s5019_s28  }
  0x19   : > { %s4028_s21 = sshll.u32 (%p5109_p5), %s5023_s29, 1  ;;  %s4027_s22 = sshll.u32 (%p5109_p5), %s244_s20, 4 }
  0x1a   : > { %s248_s25 = scalar_lea.vmem (%p5109_p5), %s8663_s0, %s4028_s21  ;;  %s246_s30 = scalar_lea.vmem (%p5109_p5), [#allocation4], %s4027_s22 }
  0x1b   : > { %v265_v0 = vld [vmem:[%s248_s25] sm:$0x3] (%p5109_p5)  ;;  %v267_v1 = vld [vmem:[%s248_s25 + $0x4] sm:$0x3] (%p5109_p5)  ;;  %v269_v2 = vld [vmem:[%s248_s25 + $0x8] sm:$0x3] (%p5109_p5) }
  0x1c   : > { %266 = vst [vmem:[%s246_s30] sm:$0x3] (%p5109_p5), %v265_v0  ;;  %v271_v3 = vld [vmem:[%s248_s25 + $0xc] sm:$0x3] (%p5109_p5)  ;;  %v273_v4 = vld [vmem:[%s248_s25 + $0x10] sm:$0x3] (%p5109_p5) }
  0x1d   : > { %268 = vst [vmem:[%s246_s30 + $0x2] sm:$0x3] %v267_v1  ;;  %v275_v5 = vld [vmem:[%s248_s25 + $0x14] sm:$0x3]  ;;  %v277_v6 = vld [vmem:[%s248_s25 + $0x18] sm:$0x3] }
  0x1e   : > { %270 = vst [vmem:[%s246_s30 + $0x4] sm:$0x3] %v269_v2  ;;  %v279_v7 = vld [vmem:[%s248_s25 + $0x1c] sm:$0x3] }
  0x1f   : > { %272 = vst [vmem:[%s246_s30 + $0x6] sm:$0x3] %v271_v3 }
  0x20   : > { %274 = vst [vmem:[%s246_s30 + $0x8] sm:$0x3] %v273_v4 }
  0x21   : > { %276 = vst [vmem:[%s246_s30 + $0xa] sm:$0x3] %v275_v5 }
  0x22   : > { %278 = vst [vmem:[%s246_s30 + $0xc] sm:$0x3] %v277_v6 }
  0x23   : > { %280 = vst [vmem:[%s246_s30 + $0xe] sm:$0x3] %v279_v7 }
  0x24 PF: > { %323 = sbr.rel (%p5124_p12) target bundleno = 2308 (0x904), region = 85 }
  0x29   : > { %s5148_s9 = sand.u32 1, %s5015_s27  }
  0x2a   : > { %s4030_s10 = sshll.u32 %s5148_s9, 4 }
  0x2b   : > { %s5151_s12 = scalar_lea.vmem [#allocation4], %s4030_s10 }
  0x2c   : > { %5002 = dma.done.wait (%p4362_p11), [#allocation7], 16  }
  0x2d   : > { %5004 = vsyncadd (%p4362_p11), [#allocation7], 4294967280 }
  0x2e   : > { %337 = sfence }
  0x2f   : > { %v411_v8 = vld [vmem:[%s5151_s12] sm:$0x3]  ;;  %vm557_vm0 = vcmask 1041408   ;;  %v4072_v9 = vld [vmem:[%s5151_s12 + $0x2] sm:$0x3]  ;;  %v5026_v13 = vmov 0   ;;  %s3946_s23 = scalar_lea.hbm %s8670_s7, %s5091_s6 }
  0x30   : > { %v559_v10 = vsel %vm557_vm0, %v411_v8, 0  ;;  %v629_v11 = vsel %vm557_vm0, %v4072_v9, 0  ;;  %v4081_v12 = vld [vmem:[%s5151_s12 + $0x4] sm:$0x3]  ;;  %4399 = vset.pattern.permute.xlu0 %v5026_v13  ;;  %4401 = vset.pattern.permute.xlu2 %v5026_v13  ;;  %vm532_vm1 = vcmask 31744   ;;  %v398_v20 = vld [vmem:[%s8666_s3 + $0x18] sm:$0xff] }
  0x31   : > { %v397_v14 = vld [vmem:[%s8666_s3 + $0x10] sm:$0xff]  ;;  %v5168_v15 = vld [vmem:[%s8664_s1] sm:$0xff]  ;;  %568 = vmatpush.bf16.msra.mxu0 %v559_v10  ;;  %4345 = vmatpush.bf16.msra.mxu3 %v559_v10  ;;  %v700_v16 = vsel %vm557_vm0, %v4081_v12, 0  ;;  %v402_v21 = vld [vmem:[%s8666_s3 + $0x38] sm:$0xff]  ;;  %s1391_s20 = sld [smem:[#allocation5]]  ;;  %s361_s24 = scalar_lea.vmem [#allocation8], %s5148_s9 }
  0x32   : > { %v5174_v17 = vld [vmem:[%s8664_s1 + $0x30] sm:$0xff]  ;;  %638 = vmatpush.bf16.msra.mxu1 %v629_v11  ;;  %709 = vmatpush.bf16.msra.mxu2 %v700_v16  ;;  %v395_v19 = vld [vmem:[%s8666_s3] sm:$0xff]  ;;  %v396_v22 = vld [vmem:[%s8666_s3 + $0x8] sm:$0xff]  ;;  %s6152_s21 = sld [smem:[#allocation5 + $0x1]]  ;;  %s3938_s6 = scalar_lea.sflag [#allocation6], %s5148_s9 }
  0x33   : > { %424 = vperm.xlu0 %4399, %v397_v14   ;;  %4400 = vset.pattern.permute.xlu1 %v5026_v13  ;;  %v401_v18 = vld [vmem:[%s8666_s3 + $0x30] sm:$0xff]  ;;  %v399_v23 = vld [vmem:[%s8666_s3 + $0x20] sm:$0xff]  ;;  %v5205_v24 = vld [vmem:[%s8664_s1 + $0x8] sm:$0xff]  ;;  %s6539_s22 = sld [smem:[#allocation5 + $0x2]]  ;;  %s4977_s18 = scalar_lea.hbm %s8670_s7, 2 }
  0x34   : > { %4064 = vmatmul.msk.bf16.vlgmr.msra.gmra.mxu0 %vm532_vm1, %v5168_v15  ;;  %4070 = vmatmul.msk.bf16.vlgmr.msra.gmra.mxu3 %vm532_vm1, %v5174_v17  ;;  %v5210_v25 = vld [vmem:[%s8664_s1 + $0x38] sm:$0xff]  ;;  %v400_v26 = vld [vmem:[%s8666_s3 + $0x28] sm:$0xff]  ;;  %v405_v27 = vld [vmem:[%s8666_s3 + $0x50] sm:$0xff]  ;;  %s6973_s25 = sld [smem:[#allocation5 + $0x3]] }
  0x35   : > { %4073 = vmatmul.msk.bf16.vlgmr.msra.gmra.mxu1 %vm532_vm1, %v5168_v15  ;;  %4082 = vmatmul.msk.bf16.vlgmr.msra.gmra.mxu2 %vm532_vm1, %v5168_v15  ;;  %v406_v28 = vld [vmem:[%s8666_s3 + $0x58] sm:$0xff]  ;;  %v403_v29 = vld [vmem:[%s8666_s3 + $0x40] sm:$0xff]  ;;  %v404_v30 = vld [vmem:[%s8666_s3 + $0x48] sm:$0xff]  ;;  %s7366_s30 = sld [smem:[#allocation5 + $0x4]] }
  0x36   : > { %444 = vperm.xlu1 %4400, %v401_v18   ;;  %414 = vperm.xlu2 %4401, %v395_v19   ;;  %v409_v31 = vld [vmem:[%s8666_s3 + $0x70] sm:$0xff]  ;;  %v410_v33 = vld [vmem:[%s8666_s3 + $0x78] sm:$0xff]  ;;  %v407_v34 = vld [vmem:[%s8666_s3 + $0x60] sm:$0xff]  ;;  %s7767_s16 = sld [smem:[#allocation5 + $0x5]] }
  0x37   : > { %4346 = vmatpush.bf16.msrb.mxu3 %v629_v11  ;;  %v5241_v32 = vld [vmem:[%s8664_s1 + $0x10] sm:$0xff]  ;;  %v408_v35 = vld [vmem:[%s8666_s3 + $0x68] sm:$0xff]  ;;  %v3877_v36 = vld [vmem:[%s8667_s4] sm:$0xff]  ;;  %s8128_s17 = sld [smem:[#allocation5 + $0x6]] }
  0x38   : > { %v5266_v37 = vld [vmem:[%s8664_s1 + $0x18] sm:$0xff]  ;;  %v3879_v38 = vld [vmem:[%s8667_s4 + $0x10] sm:$0xff]  ;;  %v5293_v48 = vld [vmem:[%s8664_s1 + $0x20] sm:$0xff]  ;;  %s8500_s19 = sld [smem:[#allocation5 + $0x7]] }
  0x39   : > { %v3880_v39 = vld [vmem:[%s8667_s4 + $0x18] sm:$0xff]  ;;  %v4090_v40 = vld [vmem:[%s5151_s12 + $0x6] sm:$0x3]  ;;  %v3878_v49 = vld [vmem:[%s8667_s4 + $0x8] sm:$0xff] }
  0x3a   : > { %v4099_v41 = vld [vmem:[%s5151_s12 + $0x8] sm:$0x3]  ;;  %v4108_v42 = vld [vmem:[%s5151_s12 + $0xa] sm:$0x3]  ;;  %v771_v43 = vsel %vm557_vm0, %v4090_v40, 0 }
  0x3b   : > { %4347 = vmatpush.bf16.msra.mxu3 %v700_v16  ;;  %429 = vperm.xlu0 %4399, %v398_v20   ;;  %v842_v44 = vsel %vm557_vm0, %v4099_v41, 0  ;;  %v913_v45 = vsel %vm557_vm0, %v4108_v42, 0  ;;  %v4117_v46 = vld [vmem:[%s5151_s12 + $0xc] sm:$0x3] }
  0x3c   : > { %851 = vmatpush.bf16.msrb.mxu0 %v842_v44  ;;  %v984_v47 = vsel %vm557_vm0, %v4117_v46, 0  ;;  %922 = vmatpush.bf16.msrb.mxu1 %v913_v45  ;;  %v5309_v50 = vld [vmem:[%s8664_s1 + $0x28] sm:$0xff] }
  0x3d   : > { %993 = vmatpush.bf16.msrb.mxu2 %v984_v47  ;;  %v4126_v47 = vld [vmem:[%s5151_s12 + $0xe] sm:$0x3] }
  0x3e   : > { %449 = vperm.xlu1 %4400, %v402_v21   ;;  %419 = vperm.xlu2 %4401, %v396_v22  }
  0x43   : > { %434 = vperm.xlu0 %4399, %v399_v23  }
  0x44   : > { %4065 = vmatmul.msk.bf16.gmra.mxu0 %vm532_vm1, %v5205_v24  ;;  %4071 = vmatmul.msk.bf16.gmra.mxu3 %vm532_vm1, %v5210_v25 }
  0x45   : > { %4074 = vmatmul.msk.bf16.gmra.mxu1 %vm532_vm1, %v5205_v24  ;;  %4083 = vmatmul.msk.bf16.gmra.mxu2 %vm532_vm1, %v5205_v24 }
  0x46   : > { %439 = vperm.xlu1 %4400, %v400_v26   ;;  %464 = vperm.xlu2 %4401, %v405_v27  }
  0x4b   : > { %469 = vperm.xlu0 %4399, %v406_v28  }
  0x4e   : > { %454 = vperm.xlu1 %4400, %v403_v29   ;;  %459 = vperm.xlu2 %4401, %v404_v30  }
  0x53   : > { %484 = vperm.xlu0 %4399, %v409_v31  }
  0x54   : > { %4066 = vmatmul.msk.bf16.gmra.mxu0 %vm532_vm1, %v5241_v32  ;;  %4079 = vmatmul.msk.bf16.vlgmr.msrb.gmra.mxu3 %vm532_vm1, %v5174_v17 }
  0x55   : > { %4075 = vmatmul.msk.bf16.gmra.mxu1 %vm532_vm1, %v5241_v32  ;;  %4084 = vmatmul.msk.bf16.gmra.mxu2 %vm532_vm1, %v5241_v32 }
  0x56   : > { %489 = vperm.xlu1 %4400, %v410_v33   ;;  %474 = vperm.xlu2 %4401, %v407_v34  }
  0x57   : > { %780 = vmatpush.bf16.msrb.mxu3 %v771_v43 }
  0x5b   : > { %479 = vperm.xlu0 %4399, %v408_v35  }
  0x5e   : > { %3883 = vperm.xlu1 %4400, %v3877_v36   ;;  %3888 = vperm.xlu2 %4401, %v3878_v49  }
  0x63   : > { %3893 = vperm.xlu0 %4399, %v3879_v38  }
  0x64   : > { %4067 = vmatmul.msk.bf16.gmra.mxu0 %vm532_vm1, %v5266_v37  ;;  %4080 = vmatmul.msk.bf16.gmra.mxu3 %vm532_vm1, %v5210_v25 }
  0x65   : > { %4076 = vmatmul.msk.bf16.gmra.mxu1 %vm532_vm1, %v5266_v37  ;;  %4085 = vmatmul.msk.bf16.gmra.mxu2 %vm532_vm1, %v5266_v37 }
  0x66   : > { %3898 = vperm.xlu1 %4400, %v3880_v39  }
  0x74   : > { %4068 = vmatmul.msk.bf16.gmra.mxu0 %vm532_vm1, %v5293_v48  ;;  %4088 = vmatmul.msk.bf16.vlgmr.msra.gmra.mxu3 %vm532_vm1, %v5174_v17 }
  0x75   : > { %4077 = vmatmul.msk.bf16.gmra.mxu1 %vm532_vm1, %v5293_v48  ;;  %4086 = vmatmul.msk.bf16.gmra.mxu2 %vm532_vm1, %v5293_v48 }
  0x84   : > { %4069 = vmatmul.msk.bf16.gmra.mxu0 %vm532_vm1, %v5309_v50  ;;  %4089 = vmatmul.msk.bf16.gmra.mxu3 %vm532_vm1, %v5210_v25 }
  0x85   : > { %4078 = vmatmul.msk.bf16.gmra.mxu1 %vm532_vm1, %v5309_v50  ;;  %4087 = vmatmul.msk.bf16.gmra.mxu2 %vm532_vm1, %v5309_v50 }
  0x90   : > { %v5353_v56 = vpop.permute.xlu2 %414 }
  0x94   : > { %4091 = vmatmul.msk.bf16.vlgmr.msrb.gmra.mxu3 %vm532_vm1, %v5168_v15  ;;  %4100 = vmatmul.msk.bf16.vlgmr.msrb.gmra.mxu0 %vm532_vm1, %v5168_v15 }
  0x95   : > { %4109 = vmatmul.msk.bf16.vlgmr.msrb.gmra.mxu1 %vm532_vm1, %v5168_v15  ;;  %4118 = vmatmul.msk.bf16.vlgmr.msrb.gmra.mxu2 %vm532_vm1, %v5168_v15 }
  0x98   : > { %v5362_v62 = vpop.permute.xlu2 %419 }
  0xa0   : > { %v5384_v11 = vpop.permute.xlu2 %464 }
  0xa1   : > { %8719 = vst [vmem:[#allocation15_spill] sm:$0xff] %v5384_v11 }
  0xa4   : > { %4092 = vmatmul.msk.bf16.gmra.mxu3 %vm532_vm1, %v5205_v24  ;;  %4101 = vmatmul.msk.bf16.gmra.mxu0 %vm532_vm1, %v5205_v24 }
  0xa5   : > { %4110 = vmatmul.msk.bf16.gmra.mxu1 %vm532_vm1, %v5205_v24  ;;  %4119 = vmatmul.msk.bf16.gmra.mxu2 %vm532_vm1, %v5205_v24  ;;  %v5355_v57 = vpop.permute.xlu0 %424 }
  0xa8   : > { %v5357_v58 = vpop.permute.xlu1 %444  ;;  %v5414_v36 = vpop.permute.xlu2 %459 }
  0xa9   : > { %8715 = vst [vmem:[#allocation11_spill] sm:$0xff] %v5357_v58 }
  0xaa   : > { %8722 = vst [vmem:[#allocation18_spill] sm:$0xff] %v5414_v36 }
  0xad   : > { %v5368_v63 = vpop.permute.xlu0 %429 }
  0xae   : > { %8716 = vst [vmem:[#allocation12_spill] sm:$0xff] %v5368_v63 }
  0xb0   : > { %v5371_v1 = vpop.permute.xlu1 %449 }
  0xb1   : > { %v570_v51 = vpop.f32.mrf.mxu0  ;;  %8717 = vst [vmem:[#allocation13_spill] sm:$0xff] %v5371_v1 }
  0xb2   : > { %v571_v61 = vadd.f32 %v570_v51, %v5353_v56  ;;  %v5402_v27 = vpop.f32.mrf.mxu1 }
  0xb4   : > { %4093 = vmatmul.msk.bf16.gmra.mxu3 %vm532_vm1, %v5241_v32  ;;  %4102 = vmatmul.msk.bf16.gmra.mxu0 %vm532_vm1, %v5241_v32  ;;  %v4135_v2 = vmul.f32 -1.442695, %v571_v61 }
  0xb5   : > { %4111 = vmatmul.msk.bf16.gmra.mxu1 %vm532_vm1, %v5241_v32  ;;  %4120 = vmatmul.msk.bf16.gmra.mxu2 %vm532_vm1, %v5241_v32  ;;  %v5380_v8 = vpop.permute.xlu0 %434 }
  0xb6   : > { %4402 = vpow2.f32 %v4135_v2 }
  0xb7   : > { %v5351_v54 = vpop.f32.mrf.mxu3 }
  0xb8   : > { %v5382_v9 = vpop.permute.xlu1 %439  ;;  %v5407_v29 = vpop.f32.mrf.mxu2 }
  0xb9   : > { %v572_v52 = vpop.f32.mrf.mxu0  ;;  %8718 = vst [vmem:[#allocation14_spill] sm:$0xff] %v5382_v9 }
  0xba   : > { %v573_v0 = vadd.f32 %v572_v52, %v5362_v62  ;;  %8720 = vst [vmem:[#allocation16_spill] sm:$0xff] %v5407_v29  ;;  %v5426_v46 = vpop.f32.mrf.mxu1 }
  0xbc   : > { %v4136_v4 = vmul.f32 -1.442695, %v573_v0  ;;  %v4403_v10 = vpop.eup %4402 }
  0xbd   : > { %v5388_v18 = vadd.f32 1.0, %v4403_v10  ;;  %v5409_v33 = vpop.permute.xlu0 %469 }
  0xbe   : > { %4404 = vpow2.f32 %v4136_v4  ;;  %8721 = vst [vmem:[#allocation17_spill] sm:$0xff] %v5409_v33 }
  0xbf   : > { %v5359_v59 = vpop.f32.mrf.mxu3  ;;  %vm1192_vm3 = vweird.f32 %v5388_v18 }
  0xc0   : > { %v5429_v51 = vpop.f32.mrf.mxu2  ;;  %v5444_v10 = vpop.permute.xlu1 %454 }
  0xc1   : > { %v575_v53 = vpop.f32.mrf.mxu0  ;;  %8724 = vst [vmem:[#allocation20_spill] sm:$0xff] %v5429_v51 }
  0xc2   : > { %v576_v3 = vadd.f32 %v575_v53, %v5355_v57  ;;  %8727 = vst [vmem:[#allocation23_spill] sm:$0xff] %v5444_v10 }
  0xc4   : > { %4094 = vmatmul.msk.bf16.gmra.mxu3 %vm532_vm1, %v5266_v37  ;;  %4103 = vmatmul.msk.bf16.gmra.mxu0 %vm532_vm1, %v5266_v37  ;;  %v4137_v7 = vmul.f32 -1.442695, %v576_v3  ;;  %v4405_v16 = vpop.eup %4404 }
  0xc5   : > { %4112 = vmatmul.msk.bf16.gmra.mxu1 %vm532_vm1, %v5266_v37  ;;  %4121 = vmatmul.msk.bf16.gmra.mxu2 %vm532_vm1, %v5266_v37  ;;  %v5404_v28 = vadd.f32 1.0, %v4405_v16  ;;  %v5438_v2 = vpop.permute.xlu0 %484 }
  0xc6   : > { %4406 = vpow2.f32 %v4137_v7  ;;  %8725 = vst [vmem:[#allocation21_spill] sm:$0xff] %v5438_v2 }
  0xc7   : > { %v5378_v6 = vpop.f32.mrf.mxu3  ;;  %4408 = vrcp.f32 %v5388_v18  ;;  %vm1207_vm4 = vweird.f32 %v5404_v28 }
  0xc9   : > { %v577_v55 = vpop.f32.mrf.mxu0 }
  0xca   : > { %v578_v19 = vadd.f32 %v577_v55, %v5368_v63  ;;  %v1055_v55 = vsel %vm557_vm0, %v4126_v47, 0 }
  0xcb   : > { %1064 = vmatpush.bf16.msra.mxu3 %v1055_v55 }
  0xcc   : > { %v4407_v26 = vpop.eup %4406  ;;  %v4138_v30 = vmul.f32 -1.442695, %v578_v19 }
  0xcd   : > { %v5411_v34 = vadd.f32 1.0, %v4407_v26  ;;  %v5417_v40 = vpop.eup %4408  ;;  %v1198_v26 = vand.u32 2147483648, %v5388_v18 }
  0xce   : > { %v1188_v45 = vmul.f32 %v5417_v40, %v5388_v18  ;;  %vm1193_vm2 = vweird.f32 %v5417_v40 }
  0xcf   : > { %v5391_v20 = vpop.f32.mrf.mxu3  ;;  %vm5509_vm5 = vmor %vm1192_vm3, %vm1193_vm2  ;;  %v1228_v51 = vand.u32 2147483648, %v5411_v34  ;;  %vm1222_vm7 = vweird.f32 %v5411_v34 }
  0xd0   : > { %v1189_v4 = vsub.f32 1.0, %v1188_v45 }
  0xd1   : > { %v580_v60 = vpop.f32.mrf.mxu0 }
  0xd2   : > { %v581_v21 = vadd.f32 %v580_v60, %v5380_v8 }
  0xd4   : > { %4095 = vmatmul.msk.bf16.gmra.mxu3 %vm532_vm1, %v5293_v48  ;;  %4104 = vmatmul.msk.bf16.gmra.mxu0 %vm532_vm1, %v5293_v48  ;;  %v4139_v31 = vmul.f32 -1.442695, %v581_v21 }
  0xd5   : > { %4113 = vmatmul.msk.bf16.gmra.mxu1 %vm532_vm1, %v5293_v48  ;;  %4122 = vmatmul.msk.bf16.gmra.mxu2 %vm532_vm1, %v5293_v48 }
  0xd7   : > { %v5420_v42 = vpop.f32.mrf.mxu3 }
  0xd8   : > { %8723 = vst [vmem:[#allocation19_spill] sm:$0xff] %v5420_v42 }
  0xd9   : > { %v582_v5 = vpop.f32.mrf.mxu0 }
  0xda   : > { %v583_v12 = vadd.f32 %v582_v5, %v5382_v9  ;;  %v5440_v5 = vpop.permute.xlu2 %474 }
  0xdb   : > { %8726 = vst [vmem:[#allocation22_spill] sm:$0xff] %v5440_v5  ;;  %v601_v19 = vadd.f32 %v5351_v54, %v5440_v5  ;;  %v1213_v54 = vand.u32 2147483648, %v5404_v28 }
  0xdc   : > { %v4140_v22 = vmul.f32 -1.442695, %v583_v12 }
  0xde   : > { %4410 = vpow2.f32 %v4140_v22  ;;  %v1190_v22 = vmul.f32 %v5417_v40, %v1189_v4 }
  0xe1   : > { %v585_v13 = vpop.f32.mrf.mxu0 }
  0xe2   : > { %v586_v14 = vadd.f32 %v585_v13, %v5357_v58  ;;  %v8748_v58 = vand.u32 2147483647, %v5388_v18 }
  0xe4   : > { %4096 = vmatmul.msk.bf16.gmra.mxu3 %vm532_vm1, %v5309_v50  ;;  %4105 = vmatmul.msk.bf16.gmra.mxu0 %vm532_vm1, %v5309_v50  ;;  %v4141_v23 = vmul.f32 -1.442695, %v586_v14  ;;  %v4411_v41 = vpop.eup %4410 }
  0xe5   : > { %4114 = vmatmul.msk.bf16.gmra.mxu1 %vm532_vm1, %v5309_v50  ;;  %4123 = vmatmul.msk.bf16.gmra.mxu2 %vm532_vm1, %v5309_v50  ;;  %v5431_v52 = vadd.f32 1.0, %v4411_v41  ;;  %v5478_v41 = vpop.f32.mrf.mxu1 }
  0xe6   : > { %4412 = vpow2.f32 %v4141_v23  ;;  %v5469_v23 = vpop.f32.mrf.mxu3 }
  0xe7   : > { %4414 = vrcp.f32 %v5404_v28  ;;  %8728 = vst [vmem:[#allocation24_spill] sm:$0xff] %v5469_v23  ;;  %vm1267_vm15 = vweird.f32 %v5431_v52  ;;  %v1271_v63 = vand.u32 2147483647, %v5431_v52 }
  0xe8   : > { %4416 = vpow2.f32 %v4138_v30 }
  0xe9   : > { %v587_v35 = vpop.f32.mrf.mxu0  ;;  %4418 = vpow2.f32 %v4139_v31 }
  0xea   : > { %v588_v38 = vadd.f32 %v587_v35, %v5371_v1  ;;  %4420 = vrcp.f32 %v5411_v34 }
  0xec   : > { %v4142_v39 = vmul.f32 -1.442695, %v588_v38  ;;  %v4413_v43 = vpop.eup %4412 }
  0xed   : > { %v5422_v44 = vpop.eup %4414  ;;  %v5434_v61 = vadd.f32 1.0, %v4413_v43  ;;  %v5480_v43 = vpop.f32.mrf.mxu2 }
  0xee   : > { %4422 = vpow2.f32 %v4142_v39  ;;  %v4417_v49 = vpop.eup %4416  ;;  %v1203_v12 = vmul.f32 %v5422_v44, %v5404_v28  ;;  %8729 = vst [vmem:[#allocation25_spill] sm:$0xff] %v5480_v43  ;;  %vm1208_vm6 = vweird.f32 %v5422_v44  ;;  %v5563_v5 = vpop.f32.mrf.mxu1 }
  0xef   : > { %v4419_v60 = vpop.eup %4418  ;;  %v5442_v7 = vadd.f32 1.0, %v4417_v49  ;;  %4424 = vrcp.f32 %v5431_v52  ;;  %v5485_v49 = vadd.f32 %v5417_v40, %v1190_v22  ;;  %vm5551_vm9 = vmor %vm1207_vm4, %vm1208_vm6  ;;  %8737 = vst [vmem:[#allocation29_spill] sm:$0xff] %v5563_v5 }
  0xf0   : > { %v5436_v0 = vpop.eup %4420  ;;  %v5452_v13 = vadd.f32 1.0, %v4419_v60  ;;  %4426 = vrcp.f32 %v5434_v61  ;;  %v1204_v30 = vsub.f32 1.0, %v1203_v12  ;;  %v5495_v12 = vpop.permute.xlu0 %479 }
  0xf1   : > { %v590_v53 = vpop.f32.mrf.mxu0  ;;  %v1218_v16 = vmul.f32 %v5436_v0, %v5411_v34  ;;  %4428 = vrcp.f32 %v5442_v7  ;;  %8730 = vst [vmem:[#allocation26_spill] sm:$0xff] %v5495_v12  ;;  %vm1223_vm8 = vweird.f32 %v5436_v0  ;;  %vm1237_vm0 = vweird.f32 %v5442_v7 }
  0xf2   : > { %v591_v21 = vadd.f32 %v590_v53, %v5444_v10  ;;  %4430 = vrcp.f32 %v5452_v13  ;;  %v606_v53 = vadd.f32 %v5378_v6, %v5438_v2  ;;  %v1205_v4 = vmul.f32 %v5422_v44, %v1204_v30  ;;  %v5540_v2 = vpop.f32.mrf.mxu3  ;;  %vm5581_vm10 = vmor %vm1222_vm7, %vm1223_vm8 }
  0xf3   : > { %v1219_v39 = vsub.f32 1.0, %v1218_v16  ;;  %v5513_v30 = vor.u32 1.1754944e-38, %v1213_v54  ;;  %v603_v54 = vadd.f32 %v5359_v59, %v5495_v12  ;;  %8734 = vst [vmem:[#allocation28_spill] sm:$0xff] %v5540_v2  ;;  %v5556_v2 = vor.u32 1.1754944e-38, %v1228_v51 }
  0xf4   : > { %v4423_v3 = vpop.eup %4422  ;;  %4097 = vmatmul.msk.bf16.gmra.mxu3 %vm532_vm1, %v5174_v17  ;;  %4106 = vmatmul.msk.bf16.gmra.mxu0 %vm532_vm1, %v5174_v17  ;;  %v4143_v45 = vmul.f32 -1.442695, %v591_v21  ;;  %v5503_v21 = vpop.permute.xlu1 %489  ;;  %vm1252_vm12 = vweird.f32 %v5452_v13  ;;  %vm1282_vm7 = vweird.f32 %v5434_v61  ;;  %vm5642_vm8 = vcmp.eq.f32.partialorder %v8748_v58, 8.507059e+37 }
  0xf5   : > { %4115 = vmatmul.msk.bf16.gmra.mxu1 %vm532_vm1, %v5174_v17  ;;  %4124 = vmatmul.msk.bf16.gmra.mxu2 %vm532_vm1, %v5174_v17  ;;  %v5460_v14 = vadd.f32 1.0, %v4423_v3  ;;  %v5475_v38 = vpop.eup %4424  ;;  %v5492_v3 = vor.u32 1.1754944e-38, %v1198_v26  ;;  %8731 = vst [vmem:[#allocation27_spill] sm:$0xff] %v5503_v21  ;;  %v608_v29 = vadd.f32 %v5391_v20, %v5503_v21 }
  0xf6   : > { %v5482_v47 = vpop.eup %4426  ;;  %v1263_v6 = vmul.f32 %v5475_v38, %v5431_v52  ;;  %vm1268_vm2 = vweird.f32 %v5475_v38 }
  0xf7   : > { %4432 = vrcp.f32 %v5460_v14  ;;  %v5497_v16 = vpop.eup %4428  ;;  %vm1283_vm3 = vweird.f32 %v5482_v47  ;;  %vm5632_vm6 = vmor %vm1267_vm15, %vm1268_vm2  ;;  %vm1272_vm2 = vcmp.eq.f32.partialorder %v1271_v63, 8.507059e+37 }
  0xf8   : > { %4434 = vtanh.f32 %v601_v19  ;;  %v1211_v19 = vand.u32 2147483647, %v5404_v28  ;;  %v5505_v22 = vpop.eup %4430  ;;  %v1264_v59 = vsub.f32 1.0, %v1263_v6  ;;  %v1226_v6 = vand.u32 2147483647, %v5411_v34 }
  0xf9   : > { %v592_v31 = vpop.f32.mrf.mxu0  ;;  %vm1238_vm11 = vweird.f32 %v5497_v16  ;;  %v1256_v34 = vand.u32 2147483647, %v5452_v13  ;;  %vm1253_vm4 = vweird.f32 %v5505_v22 }
  0xfa   : > { %v593_v35 = vadd.f32 %v592_v31, %v5414_v36  ;;  %v1220_v31 = vmul.f32 %v5436_v0, %v1219_v39  ;;  %v5530_v39 = vadd.f32 %v5422_v44, %v1205_v4  ;;  %v1265_v28 = vmul.f32 %v5475_v38, %v1264_v59 }
  0xfb   : > { %vm5599_vm13 = vcmp.eq.f32.partialorder %v1211_v19, 8.507059e+37  ;;  %vm5603_vm14 = vcmp.eq.f32.partialorder %v1226_v6, 8.507059e+37 }
  0xfc   : > { %v4144_v55 = vmul.f32 -1.442695, %v593_v35  ;;  %v1278_v35 = vmul.f32 %v5482_v47, %v5434_v61  ;;  %v5544_v23 = vadd.f32 %v5436_v0, %v1220_v31  ;;  %v1266_v6 = vadd.f32 %v5475_v38, %v1265_v28  ;;  %v5626_v28 = vpop.f32.mrf.mxu3 }
  0xfd   : > { %v5518_v60 = vpop.eup %4432  ;;  %8745 = vst [vmem:[#allocation31_spill] sm:$0xff] %v5626_v28 }
  0xfe   : > { %4436 = vpow2.f32 %v4144_v55  ;;  %v5527_v43 = vpop.eup %4434  ;;  %v1279_v12 = vsub.f32 1.0, %v1278_v35  ;;  %v1293_v20 = vmul.f32 %v5518_v60, %v5460_v14  ;;  %v1225_v51 = vsel %vm5581_vm10, %v5436_v0, %v5544_v23  ;;  %vm5649_vm10 = vmor %vm1282_vm7, %vm1283_vm3 }
  0xff   : > { %4438 = vpow2.f32 %v4143_v45  ;;  %v1233_v45 = vmul.f32 %v5497_v16, %v5442_v7  ;;  %v1258_v23 = vand.u32 2147483648, %v5452_v13  ;;  %vm1298_vm15 = vweird.f32 %v5518_v60  ;;  %vm5670_vm3 = vmor %vm1252_vm12, %vm1253_vm4 }
 0x100   : > { %4440 = vtanh.f32 %v606_v53  ;;  %v1248_v53 = vmul.f32 %v5505_v22, %v5452_v13  ;;  %v1294_v1 = vsub.f32 1.0, %v1293_v20  ;;  %vm1297_vm7 = vweird.f32 %v5460_v14 }
 0x101   : > { %v595_v55 = vpop.f32.mrf.mxu0  ;;  %4442 = vtanh.f32 %v603_v54  ;;  %vm5685_vm12 = vmor %vm1297_vm7, %vm1298_vm15  ;;  %vm5710_vm4 = vcmp.eq.f32.partialorder %v1256_v34, 8.507059e+37 }
 0x102   : > { %v596_v4 = vadd.f32 %v595_v55, %v5384_v11  ;;  %v1234_v55 = vsub.f32 1.0, %v1233_v45  ;;  %v5565_v11 = vpop.f32.mrf.mxu2  ;;  %4444 = vtanh.f32 %v608_v29  ;;  %v1295_v29 = vmul.f32 %v5518_v60, %v1294_v1 }
 0x103   : > { %8738 = vst [vmem:[#allocation30_spill] sm:$0xff] %v5565_v11  ;;  %v1280_v11 = vmul.f32 %v5482_v47, %v1279_v12  ;;  %v1273_v12 = vand.u32 2147483648, %v5431_v52  ;;  %v1286_v1 = vand.u32 2147483647, %v5434_v61 }
 0x104   : > { %v4437_v21 = vpop.eup %4436  ;;  %v4145_v31 = vmul.f32 -1.442695, %v596_v4  ;;  %4098 = vmatmul.msk.bf16.gmra.mxu3 %vm532_vm1, %v5210_v25  ;;  %4107 = vmatmul.msk.bf16.gmra.mxu0 %vm532_vm1, %v5210_v25  ;;  %v1249_v4 = vsub.f32 1.0, %v1248_v53  ;;  %v1235_v0 = vmul.f32 %v5497_v16, %v1234_v55  ;;  %v1296_v18 = vadd.f32 %v5518_v60, %v1295_v29 }
 0x105   : > { %v4439_v35 = vpop.eup %4438  ;;  %4116 = vmatmul.msk.bf16.gmra.mxu1 %vm532_vm1, %v5210_v25  ;;  %4125 = vmatmul.msk.bf16.gmra.mxu2 %vm532_vm1, %v5210_v25  ;;  %v5592_v36 = vadd.f32 1.0, %v4437_v21  ;;  %v1281_v45 = vadd.f32 %v5482_v47, %v1280_v11  ;;  %v1274_v10 = vor.u32 1.1754944e-38, %v1273_v12 }
 0x106   : > { %v5575_v54 = vpop.eup %4440  ;;  %4446 = vpow2.f32 %v4145_v31  ;;  %v5597_v53 = vadd.f32 1.0, %v4439_v35  ;;  %v1250_v19 = vmul.f32 %v5505_v22, %v1249_v4  ;;  %v1288_v4 = vand.u32 2147483648, %v5434_v61 }
 0x107   : > { %v5611_v20 = vpop.eup %4442  ;;  %4448 = vrcp.f32 %v5592_v36  ;;  %v1270_v61 = vsel %vm5632_vm6, %v5475_v38, %v1266_v6  ;;  %v1285_v58 = vsel %vm5649_vm10, %v5482_v47, %v1281_v45  ;;  %vm1287_vm6 = vcmp.eq.f32.partialorder %v1286_v1, 8.507059e+37 }
 0x108   : > { %v5618_v55 = vpop.eup %4444  ;;  %4450 = vrcp.f32 %v5597_v53  ;;  %v1289_v12 = vor.u32 1.1754944e-38, %v1288_v4  ;;  %v1301_v47 = vand.u32 2147483647, %v5460_v14  ;;  %v1275_v29 = vsel %vm1272_vm2, %v1274_v10, %v1270_v61  ;;  %v5730_v61 = vpop.f32.mrf.mxu3 }
 0x109   : > { %v597_v21 = vpop.f32.mrf.mxu0  ;;  %v8755_v6 = vand.u32 2147483648, %v5442_v7  ;;  %v8759_v10 = vsel %vm5551_vm9, %v5422_v44, %v5530_v39  ;;  %v1259_v44 = vor.u32 1.1754944e-38, %v1258_v23  ;;  %8764 = vst [vmem:[#allocation33_spill] sm:$0xff] %v5730_v61 }
 0x10a   : > { %v598_v35 = vadd.f32 %v597_v21, %v5409_v33  ;;  %v1290_v13 = vsel %vm1287_vm6, %v1289_v12, %v1285_v58  ;;  %vm1302_vm9 = vcmp.eq.f32.partialorder %v1301_v47, 8.507059e+37  ;;  %v8766_v12 = vsel %vm5509_vm5, %v5417_v40, %v5485_v49 }
 0x10b   : > { %v1244_v45 = vor.u32 1.1754944e-38, %v8755_v6  ;;  %v1373_v23 = vmul.f32 0.0, %v1290_v13 }
 0x10c   : > { %v4447_v5 = vpop.eup %4446  ;;  %v4146_v21 = vmul.f32 -1.442695, %v598_v35  ;;  %v1251_v35 = vadd.f32 %v5505_v22, %v1250_v19  ;;  %v1303_v19 = vand.u32 2147483648, %v5460_v14  ;;  %v1331_v14 = vand.u32 2147483647, %v5592_v36 }
 0x10d   : > { %v5638_v33 = vadd.f32 1.0, %v4447_v5  ;;  %v1236_v5 = vadd.f32 %v5497_v16, %v1235_v0  ;;  %v1230_v0 = vsel %vm5603_vm14, %v5556_v2, %v1225_v51  ;;  %v1215_v2 = vsel %vm5599_vm13, %v5513_v30, %v8759_v10  ;;  %vm5703_vm14 = vmor %vm1237_vm0, %vm1238_vm11 }
 0x10e   : > { %4452 = vpow2.f32 %v4146_v21  ;;  %v5664_v21 = vpop.eup %4448  ;;  %v1255_v51 = vsel %vm5670_vm3, %v5505_v22, %v1251_v35  ;;  %v1300_v30 = vsel %vm5685_vm12, %v5518_v60, %v1296_v18  ;;  %v1304_v31 = vor.u32 1.1754944e-38, %v1303_v19 }
 0x10f   : > { %4454 = vrcp.f32 %v5638_v33  ;;  %v5676_v63 = vpop.eup %4450  ;;  %v1240_v59 = vsel %vm5703_vm14, %v5497_v16, %v1236_v5  ;;  %v1323_v1 = vmul.f32 %v5664_v21, %v5592_v36  ;;  %v1372_v22 = vmul.f32 0.0, %v1275_v29 }
 0x110   : > { %v1308_v60 = vmul.f32 %v5676_v63, %v5597_v53  ;;  %v1305_v52 = vsel %vm1302_vm9, %v1304_v31, %v1300_v30  ;;  %v1260_v58 = vsel %vm5710_vm4, %v1259_v44, %v1255_v51  ;;  %v1377_v18 = vmul.f32 %v5575_v54, %v1230_v0  ;;  %v5774_v51 = vpop.f32.mrf.mxu3 }
 0x111   : > { %v5689_v11 = vpop.f32.mrf.mxu0  ;;  %v8765_v5 = vand.u32 2147483647, %v5442_v7  ;;  %v1200_v19 = vsel %vm5642_vm8, %v5492_v3, %v8766_v12  ;;  %v1324_v47 = vsub.f32 1.0, %v1323_v1  ;;  %v1374_v54 = vmul.f32 0.0, %v1305_v52  ;;  %8768 = vst [vmem:[#allocation35_spill] sm:$0xff] %v5774_v51 }
 0x112   : > { %8758 = vst [vmem:[#allocation32_spill] sm:$0xff] %v5689_v11  ;;  %v1309_v0 = vsub.f32 1.0, %v1308_v60  ;;  %v5751_v7 = vadd.f32 %v1377_v18, %v1373_v23  ;;  %v1371_v6 = vmul.f32 0.0, %v1260_v58  ;;  %v1375_v40 = vmul.f32 %v5527_v43, %v1200_v19 }
 0x113   : > { %vm1242_vm11 = vcmp.eq.f32.partialorder %v8765_v5, 8.507059e+37  ;;  %v1325_v3 = vmul.f32 %v5664_v21, %v1324_v47  ;;  %vm1313_vm13 = vweird.f32 %v5676_v63  ;;  %v1348_v43 = vand.u32 2147483648, %v5638_v33 }
 0x114   : > { %v4453_v39 = vpop.eup %4452  ;;  %4127 = vmatmul.msk.bf16.vlgmr.msra.gmra.mxu3 %vm532_vm1, %v5168_v15  ;;  %v1376_v15 = vmul.f32 %v5611_v20, %v1215_v2  ;;  %v1245_v38 = vsel %vm1242_vm11, %v1244_v45, %v1240_v59  ;;  %v1310_v4 = vmul.f32 %v5676_v63, %v1309_v0  ;;  %v5764_v10 = vadd.f32 %v1375_v40, %v1371_v6 }
 0x115   : > { %v5724_v34 = vpop.eup %4454  ;;  %v5728_v35 = vadd.f32 1.0, %v4453_v39  ;;  %v1378_v26 = vmul.f32 %v5618_v55, %v1245_v38  ;;  %vm1327_vm0 = vweird.f32 %v5592_v36  ;;  %vm1328_vm8 = vweird.f32 %v5664_v21 }
 0x116   : > { %v1338_v16 = vmul.f32 %v5724_v34, %v5638_v33  ;;  %v5749_v20 = vadd.f32 %v1376_v15, %v1372_v22  ;;  %vm1343_vm5 = vweird.f32 %v5724_v34  ;;  %vm1342_vm10 = vweird.f32 %v5638_v33  ;;  %vm5798_vm6 = vmor %vm1327_vm0, %vm1328_vm8 }
 0x117   : > { %4456 = vrcp.f32 %v5728_v35  ;;  %v5760_v45 = vadd.f32 %v1378_v26, %v1374_v54  ;;  %v1346_v44 = vand.u32 2147483647, %v5638_v33  ;;  %v1326_v30 = vadd.f32 %v5664_v21, %v1325_v3  ;;  %vm5779_vm15 = vmor %vm1342_vm10, %vm1343_vm5 }
 0x118   : > { %v1339_v29 = vsub.f32 1.0, %v1338_v16  ;;  %4458 = vtanh.f32 %v5749_v20  ;;  %v1363_v59 = vand.u32 2147483648, %v5728_v35  ;;  %v1311_v31 = vadd.f32 %v5676_v63, %v1310_v4  ;;  %v5825_v26 = vpop.f32.mrf.mxu3 }
 0x119   : > { %v5756_v49 = vpop.f32.mrf.mxu0  ;;  %4460 = vtanh.f32 %v5751_v7  ;;  %v1333_v1 = vand.u32 2147483648, %v5592_v36  ;;  %v1361_v60 = vand.u32 2147483647, %v5728_v35  ;;  %v1349_v16 = vor.u32 1.1754944e-38, %v1348_v43  ;;  %8776 = vst [vmem:[#allocation37_spill] sm:$0xff] %v5825_v26 }
 0x11a   : > { %v1340_v13 = vmul.f32 %v5724_v34, %v1339_v29  ;;  %8767 = vst [vmem:[#allocation34_spill] sm:$0xff] %v5756_v49  ;;  %4462 = vtanh.f32 %v5760_v45  ;;  %vm1312_vm3 = vweird.f32 %v5597_v53  ;;  %v1316_v58 = vand.u32 2147483647, %v5597_v53 }
 0x11b   : > { %v1318_v15 = vand.u32 2147483648, %v5597_v53  ;;  %vm1347_vm7 = vcmp.eq.f32.partialorder %v1346_v44, 8.507059e+37  ;;  %vm1357_vm12 = vweird.f32 %v5728_v35  ;;  %vm5807_vm14 = vmor %vm1312_vm3, %vm1313_vm13  ;;  %v1330_v36 = vsel %vm5798_vm6, %v5664_v21, %v1326_v30  ;;  %v5855_v44 = vld [vmem:[%s8665_s2 + $0x8] sm:$0xff] }
 0x11c   : > { %v1341_v55 = vadd.f32 %v5724_v34, %v1340_v13  ;;  %v1364_v12 = vor.u32 1.1754944e-38, %v1363_v59  ;;  %v1334_v19 = vor.u32 1.1754944e-38, %v1333_v1  ;;  %4464 = vtanh.f32 %v5764_v10  ;;  %v5870_v59 = vld [vmem:[%s8665_s2 + $0x10] sm:$0xff] }
 0x11d   : > { %v4457_v28 = vpop.eup %4456  ;;  %vm1362_vm9 = vcmp.eq.f32.partialorder %v1361_v60, 8.507059e+37  ;;  %v1315_v38 = vsel %vm5807_vm14, %v5676_v63, %v1311_v31  ;;  %vm1332_vm11 = vcmp.eq.f32.partialorder %v1331_v14, 8.507059e+37  ;;  %v1319_v54 = vor.u32 1.1754944e-38, %v1318_v15  ;;  %v5900_v60 = vld [vmem:[%s8665_s2 + $0x20] sm:$0xff] }
 0x11e   : > { %v1353_v2 = vmul.f32 %v4457_v28, %v5728_v35  ;;  %v4459_v22 = vpop.eup %4458  ;;  %v1345_v23 = vsel %vm5779_vm15, %v5724_v34, %v1341_v55  ;;  %vm1358_vm2 = vweird.f32 %v4457_v28  ;;  %v1335_v21 = vsel %vm1332_vm11, %v1334_v19, %v1330_v36 }
 0x11f   : > { %v4461_v52 = vpop.eup %4460  ;;  %v1350_v53 = vsel %vm1347_vm7, %v1349_v16, %v1345_v23  ;;  %vm1359_vm4 = vmor %vm1357_vm12, %vm1358_vm2  ;;  %vm1317_vm5 = vcmp.eq.f32.partialorder %v1316_v58, 8.507059e+37  ;;  %v5829_v3 = vmul.f32 %v4459_v22, %v1335_v21  ;;  %vm1455_vm13 = vcmask 261120   ;;  %v5885_v22 = vld [vmem:[%s8665_s2 + $0x18] sm:$0xff]  ;;  %v5915_v58 = vld [vmem:[%s8665_s2 + $0x28] sm:$0xff] }
 0x120   : > { %v1354_v42 = vsub.f32 1.0, %v1353_v2  ;;  %v4463_v47 = vpop.eup %4462  ;;  %v5821_v0 = vmul.f32 %v4461_v52, %v1350_v53  ;;  %v1320_v13 = vsel %vm1317_vm5, %v1319_v54, %v1315_v38  ;;  %v5838_v2 = vld [vmem:[%s8665_s2] sm:$0xff]  ;;  %v5844_v43 = vpop.f32.mrf.mxu3  ;;  %v5941_v53 = vld [vmem:[%s8665_s2 + $0x38] sm:$0xff] }
 0x121   : > { %8778 = vst [vmem:[#allocation39_spill] sm:$0xff] %v5844_v43 }
 0x122   : > { %v1355_v33 = vmul.f32 %v4457_v28, %v1354_v42 }
 0x124   : > { %4128 = vmatmul.msk.bf16.gmra.mxu3 %vm532_vm1, %v5205_v24  ;;  %v1356_v34 = vadd.f32 %v4457_v28, %v1355_v33  ;;  %v5816_v24 = vpop.f32.mrf.mxu0 }
 0x125   : > { %8775 = vst [vmem:[#allocation36_spill] sm:$0xff] %v5816_v24 }
 0x126   : > { %v1360_v35 = vsel %vm1359_vm4, %v4457_v28, %v1356_v34  ;;  %v4465_v28 = vpop.eup %4464  ;;  %v5930_v34 = vld [vmem:[%s8665_s2 + $0x30] sm:$0xff] }
 0x127   : > { %v1365_v29 = vsel %vm1362_vm9, %v1364_v12, %v1360_v35  ;;  %v5831_v63 = vmul.f32 %v4465_v28, %v1320_v13  ;;  %v641_v12 = vadd.f32 %v5402_v27, %v5353_v56 }
 0x128   : > { %v5823_v6 = vmul.f32 %v4463_v47, %v1365_v29  ;;  %v5850_v42 = vpop.f32.mrf.mxu3  ;;  %v650_v47 = vpop.f32.mrf.mxu1  ;;  %v646_v29 = vadd.f32 %v5478_v41, %v5355_v57 }
 0x129   : > { %v1413_v4 = vpack.c.bf16 %v5829_v3, %v5831_v63  ;;  %8780 = vst [vmem:[#allocation41_spill] sm:$0xff] %v5850_v42 }
 0x12a   : > { %v1414_v40 = vpack.c.bf16 %v5823_v6, %v5821_v0 }
 0x12c   : > { %1486 = vmatpush.bf16.msra.mxu0 %v1414_v40  ;;  %v5840_v55 = vpop.f32.mrf.mxu0 }
 0x12d   : > { %8777 = vst [vmem:[#allocation38_spill] sm:$0xff] %v5840_v55 }
 0x130   : > { %1487 = vmatpush.bf16.msra.mxu0 %v1413_v4  ;;  %v5863_v39 = vpop.f32.mrf.mxu3  ;;  %v652_v13 = vpop.f32.mrf.mxu1 }
 0x131   : > { %8782 = vst [vmem:[#allocation43_spill] sm:$0xff] %v5863_v39  ;;  %v8810_v39 = vld [vmem:[#allocation21_spill] sm:$0xff] }
 0x133   : > { %4179 = vmatmul.msk.bf16.vlgmr.msra.gmra.mxu0 %vm1455_vm13, %v5838_v2 }
 0x134   : > { %4129 = vmatmul.msk.bf16.gmra.mxu3 %vm532_vm1, %v5241_v32  ;;  %v5848_v14 = vpop.f32.mrf.mxu0 }
 0x135   : > { %8779 = vst [vmem:[#allocation40_spill] sm:$0xff] %v5848_v14 }
 0x138   : > { %v5872_v31 = vpop.f32.mrf.mxu3  ;;  %v655_v4 = vpop.f32.mrf.mxu1 }
 0x139   : > { %8784 = vst [vmem:[#allocation45_spill] sm:$0xff] %v5872_v31 }
 0x13c   : > { %v5859_v30 = vpop.f32.mrf.mxu0 }
 0x13d   : > { %8781 = vst [vmem:[#allocation42_spill] sm:$0xff] %v5859_v30 }
 0x143   : > { %4180 = vmatmul.msk.bf16.gmra.mxu0 %vm1455_vm13, %v5855_v44 }
 0x144   : > { %4130 = vmatmul.msk.bf16.gmra.mxu3 %vm532_vm1, %v5266_v37  ;;  %v5865_v32 = vpop.f32.mrf.mxu0  ;;  %v5880_v37 = vpop.f32.mrf.mxu3 }
 0x145   : > { %8783 = vst [vmem:[#allocation44_spill] sm:$0xff] %v5865_v32 }
 0x146   : > { %8786 = vst [vmem:[#allocation47_spill] sm:$0xff] %v5880_v37  ;;  %v8807_v37 = vld [vmem:[#allocation19_spill] sm:$0xff] }
 0x14c   : > { %v5878_v1 = vpop.f32.mrf.mxu0  ;;  %v5893_v33 = vpop.f32.mrf.mxu3 }
 0x14d   : > { %8785 = vst [vmem:[#allocation46_spill] sm:$0xff] %v5878_v1 }
 0x14e   : > { %8788 = vst [vmem:[#allocation49_spill] sm:$0xff] %v5893_v33  ;;  %v8811_v33 = vld [vmem:[#allocation28_spill] sm:$0xff] }
 0x14f   : > { %v6003_v31 = vadd.f32 %v8811_v33, %v8810_v39 }
 0x153   : > { %4181 = vmatmul.msk.bf16.gmra.mxu0 %vm1455_vm13, %v5870_v59 }
 0x154   : > { %4131 = vmatmul.msk.bf16.gmra.mxu3 %vm532_vm1, %v5293_v48  ;;  %v5887_v23 = vpop.f32.mrf.mxu0  ;;  %v5902_v52 = vpop.f32.mrf.mxu3 }
 0x155   : > { %8787 = vst [vmem:[#allocation48_spill] sm:$0xff] %v5887_v23 }
 0x156   : > { %8790 = vst [vmem:[#allocation51_spill] sm:$0xff] %v5902_v52 }
 0x15c   : > { %v5895_v48 = vpop.f32.mrf.mxu0 }
 0x15d   : > { %8789 = vst [vmem:[#allocation50_spill] sm:$0xff] %v5895_v48 }
 0x163   : > { %4182 = vmatmul.msk.bf16.gmra.mxu0 %vm1455_vm13, %v5885_v22 }
 0x164   : > { %4132 = vmatmul.msk.bf16.gmra.mxu3 %vm532_vm1, %v5309_v50  ;;  %v5908_v16 = vpop.f32.mrf.mxu0  ;;  %v5910_v50 = vpop.f32.mrf.mxu3 }
 0x165   : > { %8791 = vst [vmem:[#allocation52_spill] sm:$0xff] %v5908_v16 }
 0x166   : > { %8792 = vst [vmem:[#allocation53_spill] sm:$0xff] %v5910_v50  ;;  %v8809_v50 = vld [vmem:[#allocation24_spill] sm:$0xff] }
 0x16c   : > { %v5917_v15 = vpop.f32.mrf.mxu0  ;;  %v5921_v18 = vpop.f32.mrf.mxu3 }
 0x16d   : > { %8793 = vst [vmem:[#allocation54_spill] sm:$0xff] %v5917_v15 }
 0x16e   : > { %8794 = vst [vmem:[#allocation55_spill] sm:$0xff] %v5921_v18 }
 0x173   : > { %4183 = vmatmul.msk.bf16.gmra.mxu0 %vm1455_vm13, %v5900_v60 }
 0x174   : > { %4133 = vmatmul.msk.bf16.gmra.mxu3 %vm532_vm1, %v5174_v17  ;;  %v5925_v17 = vpop.f32.mrf.mxu0 }
 0x175   : > { %8795 = vst [vmem:[#allocation56_spill] sm:$0xff] %v5925_v17 }
 0x17c   : > { %v5934_v5 = vpop.f32.mrf.mxu0 }
 0x17d   : > { %8796 = vst [vmem:[#allocation57_spill] sm:$0xff] %v5934_v5  ;;  %v657_v5 = vpop.f32.mrf.mxu1 }
 0x183   : > { %4184 = vmatmul.msk.bf16.gmra.mxu0 %vm1455_vm13, %v5915_v58 }
 0x184   : > { %4134 = vmatmul.msk.bf16.gmra.mxu3 %vm532_vm1, %v5210_v25  ;;  %v5936_v36 = vpop.f32.mrf.mxu0 }
 0x185   : > { %8797 = vst [vmem:[#allocation58_spill] sm:$0xff] %v5936_v36  ;;  %v660_v15 = vpop.f32.mrf.mxu1 }
 0x18c   : > { %v5945_v25 = vpop.f32.mrf.mxu0 }
 0x18d   : > { %8798 = vst [vmem:[#allocation59_spill] sm:$0xff] %v5945_v25  ;;  %v643_v25 = vadd.f32 %v5426_v46, %v5362_v62  ;;  %v662_v23 = vpop.f32.mrf.mxu1 }
 0x193   : > { %4185 = vmatmul.msk.bf16.gmra.mxu0 %vm1455_vm13, %v5930_v34 }
 0x195   : > { %v665_v14 = vpop.f32.mrf.mxu1 }
 0x1a3   : > { %4186 = vmatmul.msk.bf16.gmra.mxu0 %vm1455_vm13, %v5941_v53 }
 0x1b0   : > { %v1489_v19 = vpop.f32.mrf.mxu0 }
 0x1b1   : > { %v1529_v35 = vadd.f32 %v1489_v19, %v641_v12  ;;  %v651_v12 = vadd.f32 %v650_v47, %v5380_v8 }
 0x1b3   : > { %v4187_v19 = vmul.f32 -1.442695, %v1529_v35  ;;  %v8800_v35 = vld [vmem:[#allocation11_spill] sm:$0xff] }
 0x1b5   : > { %4466 = vpow2.f32 %v4187_v19 }
 0x1b8   : > { %v1491_v38 = vpop.f32.mrf.mxu0 }
 0x1b9   : > { %v1530_v27 = vadd.f32 %v1491_v38, %v643_v25  ;;  %v8799_v25 = vld [vmem:[#allocation23_spill] sm:$0xff] }
 0x1ba   : > { %v661_v38 = vadd.f32 %v660_v15, %v8799_v25  ;;  %v8803_v15 = vld [vmem:[#allocation18_spill] sm:$0xff] }
 0x1bb   : > { %v4188_v1 = vmul.f32 -1.442695, %v1530_v27  ;;  %v4467_v55 = vpop.eup %4466 }
 0x1bc   : > { %v5956_v47 = vadd.f32 1.0, %v4467_v55 }
 0x1bd   : > { %4468 = vpow2.f32 %v4188_v1  ;;  %v8802_v1 = vld [vmem:[#allocation29_spill] sm:$0xff] }
 0x1be   : > { %vm1598_vm0 = vweird.f32 %v5956_v47 }
 0x1c0   : > { %v1494_v54 = vpop.f32.mrf.mxu0 }
 0x1c1   : > { %v1531_v21 = vadd.f32 %v1494_v54, %v646_v29  ;;  %v653_v54 = vadd.f32 %v652_v13, %v5382_v9 }
 0x1c3   : > { %v4189_v48 = vmul.f32 -1.442695, %v1531_v21  ;;  %v4469_v46 = vpop.eup %4468 }
 0x1c4   : > { %v5961_v13 = vadd.f32 1.0, %v4469_v46  ;;  %v8804_v46 = vld [vmem:[#allocation13_spill] sm:$0xff] }
 0x1c5   : > { %v658_v24 = vadd.f32 %v657_v5, %v8804_v46 }
 0x1c6   : > { %v1619_v51 = vand.u32 2147483648, %v5961_v13  ;;  %vm1613_vm2 = vweird.f32 %v5961_v13 }
 0x1c8   : > { %v1496_v40 = vpop.f32.mrf.mxu0 }
 0x1d0   : > { %v1499_v28 = vpop.f32.mrf.mxu0 }
 0x1d1   : > { %v1533_v16 = vadd.f32 %v1499_v28, %v651_v12  ;;  %v656_v28 = vadd.f32 %v655_v4, %v8800_v35 }
 0x1d3   : > { %v4191_v29 = vmul.f32 -1.442695, %v1533_v16  ;;  %v8801_v16 = vld [vmem:[#allocation12_spill] sm:$0xff] }
 0x1d4   : > { %v648_v19 = vadd.f32 %v8802_v1, %v8801_v16 }
 0x1d5   : > { %4470 = vpow2.f32 %v4191_v29 }
 0x1d6   : > { %4472 = vpow2.f32 %v4189_v48 }
 0x1d7   : > { %4474 = vrcp.f32 %v5956_v47 }
 0x1d8   : > { %v1501_v36 = vpop.f32.mrf.mxu0 }
 0x1d9   : > { %v1534_v32 = vadd.f32 %v1501_v36, %v653_v54  ;;  %v1532_v36 = vadd.f32 %v1496_v40, %v648_v19 }
 0x1db   : > { %v4192_v27 = vmul.f32 -1.442695, %v1534_v32  ;;  %v4471_v12 = vpop.eup %4470  ;;  %v663_v32 = vadd.f32 %v662_v23, %v8803_v15  ;;  %v4190_v1 = vmul.f32 -1.442695, %v1532_v36 }
 0x1dc   : > { %v5964_v54 = vadd.f32 1.0, %v4471_v12  ;;  %v4473_v55 = vpop.eup %4472 }
 0x1dd   : > { %4476 = vpow2.f32 %v4192_v27  ;;  %v5972_v40 = vpop.eup %4474 }
 0x1de   : > { %4478 = vrcp.f32 %v5961_v13  ;;  %v1594_v23 = vmul.f32 %v5972_v40, %v5956_v47  ;;  %vm1599_vm1 = vweird.f32 %v5972_v40  ;;  %v1664_v15 = vand.u32 2147483648, %v5964_v54 }
 0x1df   : > { %4480 = vrcp.f32 %v5964_v54  ;;  %vm6049_vm10 = vmor %vm1598_vm0, %vm1599_vm1  ;;  %vm1658_vm12 = vweird.f32 %v5964_v54 }
 0x1e0   : > { %v1504_v17 = vpop.f32.mrf.mxu0  ;;  %v1665_v25 = vor.u32 1.1754944e-38, %v1664_v15 }
 0x1e1   : > { %v1535_v29 = vadd.f32 %v1504_v17, %v656_v28 }
 0x1e3   : > { %v4193_v4 = vmul.f32 -1.442695, %v1535_v29 }
 0x1e8   : > { %v1506_v41 = vpop.f32.mrf.mxu0 }
 0x1e9   : > { %v1536_v28 = vadd.f32 %v1506_v41, %v658_v24  ;;  %v8805_v24 = vld [vmem:[#allocation15_spill] sm:$0xff] }
 0x1ea   : > { %v666_v41 = vadd.f32 %v665_v14, %v8805_v24  ;;  %v8806_v14 = vld [vmem:[#allocation22_spill] sm:$0xff] }
 0x1f0   : > { %v1509_v30 = vpop.f32.mrf.mxu0 }
 0x1f1   : > { %v1537_v21 = vadd.f32 %v1509_v30, %v661_v38  ;;  %v5969_v30 = vadd.f32 1.0, %v4473_v55  ;;  %v4477_v38 = vpop.eup %4476 }
 0x1f2   : > { %v5974_v27 = vpop.eup %4478  ;;  %v5979_v12 = vadd.f32 1.0, %v4477_v38 }
 0x1f3   : > { %v4195_v48 = vmul.f32 -1.442695, %v1537_v21  ;;  %v5981_v19 = vpop.eup %4480  ;;  %v4194_v21 = vmul.f32 -1.442695, %v1536_v28  ;;  %vm1614_vm8 = vweird.f32 %v5974_v27  ;;  %vm1628_vm9 = vweird.f32 %v5969_v30 }
 0x1f4   : > { %v1654_v28 = vmul.f32 %v5981_v19, %v5964_v54  ;;  %vm6070_vm6 = vmor %vm1613_vm2, %vm1614_vm8  ;;  %vm1659_vm7 = vweird.f32 %v5981_v19  ;;  %vm1673_vm8 = vweird.f32 %v5979_v12 }
 0x1f5   : > { %4482 = vpow2.f32 %v4195_v48  ;;  %v1595_v48 = vsub.f32 1.0, %v1594_v23  ;;  %v671_v23 = vadd.f32 %v8807_v37, %v8806_v14  ;;  %vm6096_vm14 = vmor %vm1658_vm12, %vm1659_vm7 }
 0x1f6   : > { %4484 = vpow2.f32 %v4193_v4  ;;  %v667_v4 = vpop.f32.mrf.mxu1 }
 0x1f7   : > { %4486 = vpow2.f32 %v4190_v1  ;;  %v5986_v1 = vstv %s1391_s20  ;;  %v1596_v37 = vmul.f32 %v5972_v40, %v1595_v48  ;;  %s3914_s20 = sld [smem:[#allocation3]] }
 0x1f8   : > { %v1511_v49 = vpop.f32.mrf.mxu0  ;;  %4488 = vrcp.f32 %v5969_v30  ;;  %v6021_v33 = vmul.f32 %v5986_v1, %v5829_v3  ;;  %v1604_v3 = vand.u32 2147483648, %v5956_v47 }
 0x1f9   : > { %v1538_v17 = vadd.f32 %v1511_v49, %v663_v32  ;;  %v1609_v49 = vmul.f32 %v5974_v27, %v5961_v13  ;;  %v1597_v39 = vadd.f32 %v5972_v40, %v1596_v37 }
 0x1fb   : > { %v4196_v5 = vmul.f32 -1.442695, %v1538_v17  ;;  %v4483_v36 = vpop.eup %4482  ;;  %v1610_v11 = vsub.f32 1.0, %v1609_v49  ;;  %v8812_v49 = vld [vmem:[#allocation27_spill] sm:$0xff] }
 0x1fc   : > { %v4485_v55 = vpop.eup %4484  ;;  %v5993_v18 = vadd.f32 1.0, %v4483_v36 }
 0x1fd   : > { %4490 = vpow2.f32 %v4196_v5  ;;  %v4487_v32 = vpop.eup %4486  ;;  %v8808_v5 = vld [vmem:[#allocation26_spill] sm:$0xff]  ;;  %v1611_v48 = vmul.f32 %v5974_v27, %v1610_v11 }
 0x1fe   : > { %4492 = vrcp.f32 %v5979_v12  ;;  %v5989_v38 = vpop.eup %4488  ;;  %v5999_v52 = vadd.f32 %v8809_v50, %v8808_v5  ;;  %v6012_v43 = vadd.f32 1.0, %v4487_v32  ;;  %v6017_v50 = vmul.f32 %v5986_v1, %v5831_v63 }
 0x1ff   : > { %4494 = vpow2.f32 %v4194_v21  ;;  %v8814_v21 = vld [vmem:[#allocation17_spill] sm:$0xff]  ;;  %v1617_v63 = vand.u32 2147483647, %v5961_v13  ;;  %v1612_v24 = vadd.f32 %v5974_v27, %v1611_v48  ;;  %v1620_v48 = vor.u32 1.1754944e-38, %v1619_v51 }
 0x200   : > { %v1514_v29 = vpop.f32.mrf.mxu0  ;;  %v668_v36 = vadd.f32 %v667_v4, %v8814_v21  ;;  %4496 = vrcp.f32 %v5993_v18  ;;  %v1602_v4 = vand.u32 2147483647, %v5956_v47  ;;  %v1605_v47 = vor.u32 1.1754944e-38, %v1604_v3 }
 0x201   : > { %v1539_v17 = vadd.f32 %v1514_v29, %v666_v41  ;;  %v6005_v29 = vadd.f32 1.0, %v4485_v55  ;;  %v8813_v41 = vld [vmem:[#allocation31_spill] sm:$0xff]  ;;  %v1624_v55 = vmul.f32 %v5989_v38, %v5969_v30  ;;  %vm6063_vm3 = vcmp.eq.f32.partialorder %v1617_v63, 8.507059e+37 }
 0x202   : > { %v6009_v42 = vadd.f32 %v8813_v41, %v8812_v49  ;;  %v1655_v49 = vsub.f32 1.0, %v1654_v28  ;;  %vm6053_vm15 = vcmp.eq.f32.partialorder %v1602_v4, 8.507059e+37  ;;  %v1632_v3 = vand.u32 2147483647, %v5969_v30 }
 0x203   : > { %v4197_v26 = vmul.f32 -1.442695, %v1539_v17  ;;  %v4491_v41 = vpop.eup %4490  ;;  %4498 = vrcp.f32 %v6005_v29  ;;  %v1625_v5 = vsub.f32 1.0, %v1624_v55  ;;  %v1616_v37 = vsel %vm6070_vm6, %v5974_v27, %v1612_v24 }
 0x204   : > { %v6028_v21 = vpop.eup %4492  ;;  %4500 = vrcp.f32 %v6012_v43  ;;  %v6037_v11 = vadd.f32 1.0, %v4491_v41  ;;  %v1656_v61 = vmul.f32 %v5981_v19, %v1655_v49  ;;  %v1601_v41 = vsel %vm6049_vm10, %v5972_v40, %v1597_v39 }
 0x205   : > { %v4495_v17 = vpop.eup %4494  ;;  %4502 = vpow2.f32 %v4197_v26  ;;  %v1669_v14 = vmul.f32 %v6028_v21, %v5979_v12  ;;  %v1626_v13 = vmul.f32 %v5989_v38, %v1625_v5  ;;  %vm1629_vm4 = vweird.f32 %v5989_v38 }
 0x206   : > { %v6058_v49 = vpop.eup %4496  ;;  %4504 = vrcp.f32 %v6037_v11  ;;  %v1657_v63 = vadd.f32 %v5981_v19, %v1656_v61  ;;  %v1662_v61 = vand.u32 2147483647, %v5964_v54  ;;  %v1606_v54 = vsel %vm6053_vm15, %v1605_v47, %v1601_v41  ;;  %vm6119_vm1 = vmor %vm1628_vm9, %vm1629_vm4 }
 0x207   : > { %v1670_v40 = vsub.f32 1.0, %v1669_v14  ;;  %v1714_v5 = vmul.f32 %v6058_v49, %v5993_v18  ;;  %vm6113_vm11 = vcmp.eq.f32.partialorder %v1632_v3, 8.507059e+37  ;;  %v1649_v3 = vand.u32 2147483648, %v6012_v43 }
 0x208   : > { %v1516_v32 = vpop.f32.mrf.mxu0  ;;  %vm1663_vm5 = vcmp.eq.f32.partialorder %v1662_v61, 8.507059e+37  ;;  %vm1674_vm0 = vweird.f32 %v6028_v21  ;;  %vm1719_vm2 = vweird.f32 %v6058_v49  ;;  %vm1718_vm6 = vweird.f32 %v5993_v18 }
 0x209   : > { %v1540_v28 = vadd.f32 %v1516_v32, %v668_v36  ;;  %v6045_v36 = vadd.f32 1.0, %v4495_v17  ;;  %v6067_v17 = vpop.eup %4498  ;;  %v1671_v4 = vmul.f32 %v6028_v21, %v1670_v40  ;;  %v1715_v9 = vsub.f32 1.0, %v1714_v5  ;;  %vm6143_vm10 = vmor %vm1673_vm8, %vm1674_vm0 }
 0x20a   : > { %v6077_v39 = vpop.eup %4500  ;;  %v1684_v14 = vmul.f32 %v6067_v17, %v6005_v29  ;;  %vm1688_vm7 = vweird.f32 %v6005_v29  ;;  %vm6174_vm12 = vmor %vm1718_vm6, %vm1719_vm2  ;;  %vm1733_vm0 = vweird.f32 %v6037_v11 }
 0x20b   : > { %v4198_v55 = vmul.f32 -1.442695, %v1540_v28  ;;  %v1634_v28 = vand.u32 2147483648, %v5969_v30  ;;  %v4503_v46 = vpop.eup %4502  ;;  %4506 = vrcp.f32 %v6045_v36  ;;  %v1639_v27 = vmul.f32 %v6077_v39, %v6012_v43 }
 0x20c   : > { %v6110_v35 = vpop.eup %4504  ;;  %v1716_v5 = vmul.f32 %v6058_v49, %v1715_v9  ;;  %vm1644_vm4 = vweird.f32 %v6077_v39  ;;  %vm1703_vm8 = vweird.f32 %v6045_v36 }
 0x20d   : > { %4508 = vpow2.f32 %v4198_v55  ;;  %v1661_v55 = vsel %vm6096_vm14, %v5981_v19, %v1657_v63  ;;  %v1635_v19 = vor.u32 1.1754944e-38, %v1634_v28  ;;  %v1640_v15 = vsub.f32 1.0, %v1639_v27 }
 0x20e   : > { %v1666_v41 = vsel %vm1663_vm5, %v1665_v25, %v1661_v55  ;;  %v1729_v32 = vmul.f32 %v6110_v35, %v6037_v11  ;;  %v1672_v63 = vadd.f32 %v6028_v21, %v1671_v4  ;;  %v1679_v25 = vand.u32 2147483648, %v5979_v12 }
 0x20f   : > { %v1777_v61 = vmul.f32 %v1666_v41, %v5764_v10  ;;  %v1641_v9 = vmul.f32 %v6077_v39, %v1640_v15  ;;  %vm1734_vm5 = vweird.f32 %v6110_v35 }
 0x210   : > { %v1519_v51 = vpop.f32.mrf.mxu0  ;;  %v1680_v55 = vor.u32 1.1754944e-38, %v1679_v25 }
 0x211   : > { %v1541_v16 = vadd.f32 %v1519_v51, %v671_v23  ;;  %v1627_v23 = vadd.f32 %v5989_v38, %v1626_v13  ;;  %v6103_v51 = vadd.f32 1.0, %v4503_v46  ;;  %v1685_v13 = vsub.f32 1.0, %v1684_v14  ;;  %v6123_v47 = vpop.eup %4506 }
 0x212   : > { %v1621_v46 = vsel %vm6063_vm3, %v1620_v48, %v1616_v37  ;;  %v1699_v24 = vmul.f32 %v6123_v47, %v6045_v36  ;;  %vm1689_vm3 = vweird.f32 %v6067_v17 }
 0x213   : > { %4510 = vtanh.f32 %v1541_v16  ;;  %v1631_v30 = vsel %vm6119_vm1, %v5989_v38, %v1627_v23  ;;  %v4509_v40 = vpop.eup %4508  ;;  %v1677_v38 = vand.u32 2147483647, %v5979_v12  ;;  %v1686_v14 = vmul.f32 %v6067_v17, %v1685_v13  ;;  %vm6181_vm14 = vmor %vm1688_vm7, %vm1689_vm3 }
 0x214   : > { %4512 = vrcp.f32 %v6103_v51  ;;  %v1730_v12 = vsub.f32 1.0, %v1729_v32  ;;  %v6154_v4 = vadd.f32 1.0, %v4509_v40  ;;  %v1717_v13 = vadd.f32 %v6058_v49, %v1716_v5 }
 0x215   : > { %vm1678_vm15 = vcmp.eq.f32.partialorder %v1677_v38, 8.507059e+37  ;;  %v1687_v26 = vadd.f32 %v6067_v17, %v1686_v14  ;;  %v1700_v15 = vsub.f32 1.0, %v1699_v24 }
 0x216   : > { %v1721_v38 = vsel %vm6174_vm12, %v6058_v49, %v1717_v13  ;;  %v1739_v13 = vand.u32 2147483648, %v6037_v11 }
 0x217   : > { %v1701_v24 = vmul.f32 %v6123_v47, %v1700_v15 }
 0x218   : > { %v1521_v48 = vpop.f32.mrf.mxu0 }
 0x219   : > { %v4511_v28 = vpop.eup %4510  ;;  %v1542_v37 = vadd.f32 %v1521_v48, %v5999_v52  ;;  %v6149_v52 = vsel %vm6113_vm11, %v1635_v19, %v1631_v30  ;;  %v1724_v19 = vand.u32 2147483648, %v5993_v18  ;;  %v1694_v30 = vand.u32 2147483648, %v6005_v29 }
 0x21a   : > { %v1781_v27 = vmul.f32 %v4511_v28, %v1606_v54  ;;  %v1676_v54 = vsel %vm6143_vm10, %v6028_v21, %v1672_v63  ;;  %v6163_v16 = vpop.eup %4512  ;;  %v1722_v21 = vand.u32 2147483647, %v5993_v18  ;;  %v1731_v48 = vmul.f32 %v6110_v35, %v1730_v12  ;;  %vm6217_vm10 = vmor %vm1733_vm0, %vm1734_vm5 }
 0x21b   : > { %4514 = vtanh.f32 %v1542_v37  ;;  %v1681_v41 = vsel %vm1678_vm15, %v1680_v55, %v1676_v54  ;;  %v1744_v18 = vmul.f32 %v6163_v16, %v6103_v51  ;;  %v1692_v37 = vand.u32 2147483647, %v6005_v29 }
 0x21c   : > { %v6156_v10 = vadd.f32 %v1781_v27, %v1777_v61  ;;  %v1778_v5 = vmul.f32 %v1681_v41, %v5749_v20  ;;  %v1691_v61 = vsel %vm6181_vm14, %v6067_v17, %v1687_v26  ;;  %v1725_v27 = vor.u32 1.1754944e-38, %v1724_v19  ;;  %v6214_v26 = vpop.f32.mrf.mxu1 }
 0x21d   : > { %vm1723_vm9 = vcmp.eq.f32.partialorder %v1722_v21, 8.507059e+37  ;;  %vm1643_vm11 = vweird.f32 %v6012_v43  ;;  %v1732_v49 = vadd.f32 %v6110_v35, %v1731_v48  ;;  %v1695_v17 = vor.u32 1.1754944e-38, %v1694_v30  ;;  %8835 = vst [vmem:[#allocation29_spill] sm:$0xff] %v6214_v26 }
 0x21e   : > { %4516 = vtanh.f32 %v6156_v10  ;;  %v1726_v20 = vsel %vm1723_vm9, %v1725_v27, %v1721_v38  ;;  %v1642_v12 = vadd.f32 %v6077_v39, %v1641_v9  ;;  %vm1693_vm1 = vcmp.eq.f32.partialorder %v1692_v37, 8.507059e+37  ;;  %vm6258_vm6 = vmor %vm1643_vm11, %vm1644_vm4 }
 0x21f   : > { %4518 = vrcp.f32 %v6154_v4  ;;  %v1696_v19 = vsel %vm1693_vm1, %v1695_v17, %v1691_v61  ;;  %v1737_v9 = vand.u32 2147483647, %v6037_v11  ;;  %v1709_v21 = vand.u32 2147483648, %v6045_v36 }
 0x220   : > { %v1524_v40 = vpop.f32.mrf.mxu0  ;;  %vm1704_vm15 = vweird.f32 %v6123_v47  ;;  %v1736_v32 = vsel %vm6217_vm10, %v6110_v35, %v1732_v49  ;;  %v1707_v38 = vand.u32 2147483647, %v6045_v36  ;;  %v1647_v35 = vand.u32 2147483647, %v6012_v43 }
 0x221   : > { %v4515_v63 = vpop.eup %4514  ;;  %v1543_v25 = vadd.f32 %v1524_v40, %v6003_v31  ;;  %v6199_v31 = vstv %s6152_s21  ;;  %v1702_v40 = vadd.f32 %v6123_v47, %v1701_v24  ;;  %vm6245_vm2 = vmor %vm1703_vm8, %vm1704_vm15  ;;  %vm1738_vm3 = vcmp.eq.f32.partialorder %v1737_v9, 8.507059e+37 }
 0x222   : > { %v1782_v14 = vmul.f32 %v4515_v63, %v1621_v46  ;;  %v1745_v46 = vsub.f32 1.0, %v1744_v18  ;;  %vm1749_vm7 = vweird.f32 %v6163_v16  ;;  %vm1708_vm12 = vcmp.eq.f32.partialorder %v1707_v38, 8.507059e+37 }
 0x223   : > { %4520 = vtanh.f32 %v1543_v25  ;;  %v1779_v25 = vmul.f32 %v1696_v19, %v5751_v7  ;;  %vm1748_vm14 = vweird.f32 %v6103_v51  ;;  %v1752_v49 = vand.u32 2147483647, %v6103_v51 }
 0x224   : > { %v4517_v29 = vpop.eup %4516  ;;  %v6201_v23 = vadd.f32 %v1782_v14, %v1778_v5  ;;  %v1746_v63 = vmul.f32 %v6163_v16, %v1745_v46  ;;  %v1740_v5 = vor.u32 1.1754944e-38, %v1739_v13  ;;  %v1650_v14 = vor.u32 1.1754944e-38, %v1649_v3  ;;  %vm1750_vm9 = vmor %vm1748_vm14, %vm1749_vm7  ;;  %v6272_v13 = vpop.f32.mrf.mxu1 }
 0x225   : > { %v6207_v54 = vmul.f32 %v4517_v29, %v1726_v20  ;;  %v6209_v55 = vpop.eup %4518  ;;  %v1754_v20 = vand.u32 2147483648, %v6103_v51  ;;  %vm1648_vm4 = vcmp.eq.f32.partialorder %v1647_v35, 8.507059e+37  ;;  %8842 = vst [vmem:[#allocation19_spill] sm:$0xff] %v6272_v13  ;;  %vm1753_vm11 = vcmp.eq.f32.partialorder %v1752_v49, 8.507059e+37 }
 0x226   : > { %4522 = vtanh.f32 %v6201_v23  ;;  %v1759_v11 = vmul.f32 %v6209_v55, %v6154_v4  ;;  %v1741_v27 = vsel %vm1738_vm3, %v1740_v5, %v1736_v32  ;;  %v1747_v3 = vadd.f32 %v6163_v16, %v1746_v63 }
 0x227   : > { %v1799_v41 = vmul.f32 %v6199_v31, %v6207_v54  ;;  %vm1764_vm5 = vweird.f32 %v6209_v55  ;;  %vm1763_vm1 = vweird.f32 %v6154_v4 }
 0x228   : > { %v1526_v30 = vpop.f32.mrf.mxu0  ;;  %v1760_v24 = vsub.f32 1.0, %v1759_v11  ;;  %vm1765_vm0 = vmor %vm1763_vm1, %vm1764_vm5 }
 0x229   : > { %v4521_v48 = vpop.eup %4520  ;;  %v1544_v28 = vadd.f32 %v1526_v30, %v6009_v42  ;;  %v6235_v18 = vadd.f32 %v1799_v41, %v6017_v50  ;;  %v1706_v50 = vsel %vm6245_vm2, %v6123_v47, %v1702_v40  ;;  %v1646_v47 = vsel %vm6258_vm6, %v6077_v39, %v1642_v12 }
 0x22a   : > { %v1783_v37 = vmul.f32 %v4521_v48, %v6149_v52  ;;  %v1710_v52 = vor.u32 1.1754944e-38, %v1709_v21  ;;  %v1761_v19 = vmul.f32 %v6209_v55, %v1760_v24  ;;  %v1651_v15 = vsel %vm1648_vm4, %v1650_v14, %v1646_v47  ;;  %v8857_v24 = vld [vmem:[#allocation16_spill] sm:$0xff]  ;;  %v721_v47 = vpop.f32.mrf.mxu2 }
 0x22b   : > { %4524 = vtanh.f32 %v1544_v28  ;;  %v1751_v39 = vsel %vm1750_vm9, %v6163_v16, %v1747_v3  ;;  %v1755_v21 = vor.u32 1.1754944e-38, %v1754_v20  ;;  %v1769_v16 = vand.u32 2147483648, %v6154_v4  ;;  %v8858_v20 = vld [vmem:[#allocation25_spill] sm:$0xff] }
 0x22c   : > { %v4523_v42 = vpop.eup %4522  ;;  %v6249_v7 = vadd.f32 %v1783_v37, %v1779_v25  ;;  %v1711_v43 = vsel %vm1708_vm12, %v1710_v52, %v1706_v50  ;;  %v1762_v32 = vadd.f32 %v6209_v55, %v1761_v19  ;;  %v6294_v37 = vpop.f32.mrf.mxu1  ;;  %v712_v36 = vadd.f32 %v8857_v24, %v5353_v56 }
 0x22d   : > { %v1794_v29 = vmul.f32 %v4523_v42, %v1741_v27  ;;  %v1780_v9 = vmul.f32 %v1711_v43, %v5760_v45  ;;  %v1756_v40 = vsel %vm1753_vm11, %v1755_v21, %v1751_v39  ;;  %v1767_v45 = vand.u32 2147483647, %v6154_v4  ;;  %8843 = vst [vmem:[#allocation24_spill] sm:$0xff] %v6294_v37 }
 0x22e   : > { %4526 = vtanh.f32 %v6249_v7  ;;  %v1766_v11 = vsel %vm1765_vm0, %v6209_v55, %v1762_v32  ;;  %v1770_v25 = vor.u32 1.1754944e-38, %v1769_v16  ;;  %v717_v43 = vadd.f32 %v8858_v20, %v5355_v57  ;;  %v8863_v20 = vld [vmem:[#allocation12_spill] sm:$0xff] }
 0x22f   : > { %v1800_v17 = vmul.f32 %v6199_v31, %v1794_v29  ;;  %vm1768_vm8 = vcmp.eq.f32.partialorder %v1767_v45, 8.507059e+37  ;;  %v1823_v55 = vpack.c.bf16 %v1794_v29, %v6207_v54 }
 0x230   : > { %v1771_v5 = vsel %vm1768_vm8, %v1770_v25, %v1766_v11  ;;  %v8860_v11 = vld [vmem:[#allocation14_spill] sm:$0xff] }
 0x231   : > { %v4525_v46 = vpop.eup %4524  ;;  %v6277_v12 = vadd.f32 %v1800_v17, %v6021_v33  ;;  %v1395_v33 = vmul.f32 %v5986_v1, %v5821_v0  ;;  %v1396_v0 = vmul.f32 %v5986_v1, %v5823_v6 }
 0x232   : > { %v1784_v41 = vmul.f32 %v4525_v46, %v1651_v15  ;;  %v723_v17 = vpop.f32.mrf.mxu2 }
 0x233   : > { %v724_v25 = vadd.f32 %v723_v17, %v8860_v11 }
 0x234   : > { %v4527_v51 = vpop.eup %4526  ;;  %v6280_v30 = vadd.f32 %v1784_v41, %v1780_v9  ;;  %v6302_v42 = vpop.f32.mrf.mxu1  ;;  %v8859_v9 = vld [vmem:[#allocation20_spill] sm:$0xff] }
 0x235   : > { %v1795_v48 = vmul.f32 %v4527_v51, %v1756_v40  ;;  %8844 = vst [vmem:[#allocation28_spill] sm:$0xff] %v6302_v42  ;;  %v714_v41 = vadd.f32 %v8859_v9, %v5362_v62  ;;  %v722_v40 = vadd.f32 %v721_v47, %v5380_v8 }
 0x236   : > { %4528 = vtanh.f32 %v6280_v30 }
 0x237   : > { %v1801_v63 = vmul.f32 %v6199_v31, %v1795_v48 }
 0x239   : > { %v6292_v28 = vadd.f32 %v1801_v63, %v1395_v33 }
 0x23a   : > { %v726_v15 = vpop.f32.mrf.mxu2 }
 0x23c   : > { %v4529_v38 = vpop.eup %4528  ;;  %v6306_v50 = vpop.f32.mrf.mxu1 }
 0x23d   : > { %v1796_v35 = vmul.f32 %v4529_v38, %v1771_v5  ;;  %8845 = vst [vmem:[#allocation31_spill] sm:$0xff] %v6306_v50 }
 0x23f   : > { %v1802_v14 = vmul.f32 %v6199_v31, %v1796_v35  ;;  %v1824_v4 = vpack.c.bf16 %v1796_v35, %v1795_v48 }
 0x241   : > { %v6299_v61 = vadd.f32 %v1802_v14, %v1396_v0  ;;  %1831 = vmatpush.bf16.msra.mxu1 %v1824_v4 }
 0x244   : > { %v6310_v6 = vpop.f32.mrf.mxu1 }
 0x245   : > { %1832 = vmatpush.bf16.msra.mxu1 %v1823_v55  ;;  %8846 = vst [vmem:[#allocation60_spill] sm:$0xff] %v6310_v6  ;;  %v8861_v55 = vld [vmem:[#allocation23_spill] sm:$0xff] }
 0x248   : > { %4200 = vmatmul.msk.bf16.vlgmr.msra.gmra.mxu1 %vm1455_vm13, %v5838_v2 }
 0x24c   : > { %v6312_v1 = vpop.f32.mrf.mxu1 }
 0x24d   : > { %8847 = vst [vmem:[#allocation61_spill] sm:$0xff] %v6312_v1 }
 0x254   : > { %v6316_v31 = vpop.f32.mrf.mxu1 }
 0x255   : > { %8848 = vst [vmem:[#allocation62_spill] sm:$0xff] %v6316_v31 }
 0x258   : > { %4201 = vmatmul.msk.bf16.gmra.mxu1 %vm1455_vm13, %v5855_v44 }
 0x25c   : > { %v6318_v54 = vpop.f32.mrf.mxu1 }
 0x25d   : > { %8849 = vst [vmem:[#allocation63_spill] sm:$0xff] %v6318_v54 }
 0x264   : > { %v6322_v2 = vpop.f32.mrf.mxu1 }
 0x265   : > { %8850 = vst [vmem:[#allocation64_spill] sm:$0xff] %v6322_v2 }
 0x268   : > { %4202 = vmatmul.msk.bf16.gmra.mxu1 %vm1455_vm13, %v5870_v59 }
 0x26c   : > { %v6326_v44 = vpop.f32.mrf.mxu1 }
 0x26d   : > { %8851 = vst [vmem:[#allocation65_spill] sm:$0xff] %v6326_v44 }
 0x274   : > { %v6328_v52 = vpop.f32.mrf.mxu1 }
 0x275   : > { %8852 = vst [vmem:[#allocation66_spill] sm:$0xff] %v6328_v52 }
 0x278   : > { %4203 = vmatmul.msk.bf16.gmra.mxu1 %vm1455_vm13, %v5885_v22 }
 0x27c   : > { %v6332_v59 = vpop.f32.mrf.mxu1 }
 0x27d   : > { %8853 = vst [vmem:[#allocation67_spill] sm:$0xff] %v6332_v59  ;;  %v8876_v59 = vld [vmem:[#allocation39_spill] sm:$0xff] }
 0x284   : > { %v6336_v27 = vpop.f32.mrf.mxu1 }
 0x285   : > { %8854 = vst [vmem:[#allocation68_spill] sm:$0xff] %v6336_v27  ;;  %v8875_v27 = vld [vmem:[#allocation27_spill] sm:$0xff] }
 0x286   : > { %v6408_v52 = vadd.f32 %v8876_v59, %v8875_v27 }
 0x288   : > { %4204 = vmatmul.msk.bf16.gmra.mxu1 %vm1455_vm13, %v5900_v60 }
 0x28c   : > { %v6338_v22 = vpop.f32.mrf.mxu1 }
 0x28d   : > { %8855 = vst [vmem:[#allocation69_spill] sm:$0xff] %v6338_v22 }
 0x294   : > { %v6342_v60 = vpop.f32.mrf.mxu1 }
 0x295   : > { %8856 = vst [vmem:[#allocation70_spill] sm:$0xff] %v6342_v60 }
 0x298   : > { %4205 = vmatmul.msk.bf16.gmra.mxu1 %vm1455_vm13, %v5915_v58 }
 0x2a8   : > { %4206 = vmatmul.msk.bf16.gmra.mxu1 %vm1455_vm13, %v5930_v34 }
 0x2b8   : > { %4207 = vmatmul.msk.bf16.gmra.mxu1 %vm1455_vm13, %v5941_v53  ;;  %v728_v53 = vpop.f32.mrf.mxu2 }
 0x2c0   : > { %v731_v16 = vpop.f32.mrf.mxu2 }
 0x2c1   : > { %v732_v24 = vadd.f32 %v731_v16, %v8861_v55 }
 0x2c5   : > { %v1834_v3 = vpop.f32.mrf.mxu1 }
 0x2c6   : > { %v1874_v29 = vadd.f32 %v1834_v3, %v712_v36  ;;  %v8862_v3 = vld [vmem:[#allocation11_spill] sm:$0xff] }
 0x2c8   : > { %v4208_v32 = vmul.f32 -1.442695, %v1874_v29  ;;  %v733_v14 = vpop.f32.mrf.mxu2  ;;  %v727_v29 = vadd.f32 %v726_v15, %v8862_v3  ;;  %v8865_v15 = vld [vmem:[#allocation18_spill] sm:$0xff] }
 0x2ca   : > { %4530 = vpow2.f32 %v4208_v32 }
 0x2cd   : > { %v1836_v58 = vpop.f32.mrf.mxu1 }
 0x2ce   : > { %v1875_v51 = vadd.f32 %v1836_v58, %v714_v41 }
 0x2d0   : > { %v4209_v33 = vmul.f32 -1.442695, %v1875_v51  ;;  %v4531_v5 = vpop.eup %4530 }
 0x2d1   : > { %v6353_v36 = vadd.f32 1.0, %v4531_v5 }
 0x2d2   : > { %4532 = vpow2.f32 %v4209_v33  ;;  %v8866_v33 = vld [vmem:[#allocation13_spill] sm:$0xff] }
 0x2d3   : > { %v1949_v59 = vand.u32 2147483648, %v6353_v36  ;;  %vm1943_vm15 = vweird.f32 %v6353_v36 }
 0x2d5   : > { %v1839_v34 = vpop.f32.mrf.mxu1 }
 0x2d6   : > { %v1876_v49 = vadd.f32 %v1839_v34, %v717_v43  ;;  %v8864_v43 = vld [vmem:[#allocation30_spill] sm:$0xff] }
 0x2d7   : > { %v719_v34 = vadd.f32 %v8864_v43, %v8863_v20 }
 0x2d8   : > { %v4210_v38 = vmul.f32 -1.442695, %v1876_v49  ;;  %v4533_v0 = vpop.eup %4532 }
 0x2d9   : > { %v6358_v17 = vadd.f32 1.0, %v4533_v0 }
 0x2db   : > { %v1964_v42 = vand.u32 2147483648, %v6358_v17  ;;  %vm1958_vm7 = vweird.f32 %v6358_v17 }
 0x2dd   : > { %v1841_v46 = vpop.f32.mrf.mxu1 }
 0x2e5   : > { %v1844_v19 = vpop.f32.mrf.mxu1 }
 0x2e6   : > { %v1878_v48 = vadd.f32 %v1844_v19, %v722_v40  ;;  %v734_v40 = vadd.f32 %v733_v14, %v8865_v15 }
 0x2e8   : > { %v4212_v63 = vmul.f32 -1.442695, %v1878_v48 }
 0x2ea   : > { %4534 = vpow2.f32 %v4212_v63  ;;  %v729_v63 = vadd.f32 %v728_v53, %v8866_v33 }
 0x2eb   : > { %4536 = vpow2.f32 %v4210_v38 }
 0x2ec   : > { %4538 = vrcp.f32 %v6353_v36 }
 0x2ed   : > { %v1846_v39 = vpop.f32.mrf.mxu1 }
 0x2ee   : > { %v1879_v35 = vadd.f32 %v1846_v39, %v724_v25  ;;  %v1877_v39 = vadd.f32 %v1841_v46, %v719_v34  ;;  %v736_v25 = vpop.f32.mrf.mxu2 }
 0x2f0   : > { %v4213_v58 = vmul.f32 -1.442695, %v1879_v35  ;;  %v4535_v47 = vpop.eup %4534  ;;  %v4211_v16 = vmul.f32 -1.442695, %v1877_v39 }
 0x2f1   : > { %v6361_v9 = vadd.f32 1.0, %v4535_v47  ;;  %v4537_v41 = vpop.eup %4536 }
 0x2f2   : > { %4540 = vpow2.f32 %v4213_v58  ;;  %v6366_v38 = vadd.f32 1.0, %v4537_v41 }
 0x2f3   : > { %4542 = vrcp.f32 %v6358_v17  ;;  %v2009_v37 = vand.u32 2147483648, %v6361_v9  ;;  %vm2003_vm9 = vweird.f32 %v6361_v9 }
 0x2f4   : > { %4544 = vrcp.f32 %v6361_v9  ;;  %vm1973_vm1 = vweird.f32 %v6366_v38 }
 0x2f5   : > { %v1849_v21 = vpop.f32.mrf.mxu1 }
 0x2f6   : > { %v1880_v19 = vadd.f32 %v1849_v21, %v727_v29  ;;  %v6369_v21 = vpop.eup %4538 }
 0x2f7   : > { %v1939_v14 = vmul.f32 %v6369_v21, %v6353_v36  ;;  %vm1944_vm10 = vweird.f32 %v6369_v21 }
 0x2f8   : > { %v4214_v32 = vmul.f32 -1.442695, %v1880_v19  ;;  %v4541_v5 = vpop.eup %4540  ;;  %vm6436_vm3 = vmor %vm1943_vm15, %vm1944_vm10 }
 0x2f9   : > { %v6371_v0 = vpop.eup %4542  ;;  %v1940_v19 = vsub.f32 1.0, %v1939_v14  ;;  %v8871_v14 = vld [vmem:[#allocation35_spill] sm:$0xff] }
 0x2fa   : > { %v1954_v29 = vmul.f32 %v6371_v0, %v6358_v17  ;;  %vm1959_vm2 = vweird.f32 %v6371_v0 }
 0x2fb   : > { %v1941_v22 = vmul.f32 %v6369_v21, %v1940_v19  ;;  %vm6457_vm14 = vmor %vm1958_vm7, %vm1959_vm2 }
 0x2fd   : > { %v1851_v45 = vpop.f32.mrf.mxu1  ;;  %v1942_v2 = vadd.f32 %v6369_v21, %v1941_v22 }
 0x2fe   : > { %v1881_v35 = vadd.f32 %v1851_v45, %v729_v63  ;;  %v8867_v45 = vld [vmem:[#allocation15_spill] sm:$0xff]  ;;  %v8868_v63 = vld [vmem:[#allocation22_spill] sm:$0xff] }
 0x2ff   : > { %v737_v34 = vadd.f32 %v736_v25, %v8867_v45 }
 0x300   : > { %v4215_v58 = vmul.f32 -1.442695, %v1881_v35  ;;  %v8870_v35 = vld [vmem:[#allocation26_spill] sm:$0xff] }
 0x305   : > { %v1854_v4 = vpop.f32.mrf.mxu1 }
 0x306   : > { %v1882_v49 = vadd.f32 %v1854_v4, %v732_v24  ;;  %v6376_v4 = vadd.f32 1.0, %v4541_v5  ;;  %v6378_v24 = vpop.eup %4544 }
 0x307   : > { %vm2004_vm4 = vweird.f32 %v6378_v24 }
 0x308   : > { %v4216_v51 = vmul.f32 -1.442695, %v1882_v49  ;;  %vm6483_vm11 = vmor %vm2003_vm9, %vm2004_vm4  ;;  %vm2018_vm2 = vweird.f32 %v6376_v4 }
 0x30a   : > { %4546 = vpow2.f32 %v4216_v51 }
 0x30b   : > { %4548 = vpow2.f32 %v4214_v32  ;;  %v1955_v32 = vsub.f32 1.0, %v1954_v29 }
 0x30c   : > { %4550 = vpow2.f32 %v4211_v16 }
 0x30d   : > { %v1856_v48 = vpop.f32.mrf.mxu1  ;;  %4552 = vrcp.f32 %v6366_v38  ;;  %v1956_v31 = vmul.f32 %v6371_v0, %v1955_v32 }
 0x30e   : > { %v1883_v46 = vadd.f32 %v1856_v48, %v734_v40  ;;  %v738_v40 = vpop.f32.mrf.mxu2  ;;  %v1999_v48 = vmul.f32 %v6378_v24, %v6361_v9 }
 0x30f   : > { %v1957_v13 = vadd.f32 %v6371_v0, %v1956_v31 }
 0x310   : > { %v4217_v53 = vmul.f32 -1.442695, %v1883_v46  ;;  %v4547_v43 = vpop.eup %4546  ;;  %v8869_v46 = vld [vmem:[#allocation33_spill] sm:$0xff]  ;;  %v2000_v44 = vsub.f32 1.0, %v1999_v48 }
 0x311   : > { %v4549_v49 = vpop.eup %4548  ;;  %v6388_v16 = vadd.f32 1.0, %v4547_v43  ;;  %v742_v25 = vadd.f32 %v8869_v46, %v8868_v63  ;;  %v1961_v22 = vsel %vm6457_vm14, %v6371_v0, %v1957_v13 }
 0x312   : > { %4554 = vpow2.f32 %v4217_v53  ;;  %v4551_v39 = vpop.eup %4550  ;;  %v6392_v5 = vadd.f32 1.0, %v4549_v49  ;;  %v6396_v53 = vadd.f32 %v8871_v14, %v8870_v35  ;;  %v2001_v54 = vmul.f32 %v6378_v24, %v2000_v44 }
 0x313   : > { %4556 = vrcp.f32 %v6376_v4  ;;  %v6384_v51 = vpop.eup %4552  ;;  %v6402_v29 = vadd.f32 1.0, %v4551_v39  ;;  %v1947_v39 = vand.u32 2147483647, %v6353_v36  ;;  %v1950_v44 = vor.u32 1.1754944e-38, %v1949_v59 }
 0x314   : > { %4558 = vpow2.f32 %v4215_v58  ;;  %v8874_v58 = vld [vmem:[#allocation17_spill] sm:$0xff]  ;;  %v1969_v49 = vmul.f32 %v6384_v51, %v6366_v38  ;;  %v1977_v59 = vand.u32 2147483647, %v6366_v38  ;;  %vm1974_vm5 = vweird.f32 %v6384_v51 }
 0x315   : > { %v1859_v47 = vpop.f32.mrf.mxu1  ;;  %v739_v43 = vadd.f32 %v738_v40, %v8874_v58  ;;  %4560 = vrcp.f32 %v6388_v16  ;;  %v1962_v40 = vand.u32 2147483647, %v6358_v17  ;;  %vm6440_vm6 = vcmp.eq.f32.partialorder %v1947_v39, 8.507059e+37  ;;  %vm6506_vm10 = vmor %vm1973_vm1, %vm1974_vm5 }
 0x316   : > { %v1884_v41 = vadd.f32 %v1859_v47, %v737_v34  ;;  %v8872_v47 = vld [vmem:[#allocation21_spill] sm:$0xff]  ;;  %4562 = vrcp.f32 %v6392_v5  ;;  %v1970_v1 = vsub.f32 1.0, %v1969_v49  ;;  %vm6500_vm0 = vcmp.eq.f32.partialorder %v1977_v59, 8.507059e+37 }
 0x317   : > { %v8873_v34 = vld [vmem:[#allocation37_spill] sm:$0xff]  ;;  %4564 = vrcp.f32 %v6402_v29  ;;  %vm6450_vm12 = vcmp.eq.f32.partialorder %v1962_v40, 8.507059e+37  ;;  %v2002_v40 = vadd.f32 %v6378_v24, %v2001_v54  ;;  %v2007_v54 = vand.u32 2147483647, %v6361_v9 }
 0x318   : > { %v6400_v60 = vadd.f32 %v8873_v34, %v8872_v47  ;;  %v4218_v46 = vmul.f32 -1.442695, %v1884_v41  ;;  %v4555_v14 = vpop.eup %4554  ;;  %v1971_v17 = vmul.f32 %v6384_v51, %v1970_v1  ;;  %v2010_v47 = vor.u32 1.1754944e-38, %v2009_v37 }
 0x319   : > { %v6415_v19 = vpop.eup %4556  ;;  %v6424_v32 = vadd.f32 1.0, %v4555_v14  ;;  %vm2008_vm8 = vcmp.eq.f32.partialorder %v2007_v54, 8.507059e+37  ;;  %v1994_v59 = vand.u32 2147483648, %v6402_v29  ;;  %vm2063_vm14 = vweird.f32 %v6388_v16 }
 0x31a   : > { %v4559_v41 = vpop.eup %4558  ;;  %4566 = vpow2.f32 %v4218_v46  ;;  %v2014_v6 = vmul.f32 %v6415_v19, %v6376_v4  ;;  %v1946_v46 = vsel %vm6436_vm3, %v6369_v21, %v1942_v2  ;;  %vm2019_vm15 = vweird.f32 %v6415_v19 }
 0x31b   : > { %v6445_v36 = vpop.eup %4560  ;;  %4568 = vrcp.f32 %v6424_v32  ;;  %v1951_v9 = vsel %vm6440_vm6, %v1950_v44, %v1946_v46  ;;  %vm6530_vm3 = vmor %vm2018_vm2, %vm2019_vm15  ;;  %vm2033_vm4 = vweird.f32 %v6392_v5  ;;  %vm2078_vm15 = vweird.f32 %v6424_v32 }
 0x31c   : > { %v2015_v21 = vsub.f32 1.0, %v2014_v6  ;;  %v2059_v1 = vmul.f32 %v6445_v36, %v6388_v16  ;;  %vm2064_vm7 = vweird.f32 %v6445_v36 }
 0x31d   : > { %v1861_v34 = vpop.f32.mrf.mxu1  ;;  %vm6561_vm9 = vmor %vm2063_vm14, %vm2064_vm7 }
 0x31e   : > { %v1885_v48 = vadd.f32 %v1861_v34, %v739_v43  ;;  %v6432_v43 = vadd.f32 1.0, %v4559_v41  ;;  %v1965_v34 = vor.u32 1.1754944e-38, %v1964_v42  ;;  %v6454_v41 = vpop.eup %4562  ;;  %v2016_v39 = vmul.f32 %v6415_v19, %v2015_v21 }
 0x31f   : > { %v6464_v2 = vpop.eup %4564  ;;  %v2029_v6 = vmul.f32 %v6454_v41, %v6392_v5  ;;  %v2060_v35 = vsub.f32 1.0, %v2059_v1 }
 0x320   : > { %v4219_v31 = vmul.f32 -1.442695, %v1885_v48  ;;  %v1979_v48 = vand.u32 2147483648, %v6366_v38  ;;  %v4567_v50 = vpop.eup %4566  ;;  %4570 = vrcp.f32 %v6432_v43  ;;  %v1984_v13 = vmul.f32 %v6464_v2, %v6402_v29 }
 0x321   : > { %v6497_v27 = vpop.eup %4568  ;;  %v2061_v1 = vmul.f32 %v6445_v36, %v2060_v35  ;;  %vm1989_vm5 = vweird.f32 %v6464_v2  ;;  %vm2048_vm2 = vweird.f32 %v6432_v43 }
 0x322   : > { %4572 = vpow2.f32 %v4219_v31  ;;  %v2006_v31 = vsel %vm6483_vm11, %v6378_v24, %v2002_v40  ;;  %v1980_v24 = vor.u32 1.1754944e-38, %v1979_v48  ;;  %v1985_v37 = vsub.f32 1.0, %v1984_v13 }
 0x323   : > { %v2011_v46 = vsel %vm2008_vm8, %v2010_v47, %v2006_v31  ;;  %v2074_v14 = vmul.f32 %v6497_v27, %v6424_v32  ;;  %v2017_v40 = vadd.f32 %v6415_v19, %v2016_v39  ;;  %v2024_v47 = vand.u32 2147483648, %v6376_v4 }
 0x324   : > { %v2122_v54 = vmul.f32 %v2011_v46, %v6156_v10  ;;  %v1986_v35 = vmul.f32 %v6464_v2, %v1985_v37  ;;  %vm2079_vm8 = vweird.f32 %v6497_v27 }
 0x325   : > { %v1864_v42 = vpop.f32.mrf.mxu1  ;;  %v2025_v31 = vor.u32 1.1754944e-38, %v2024_v47 }
 0x326   : > { %v1886_v26 = vadd.f32 %v1864_v42, %v742_v25  ;;  %v1972_v25 = vadd.f32 %v6384_v51, %v1971_v17  ;;  %v6490_v42 = vadd.f32 1.0, %v4567_v50  ;;  %v2030_v17 = vsub.f32 1.0, %v2029_v6  ;;  %v6510_v44 = vpop.eup %4570 }
 0x327   : > { %v1966_v50 = vsel %vm6450_vm12, %v1965_v34, %v1961_v22  ;;  %v2044_v0 = vmul.f32 %v6510_v44, %v6432_v43  ;;  %vm2034_vm12 = vweird.f32 %v6454_v41 }
 0x328   : > { %4574 = vtanh.f32 %v1886_v26  ;;  %v1976_v38 = vsel %vm6506_vm10, %v6384_v51, %v1972_v25  ;;  %v4573_v21 = vpop.eup %4572  ;;  %v2022_v51 = vand.u32 2147483647, %v6376_v4  ;;  %v2031_v6 = vmul.f32 %v6454_v41, %v2030_v17  ;;  %vm6568_vm11 = vmor %vm2033_vm4, %vm2034_vm12 }
 0x329   : > { %4576 = vrcp.f32 %v6490_v42  ;;  %v2075_v4 = vsub.f32 1.0, %v2074_v14  ;;  %v6541_v39 = vadd.f32 1.0, %v4573_v21  ;;  %v2062_v17 = vadd.f32 %v6445_v36, %v2061_v1 }
 0x32a   : > { %vm2023_vm6 = vcmp.eq.f32.partialorder %v2022_v51, 8.507059e+37  ;;  %v2032_v49 = vadd.f32 %v6454_v41, %v2031_v6  ;;  %v2045_v37 = vsub.f32 1.0, %v2044_v0 }
 0x32b   : > { %v2066_v51 = vsel %vm6561_vm9, %v6445_v36, %v2062_v17  ;;  %v2084_v17 = vand.u32 2147483648, %v6424_v32 }
 0x32c   : > { %v2046_v0 = vmul.f32 %v6510_v44, %v2045_v37 }
 0x32d   : > { %v1866_v34 = vpop.f32.mrf.mxu1 }
 0x32e   : > { %v4575_v48 = vpop.eup %4574  ;;  %v1887_v22 = vadd.f32 %v1866_v34, %v6396_v53  ;;  %v6536_v53 = vsel %vm6500_vm0, %v1980_v24, %v1976_v38  ;;  %v2069_v24 = vand.u32 2147483648, %v6388_v16  ;;  %v2039_v38 = vand.u32 2147483648, %v6392_v5 }
 0x32f   : > { %v2126_v13 = vmul.f32 %v4575_v48, %v1951_v9  ;;  %v2021_v9 = vsel %vm6530_vm3, %v6415_v19, %v2017_v40  ;;  %v6550_v26 = vpop.eup %4576  ;;  %v2067_v19 = vand.u32 2147483647, %v6388_v16  ;;  %v2076_v34 = vmul.f32 %v6497_v27, %v2075_v4  ;;  %vm6602_vm3 = vmor %vm2078_vm15, %vm2079_vm8 }
 0x330   : > { %4578 = vtanh.f32 %v1887_v22  ;;  %v2026_v46 = vsel %vm2023_vm6, %v2025_v31, %v2021_v9  ;;  %v2089_v16 = vmul.f32 %v6550_v26, %v6490_v42  ;;  %v2037_v22 = vand.u32 2147483647, %v6392_v5 }
 0x331   : > { %v6543_v10 = vadd.f32 %v2126_v13, %v2122_v54  ;;  %v2123_v1 = vmul.f32 %v2026_v46, %v6201_v23  ;;  %v2036_v54 = vsel %vm6568_vm11, %v6454_v41, %v2032_v49  ;;  %v2070_v13 = vor.u32 1.1754944e-38, %v2069_v24 }
 0x332   : > { %vm2068_vm1 = vcmp.eq.f32.partialorder %v2067_v19, 8.507059e+37  ;;  %vm1988_vm0 = vweird.f32 %v6402_v29  ;;  %v2077_v36 = vadd.f32 %v6497_v27, %v2076_v34  ;;  %v2040_v41 = vor.u32 1.1754944e-38, %v2039_v38 }
 0x333   : > { %4580 = vtanh.f32 %v6543_v10  ;;  %v2071_v23 = vsel %vm2068_vm1, %v2070_v13, %v2066_v51  ;;  %v1987_v4 = vadd.f32 %v6464_v2, %v1986_v35  ;;  %vm2038_vm10 = vcmp.eq.f32.partialorder %v2037_v22, 8.507059e+37  ;;  %v6639_v13 = vpop.f32.mrf.mxu2  ;;  %vm6645_vm14 = vmor %vm1988_vm0, %vm1989_vm5 }
 0x334   : > { %4582 = vrcp.f32 %v6541_v39  ;;  %v2041_v49 = vsel %vm2038_vm10, %v2040_v41, %v2036_v54  ;;  %v2082_v35 = vand.u32 2147483647, %v6424_v32  ;;  %v2054_v46 = vand.u32 2147483648, %v6432_v43  ;;  %8901 = vst [vmem:[#allocation16_spill] sm:$0xff] %v6639_v13 }
 0x335   : > { %v1869_v21 = vpop.f32.mrf.mxu1  ;;  %v2047_v38 = vadd.f32 %v6510_v44, %v2046_v0  ;;  %vm2049_vm6 = vweird.f32 %v6510_v44  ;;  %v2052_v22 = vand.u32 2147483647, %v6432_v43  ;;  %v2085_v51 = vor.u32 1.1754944e-38, %v2084_v17 }
 0x336   : > { %v4579_v40 = vpop.eup %4578  ;;  %v1888_v47 = vadd.f32 %v1869_v21, %v6400_v60  ;;  %v6586_v60 = vstv %s6539_s22  ;;  %v2081_v21 = vsel %vm6602_vm3, %v6497_v27, %v2077_v36  ;;  %v1992_v27 = vand.u32 2147483647, %v6402_v29  ;;  %vm6630_vm7 = vmor %vm2048_vm2, %vm2049_vm6 }
 0x337   : > { %v2127_v6 = vmul.f32 %v4579_v40, %v1966_v50  ;;  %v2090_v50 = vsub.f32 1.0, %v2089_v16  ;;  %v2124_v16 = vmul.f32 %v2041_v49, %v6249_v7  ;;  %vm2083_vm12 = vcmp.eq.f32.partialorder %v2082_v35, 8.507059e+37 }
 0x338   : > { %4584 = vtanh.f32 %v1888_v47  ;;  %v2086_v54 = vsel %vm2083_vm12, %v2085_v51, %v2081_v21  ;;  %vm2094_vm4 = vweird.f32 %v6550_v26  ;;  %vm2053_vm9 = vcmp.eq.f32.partialorder %v2052_v22, 8.507059e+37 }
 0x339   : > { %v4581_v5 = vpop.eup %4580  ;;  %v6588_v25 = vadd.f32 %v2127_v6, %v2123_v1  ;;  %v2091_v34 = vmul.f32 %v6550_v26, %v2090_v50  ;;  %v1995_v1 = vor.u32 1.1754944e-38, %v1994_v59  ;;  %vm2093_vm11 = vweird.f32 %v6490_v42 }
 0x33a   : > { %v6594_v9 = vmul.f32 %v4581_v5, %v2071_v23  ;;  %v6596_v31 = vpop.eup %4582  ;;  %v2099_v23 = vand.u32 2147483648, %v6490_v42  ;;  %v2097_v36 = vand.u32 2147483647, %v6490_v42  ;;  %vm1993_vm5 = vcmp.eq.f32.partialorder %v1992_v27, 8.507059e+37  ;;  %vm2095_vm1 = vmor %vm2093_vm11, %vm2094_vm4 }
 0x33b   : > { %4586 = vtanh.f32 %v6588_v25  ;;  %v2104_v32 = vmul.f32 %v6596_v31, %v6541_v39  ;;  %v2092_v0 = vadd.f32 %v6550_v26, %v2091_v34  ;;  %vm2109_vm8 = vweird.f32 %v6596_v31 }
 0x33c   : > { %v2144_v37 = vmul.f32 %v6586_v60, %v6594_v9  ;;  %vm2098_vm0 = vcmp.eq.f32.partialorder %v2097_v36, 8.507059e+37  ;;  %vm2108_vm10 = vweird.f32 %v6541_v39  ;;  %v6752_v36 = vld [vmem:[%s8665_s2 + $0x30] sm:$0xff] }
 0x33d   : > { %v1871_v19 = vpop.f32.mrf.mxu1  ;;  %v2105_v59 = vsub.f32 1.0, %v2104_v32  ;;  %v2096_v24 = vsel %vm2095_vm1, %v6550_v26, %v2092_v0  ;;  %v2114_v26 = vand.u32 2147483648, %v6541_v39  ;;  %vm2110_vm15 = vmor %vm2108_vm10, %vm2109_vm8  ;;  %v6732_v0 = vld [vmem:[%s8665_s2 + $0x20] sm:$0xff] }
 0x33e   : > { %v4585_v14 = vpop.eup %4584  ;;  %v1889_v40 = vadd.f32 %v1871_v19, %v6408_v52  ;;  %v6620_v48 = vadd.f32 %v2144_v37, %v6235_v18  ;;  %v2051_v52 = vsel %vm6630_vm7, %v6510_v44, %v2047_v38  ;;  %v1991_v44 = vsel %vm6645_vm14, %v6464_v2, %v1987_v4 }
 0x33f   : > { %v2128_v47 = vmul.f32 %v4585_v14, %v6536_v53  ;;  %v2055_v53 = vor.u32 1.1754944e-38, %v2054_v46  ;;  %v2106_v17 = vmul.f32 %v6596_v31, %v2105_v59  ;;  %v1996_v49 = vsel %vm1993_vm5, %v1995_v1, %v1991_v44  ;;  %v6741_v44 = vld [vmem:[%s8665_s2 + $0x28] sm:$0xff] }
 0x340   : > { %4588 = vtanh.f32 %v1889_v40  ;;  %v2100_v37 = vor.u32 1.1754944e-38, %v2099_v23  ;;  %v2115_v40 = vor.u32 1.1754944e-38, %v2114_v26 }
 0x341   : > { %v4587_v18 = vpop.eup %4586  ;;  %v6634_v7 = vadd.f32 %v2128_v47, %v2124_v16  ;;  %v2056_v29 = vsel %vm2053_vm9, %v2055_v53, %v2051_v52  ;;  %v2107_v38 = vadd.f32 %v6596_v31, %v2106_v17 }
 0x342   : > { %v2139_v5 = vmul.f32 %v4587_v18, %v2086_v54  ;;  %v2125_v4 = vmul.f32 %v2056_v29, %v6280_v30  ;;  %v2101_v19 = vsel %vm2098_vm0, %v2100_v37, %v2096_v24  ;;  %v2112_v30 = vand.u32 2147483647, %v6541_v39  ;;  %v6710_v18 = vld [vmem:[%s8665_s2 + $0x10] sm:$0xff]  ;;  %v6721_v54 = vld [vmem:[%s8665_s2 + $0x18] sm:$0xff] }
 0x343   : > { %4590 = vtanh.f32 %v6634_v7  ;;  %v2111_v34 = vsel %vm2110_vm15, %v6596_v31, %v2107_v38  ;;  %v8919_v24 = vld [vmem:[#allocation41_spill] sm:$0xff] }
 0x344   : > { %v2145_v41 = vmul.f32 %v6586_v60, %v2139_v5  ;;  %vm2113_vm2 = vcmp.eq.f32.partialorder %v2112_v30, 8.507059e+37  ;;  %v2168_v6 = vpack.c.bf16 %v2139_v5, %v6594_v9  ;;  %v8920_v38 = vld [vmem:[#allocation45_spill] sm:$0xff] }
 0x345   : > { %v2116_v47 = vsel %vm2113_vm2, %v2115_v40, %v2111_v34  ;;  %v8921_v40 = vld [vmem:[#allocation49_spill] sm:$0xff] }
 0x346   : > { %v4589_v50 = vpop.eup %4588  ;;  %v6662_v2 = vadd.f32 %v2145_v41, %v6277_v12  ;;  %v6671_v12 = vpop.f32.mrf.mxu2 }
 0x347   : > { %v2129_v35 = vmul.f32 %v4589_v50, %v1996_v49  ;;  %8904 = vst [vmem:[#allocation25_spill] sm:$0xff] %v6671_v12  ;;  %v6761_v50 = vld [vmem:[%s8665_s2 + $0x38] sm:$0xff] }
 0x349   : > { %v4591_v46 = vpop.eup %4590  ;;  %v6665_v42 = vadd.f32 %v2129_v35, %v2125_v4  ;;  %v783_v4 = vadd.f32 %v8919_v24, %v5353_v56  ;;  %v8922_v24 = vld [vmem:[#allocation43_spill] sm:$0xff] }
 0x34a   : > { %v2140_v21 = vmul.f32 %v4591_v46, %v2101_v19  ;;  %v802_v19 = vpop.f32.mrf.mxu3 }
 0x34b   : > { %4592 = vtanh.f32 %v6665_v42 }
 0x34c   : > { %v2146_v14 = vmul.f32 %v6586_v60, %v2140_v21 }
 0x34e   : > { %v6678_v32 = vadd.f32 %v2146_v14, %v6292_v28  ;;  %v6681_v1 = vpop.f32.mrf.mxu2  ;;  %v6690_v28 = vld [vmem:[%s8665_s2] sm:$0xff] }
 0x34f   : > { %8905 = vst [vmem:[#allocation20_spill] sm:$0xff] %v6681_v1 }
 0x351   : > { %v4593_v16 = vpop.eup %4592 }
 0x352   : > { %v2141_v22 = vmul.f32 %v4593_v16, %v2116_v47  ;;  %v804_v14 = vpop.f32.mrf.mxu3  ;;  %v793_v16 = vadd.f32 %v8921_v40, %v5380_v8  ;;  %v8923_v40 = vld [vmem:[#allocation51_spill] sm:$0xff] }
 0x354   : > { %v2147_v51 = vmul.f32 %v6586_v60, %v2141_v22  ;;  %v2169_v27 = vpack.c.bf16 %v2141_v22, %v2140_v21  ;;  %v788_v21 = vadd.f32 %v8920_v38, %v5355_v57 }
 0x356   : > { %v6684_v39 = vadd.f32 %v2147_v51, %v6299_v61  ;;  %2176 = vmatpush.bf16.msra.mxu2 %v2169_v27  ;;  %v6694_v31 = vpop.f32.mrf.mxu2  ;;  %v6701_v61 = vld [vmem:[%s8665_s2 + $0x8] sm:$0xff] }
 0x357   : > { %8906 = vst [vmem:[#allocation14_spill] sm:$0xff] %v6694_v31 }
 0x35a   : > { %2177 = vmatpush.bf16.msra.mxu2 %v2168_v6  ;;  %v6775_v51 = vpop.f32.mrf.mxu3 }
 0x35d   : > { %4221 = vmatmul.msk.bf16.vlgmr.msra.gmra.mxu2 %vm1455_vm13, %v6690_v28 }
 0x35e   : > { %v6696_v60 = vpop.f32.mrf.mxu2 }
 0x35f   : > { %8907 = vst [vmem:[#allocation30_spill] sm:$0xff] %v6696_v60 }
 0x362   : > { %v6777_v6 = vpop.f32.mrf.mxu3 }
 0x366   : > { %v6705_v9 = vpop.f32.mrf.mxu2 }
 0x367   : > { %8908 = vst [vmem:[#allocation33_spill] sm:$0xff] %v6705_v9  ;;  %v8928_v9 = vld [vmem:[#allocation21_spill] sm:$0xff] }
 0x36d   : > { %4222 = vmatmul.msk.bf16.gmra.mxu2 %vm1455_vm13, %v6701_v61 }
 0x36e   : > { %v6714_v52 = vpop.f32.mrf.mxu2 }
 0x36f   : > { %8909 = vst [vmem:[#allocation35_spill] sm:$0xff] %v6714_v52 }
 0x376   : > { %v6716_v53 = vpop.f32.mrf.mxu2 }
 0x377   : > { %8910 = vst [vmem:[#allocation37_spill] sm:$0xff] %v6716_v53 }
 0x37d   : > { %4223 = vmatmul.msk.bf16.gmra.mxu2 %vm1455_vm13, %v6710_v18 }
 0x37e   : > { %v6725_v59 = vpop.f32.mrf.mxu2 }
 0x37f   : > { %8911 = vst [vmem:[#allocation39_spill] sm:$0xff] %v6725_v59 }
 0x386   : > { %v6727_v43 = vpop.f32.mrf.mxu2 }
 0x387   : > { %8912 = vst [vmem:[#allocation71_spill] sm:$0xff] %v6727_v43 }
 0x38d   : > { %4224 = vmatmul.msk.bf16.gmra.mxu2 %vm1455_vm13, %v6721_v54 }
 0x38e   : > { %v6736_v5 = vpop.f32.mrf.mxu2 }
 0x38f   : > { %8913 = vst [vmem:[#allocation72_spill] sm:$0xff] %v6736_v5 }
 0x396   : > { %v6745_v23 = vpop.f32.mrf.mxu2 }
 0x397   : > { %8914 = vst [vmem:[#allocation73_spill] sm:$0xff] %v6745_v23 }
 0x39d   : > { %4225 = vmatmul.msk.bf16.gmra.mxu2 %vm1455_vm13, %v6732_v0 }
 0x39e   : > { %v6747_v29 = vpop.f32.mrf.mxu2 }
 0x39f   : > { %8915 = vst [vmem:[#allocation74_spill] sm:$0xff] %v6747_v29 }
 0x3a6   : > { %v6756_v41 = vpop.f32.mrf.mxu2 }
 0x3a7   : > { %8916 = vst [vmem:[#allocation75_spill] sm:$0xff] %v6756_v41 }
 0x3ad   : > { %4226 = vmatmul.msk.bf16.gmra.mxu2 %vm1455_vm13, %v6741_v44 }
 0x3ae   : > { %v6765_v17 = vpop.f32.mrf.mxu2 }
 0x3af   : > { %8917 = vst [vmem:[#allocation76_spill] sm:$0xff] %v6765_v17  ;;  %v6781_v17 = vpop.f32.mrf.mxu3 }
 0x3b6   : > { %v6767_v49 = vpop.f32.mrf.mxu2 }
 0x3b7   : > { %8918 = vst [vmem:[#allocation77_spill] sm:$0xff] %v6767_v49  ;;  %v814_v53 = vpop.f32.mrf.mxu3 }
 0x3bd   : > { %4227 = vmatmul.msk.bf16.gmra.mxu2 %vm1455_vm13, %v6752_v36 }
 0x3cd   : > { %4228 = vmatmul.msk.bf16.gmra.mxu2 %vm1455_vm13, %v6761_v50 }
 0x3e0   : > { %v2179_v35 = vpop.f32.mrf.mxu2 }
 0x3e1   : > { %v2219_v37 = vadd.f32 %v2179_v35, %v783_v4  ;;  %v785_v4 = vadd.f32 %v8922_v24, %v5362_v62 }
 0x3e3   : > { %v4229_v38 = vmul.f32 -1.442695, %v2219_v37 }
 0x3e5   : > { %4594 = vpow2.f32 %v4229_v38 }
 0x3e8   : > { %v2181_v46 = vpop.f32.mrf.mxu2 }
 0x3e9   : > { %v2220_v49 = vadd.f32 %v2181_v46, %v785_v4  ;;  %v803_v46 = vadd.f32 %v802_v19, %v8861_v55 }
 0x3eb   : > { %v4595_v29 = vpop.eup %4594 }
 0x3ec   : > { %v6786_v37 = vadd.f32 1.0, %v4595_v29 }
 0x3ee   : > { %vm2288_vm6 = vweird.f32 %v6786_v37 }
 0x3f0   : > { %v2184_v26 = vpop.f32.mrf.mxu2 }
 0x3f1   : > { %v2221_v30 = vadd.f32 %v2184_v26, %v788_v21  ;;  %v4230_v21 = vmul.f32 -1.442695, %v2220_v49  ;;  %v8924_v49 = vld [vmem:[#allocation53_spill] sm:$0xff] }
 0x3f2   : > { %v798_v4 = vadd.f32 %v8924_v49, %v8862_v3 }
 0x3f3   : > { %4596 = vpow2.f32 %v4230_v21  ;;  %v8925_v21 = vld [vmem:[#allocation47_spill] sm:$0xff] }
 0x3f8   : > { %v2186_v34 = vpop.f32.mrf.mxu2 }
 0x3f9   : > { %v4597_v5 = vpop.eup %4596 }
 0x400   : > { %v2189_v47 = vpop.f32.mrf.mxu2 }
 0x401   : > { %v2223_v22 = vadd.f32 %v2189_v47, %v793_v16  ;;  %v795_v16 = vadd.f32 %v8923_v40, %v8860_v11  ;;  %v4231_v47 = vmul.f32 -1.442695, %v2221_v30  ;;  %v790_v40 = vadd.f32 %v8925_v21, %v8863_v20 }
 0x402   : > { %v6792_v30 = vadd.f32 1.0, %v4597_v5  ;;  %v8926_v5 = vld [vmem:[#allocation55_spill] sm:$0xff] }
 0x403   : > { %v4233_v41 = vmul.f32 -1.442695, %v2223_v22  ;;  %v800_v21 = vadd.f32 %v8926_v5, %v8866_v33 }
 0x404   : > { %vm2303_vm4 = vweird.f32 %v6792_v30 }
 0x405   : > { %4598 = vpow2.f32 %v4233_v41 }
 0x406   : > { %4600 = vpow2.f32 %v4231_v47 }
 0x407   : > { %4602 = vrcp.f32 %v6786_v37 }
 0x408   : > { %v2191_v27 = vpop.f32.mrf.mxu2 }
 0x409   : > { %v2224_v23 = vadd.f32 %v2191_v27, %v795_v16  ;;  %v2222_v16 = vadd.f32 %v2186_v34, %v790_v40 }
 0x40b   : > { %v4234_v22 = vmul.f32 -1.442695, %v2224_v23  ;;  %v4599_v38 = vpop.eup %4598  ;;  %v805_v23 = vadd.f32 %v804_v14, %v8865_v15  ;;  %v4232_v31 = vmul.f32 -1.442695, %v2222_v16 }
 0x40c   : > { %v6795_v43 = vadd.f32 1.0, %v4599_v38  ;;  %v4601_v29 = vpop.eup %4600 }
 0x40d   : > { %4604 = vpow2.f32 %v4234_v22 }
 0x40e   : > { %4606 = vrcp.f32 %v6792_v30  ;;  %v2354_v33 = vand.u32 2147483648, %v6795_v43  ;;  %vm2348_vm1 = vweird.f32 %v6795_v43 }
 0x40f   : > { %4608 = vrcp.f32 %v6795_v43 }
 0x410   : > { %v2194_v35 = vpop.f32.mrf.mxu2  ;;  %v2355_v3 = vor.u32 1.1754944e-38, %v2354_v33 }
 0x411   : > { %v2225_v27 = vadd.f32 %v2194_v35, %v798_v4  ;;  %v6801_v35 = vadd.f32 1.0, %v4601_v29 }
 0x413   : > { %v4235_v47 = vmul.f32 -1.442695, %v2225_v27  ;;  %vm2318_vm10 = vweird.f32 %v6801_v35 }
 0x418   : > { %v2196_v26 = vpop.f32.mrf.mxu2 }
 0x419   : > { %v2226_v22 = vadd.f32 %v2196_v26, %v800_v21  ;;  %v808_v26 = vadd.f32 %v6775_v51, %v8867_v45  ;;  %v810_v51 = vadd.f32 %v6777_v6, %v8874_v58 }
 0x41b   : > { %v4236_v29 = vmul.f32 -1.442695, %v2226_v22 }
 0x420   : > { %v2199_v24 = vpop.f32.mrf.mxu2 }
 0x421   : > { %v2227_v41 = vadd.f32 %v2199_v24, %v803_v46  ;;  %v817_v24 = vpop.f32.mrf.mxu3  ;;  %v6804_v46 = vpop.eup %4602 }
 0x422   : > { %v4605_v4 = vpop.eup %4604  ;;  %v2284_v14 = vmul.f32 %v6804_v46, %v6786_v37  ;;  %v6839_v12 = vadd.f32 %v817_v24, %v8928_v9  ;;  %vm2289_vm3 = vweird.f32 %v6804_v46  ;;  %v2294_v24 = vand.u32 2147483648, %v6786_v37 }
 0x423   : > { %v4237_v19 = vmul.f32 -1.442695, %v2227_v41  ;;  %v6806_v38 = vpop.eup %4606  ;;  %v6811_v41 = vadd.f32 1.0, %v4605_v4  ;;  %vm6870_vm12 = vmor %vm2288_vm6, %vm2289_vm3 }
 0x424   : > { %v6813_v27 = vpop.eup %4608  ;;  %v2299_v16 = vmul.f32 %v6806_v38, %v6792_v30  ;;  %vm2304_vm7 = vweird.f32 %v6806_v38 }
 0x425   : > { %4610 = vpow2.f32 %v4237_v19  ;;  %v2344_v52 = vmul.f32 %v6813_v27, %v6795_v43  ;;  %vm6891_vm11 = vmor %vm2303_vm4, %vm2304_vm7  ;;  %vm2349_vm5 = vweird.f32 %v6813_v27  ;;  %vm2363_vm7 = vweird.f32 %v6811_v41 }
 0x426   : > { %4612 = vpow2.f32 %v4235_v47  ;;  %v2285_v47 = vsub.f32 1.0, %v2284_v14  ;;  %v2300_v4 = vsub.f32 1.0, %v2299_v16  ;;  %v813_v14 = vadd.f32 %v6781_v17, %v8868_v63  ;;  %vm6917_vm0 = vmor %vm2348_vm1, %vm2349_vm5 }
 0x427   : > { %4614 = vpow2.f32 %v4232_v31  ;;  %v2345_v1 = vsub.f32 1.0, %v2344_v52  ;;  %v2292_v17 = vand.u32 2147483647, %v6786_v37 }
 0x428   : > { %v2201_v49 = vpop.f32.mrf.mxu2  ;;  %4616 = vrcp.f32 %v6801_v35  ;;  %v2286_v16 = vmul.f32 %v6804_v46, %v2285_v47 }
 0x429   : > { %v2228_v34 = vadd.f32 %v2201_v49, %v805_v23  ;;  %vm6874_vm14 = vcmp.eq.f32.partialorder %v2292_v17, 8.507059e+37 }
 0x42a   : > { %v2287_v13 = vadd.f32 %v6804_v46, %v2286_v16 }
 0x42b   : > { %v4238_v40 = vmul.f32 -1.442695, %v2228_v34  ;;  %v4611_v23 = vpop.eup %4610  ;;  %v819_v34 = vpop.f32.mrf.mxu3 }
 0x42c   : > { %v4613_v31 = vpop.eup %4612  ;;  %v6824_v22 = vadd.f32 1.0, %v4611_v23 }
 0x42d   : > { %4618 = vpow2.f32 %v4238_v40  ;;  %v4615_v49 = vpop.eup %4614  ;;  %v6828_v59 = vadd.f32 1.0, %v4613_v31  ;;  %v8927_v40 = vld [vmem:[#allocation26_spill] sm:$0xff] }
 0x42e   : > { %4620 = vrcp.f32 %v6811_v41  ;;  %v6820_v21 = vpop.eup %4616 }
 0x42f   : > { %4622 = vpow2.f32 %v4236_v29  ;;  %v8929_v29 = vld [vmem:[#allocation27_spill] sm:$0xff]  ;;  %v2314_v6 = vmul.f32 %v6820_v21, %v6801_v35  ;;  %vm2319_vm8 = vweird.f32 %v6820_v21  ;;  %vm2378_vm5 = vweird.f32 %v6828_v59 }
 0x430   : > { %v2204_v19 = vpop.f32.mrf.mxu2  ;;  %v6842_v23 = vadd.f32 %v819_v34, %v8929_v29  ;;  %4624 = vrcp.f32 %v6824_v22  ;;  %v2307_v34 = vand.u32 2147483647, %v6792_v30  ;;  %v2309_v29 = vand.u32 2147483648, %v6792_v30  ;;  %vm6940_vm3 = vmor %vm2318_vm10, %vm2319_vm8 }
 0x431   : > { %v2229_v5 = vadd.f32 %v2204_v19, %v808_v26  ;;  %v6833_v19 = vadd.f32 %v814_v53, %v8927_v40  ;;  %v6835_v26 = vadd.f32 1.0, %v4615_v49  ;;  %v2301_v49 = vmul.f32 %v6806_v38, %v2300_v4 }
 0x432   : > { %4626 = vrcp.f32 %v6828_v59  ;;  %v2315_v9 = vsub.f32 1.0, %v2314_v6  ;;  %v2346_v40 = vmul.f32 %v6813_v27, %v2345_v1  ;;  %v2295_v1 = vor.u32 1.1754944e-38, %v2294_v24 }
 0x433   : > { %v4239_v31 = vmul.f32 -1.442695, %v2229_v5  ;;  %v4619_v60 = vpop.eup %4618  ;;  %4628 = vrcp.f32 %v6835_v26  ;;  %v2302_v58 = vadd.f32 %v6806_v38, %v2301_v49  ;;  %vm6884_vm9 = vcmp.eq.f32.partialorder %v2307_v34, 8.507059e+37 }
 0x434   : > { %v6849_v47 = vpop.eup %4620  ;;  %v6858_v4 = vadd.f32 1.0, %v4619_v60  ;;  %v2310_v49 = vor.u32 1.1754944e-38, %v2309_v29  ;;  %v2316_v30 = vmul.f32 %v6820_v21, %v2315_v9  ;;  %v2322_v24 = vand.u32 2147483647, %v6801_v35 }
 0x435   : > { %v4623_v5 = vpop.eup %4622  ;;  %4630 = vpow2.f32 %v4239_v31  ;;  %v2359_v63 = vmul.f32 %v6849_v47, %v6811_v41  ;;  %v2291_v31 = vsel %vm6870_vm12, %v6804_v46, %v2287_v13  ;;  %v2347_v34 = vadd.f32 %v6813_v27, %v2346_v40 }
 0x436   : > { %v6879_v37 = vpop.eup %4624  ;;  %4632 = vrcp.f32 %v6858_v4  ;;  %v2306_v16 = vsel %vm6891_vm11, %v6806_v38, %v2302_v58  ;;  %v2352_v40 = vand.u32 2147483647, %v6795_v43  ;;  %v2296_v43 = vsel %vm6874_vm14, %v2295_v1, %v2291_v31 }
 0x437   : > { %v2360_v46 = vsub.f32 1.0, %v2359_v63  ;;  %v2404_v9 = vmul.f32 %v6879_v37, %v6824_v22  ;;  %vm6934_vm15 = vcmp.eq.f32.partialorder %v2322_v24, 8.507059e+37  ;;  %v2339_v24 = vand.u32 2147483648, %v6835_v26 }
 0x438   : > { %v2206_v53 = vpop.f32.mrf.mxu2  ;;  %vm2353_vm2 = vcmp.eq.f32.partialorder %v2352_v40, 8.507059e+37  ;;  %vm2364_vm6 = vweird.f32 %v6849_v47  ;;  %vm2409_vm4 = vweird.f32 %v6879_v37  ;;  %vm2408_vm11 = vweird.f32 %v6824_v22 }
 0x439   : > { %v2230_v52 = vadd.f32 %v2206_v53, %v810_v51  ;;  %v6866_v51 = vadd.f32 1.0, %v4623_v5  ;;  %v6888_v5 = vpop.eup %4626  ;;  %v2361_v17 = vmul.f32 %v6849_v47, %v2360_v46  ;;  %v2405_v55 = vsub.f32 1.0, %v2404_v9  ;;  %vm6964_vm12 = vmor %vm2363_vm7, %vm2364_vm6 }
 0x43a   : > { %v6898_v13 = vpop.eup %4628  ;;  %v2374_v63 = vmul.f32 %v6888_v5, %v6828_v59  ;;  %vm6995_vm1 = vmor %vm2408_vm11, %vm2409_vm4  ;;  %vm2423_vm6 = vweird.f32 %v6858_v4 }
 0x43b   : > { %v4240_v6 = vmul.f32 -1.442695, %v2230_v52  ;;  %v2324_v52 = vand.u32 2147483648, %v6801_v35  ;;  %v4631_v45 = vpop.eup %4630  ;;  %4634 = vrcp.f32 %v6866_v51  ;;  %v2329_v58 = vmul.f32 %v6898_v13, %v6835_v26 }
 0x43c   : > { %v6931_v20 = vpop.eup %4632  ;;  %v2406_v9 = vmul.f32 %v6879_v37, %v2405_v55  ;;  %vm2334_vm8 = vweird.f32 %v6898_v13  ;;  %vm2393_vm7 = vweird.f32 %v6866_v51 }
 0x43d   : > { %4636 = vpow2.f32 %v4240_v6  ;;  %v2351_v6 = vsel %vm6917_vm0, %v6813_v27, %v2347_v34  ;;  %v2325_v27 = vor.u32 1.1754944e-38, %v2324_v52  ;;  %v2330_v33 = vsub.f32 1.0, %v2329_v58 }
 0x43e   : > { %v2356_v31 = vsel %vm2353_vm2, %v2355_v3, %v2351_v6  ;;  %v2419_v53 = vmul.f32 %v6931_v20, %v6858_v4  ;;  %v2362_v34 = vadd.f32 %v6849_v47, %v2361_v17  ;;  %v2369_v3 = vand.u32 2147483648, %v6811_v41 }
 0x43f   : > { %v2467_v40 = vmul.f32 %v2356_v31, %v6543_v10  ;;  %v2331_v55 = vmul.f32 %v6898_v13, %v2330_v33  ;;  %vm2424_vm2 = vweird.f32 %v6931_v20 }
 0x440   : > { %v2209_v29 = vpop.f32.mrf.mxu2  ;;  %v2370_v6 = vor.u32 1.1754944e-38, %v2369_v3 }
 0x441   : > { %v2231_v15 = vadd.f32 %v2209_v29, %v813_v14  ;;  %v2317_v14 = vadd.f32 %v6820_v21, %v2316_v30  ;;  %v6924_v29 = vadd.f32 1.0, %v4631_v45  ;;  %v2375_v30 = vsub.f32 1.0, %v2374_v63  ;;  %v6944_v1 = vpop.eup %4634 }
 0x442   : > { %v2311_v45 = vsel %vm6884_vm9, %v2310_v49, %v2306_v16  ;;  %v2389_v38 = vmul.f32 %v6944_v1, %v6866_v51  ;;  %vm2379_vm9 = vweird.f32 %v6888_v5 }
 0x443   : > { %4638 = vtanh.f32 %v2231_v15  ;;  %v2321_v35 = vsel %vm6940_vm3, %v6820_v21, %v2317_v14  ;;  %v4637_v46 = vpop.eup %4636  ;;  %v2367_v21 = vand.u32 2147483647, %v6811_v41  ;;  %v2376_v63 = vmul.f32 %v6888_v5, %v2375_v30  ;;  %vm7002_vm0 = vmor %vm2378_vm5, %vm2379_vm9 }
 0x444   : > { %4640 = vrcp.f32 %v6924_v29  ;;  %v2420_v41 = vsub.f32 1.0, %v2419_v53  ;;  %v6975_v17 = vadd.f32 1.0, %v4637_v46  ;;  %v2407_v30 = vadd.f32 %v6879_v37, %v2406_v9 }
 0x445   : > { %vm2368_vm14 = vcmp.eq.f32.partialorder %v2367_v21, 8.507059e+37  ;;  %v2377_v60 = vadd.f32 %v6888_v5, %v2376_v63  ;;  %v2390_v33 = vsub.f32 1.0, %v2389_v38 }
 0x446   : > { %v2411_v21 = vsel %vm6995_vm1, %v6879_v37, %v2407_v30  ;;  %v2429_v30 = vand.u32 2147483648, %v6858_v4 }
 0x447   : > { %v2391_v38 = vmul.f32 %v6944_v1, %v2390_v33 }
 0x448   : > { %v2211_v49 = vpop.f32.mrf.mxu2 }
 0x449   : > { %v4639_v52 = vpop.eup %4638  ;;  %v2232_v16 = vadd.f32 %v2211_v49, %v6833_v19  ;;  %v6970_v19 = vsel %vm6934_vm15, %v2325_v27, %v2321_v35  ;;  %v2414_v27 = vand.u32 2147483648, %v6824_v22  ;;  %v2384_v35 = vand.u32 2147483648, %v6828_v59 }
 0x44a   : > { %v2471_v58 = vmul.f32 %v4639_v52, %v2296_v43  ;;  %v2366_v43 = vsel %vm6964_vm12, %v6849_v47, %v2362_v34  ;;  %v6984_v15 = vpop.eup %4640  ;;  %v2412_v47 = vand.u32 2147483647, %v6824_v22  ;;  %v2421_v49 = vmul.f32 %v6931_v20, %v2420_v41  ;;  %vm7036_vm12 = vmor %vm2423_vm6, %vm2424_vm2 }
 0x44b   : > { %4642 = vtanh.f32 %v2232_v16  ;;  %v2371_v31 = vsel %vm2368_vm14, %v2370_v6, %v2366_v43  ;;  %v2434_v22 = vmul.f32 %v6984_v15, %v6924_v29  ;;  %v2382_v16 = vand.u32 2147483647, %v6828_v59 }
 0x44c   : > { %v6977_v10 = vadd.f32 %v2471_v58, %v2467_v40  ;;  %v2468_v9 = vmul.f32 %v2371_v31, %v6588_v25  ;;  %v2381_v40 = vsel %vm7002_vm0, %v6888_v5, %v2377_v60  ;;  %v2415_v58 = vor.u32 1.1754944e-38, %v2414_v27 }
 0x44d   : > { %vm2413_vm10 = vcmp.eq.f32.partialorder %v2412_v47, 8.507059e+37  ;;  %vm2333_vm15 = vweird.f32 %v6835_v26  ;;  %v2422_v37 = vadd.f32 %v6931_v20, %v2421_v49  ;;  %v2385_v5 = vor.u32 1.1754944e-38, %v2384_v35 }
 0x44e   : > { %4644 = vtanh.f32 %v6977_v10  ;;  %v2416_v25 = vsel %vm2413_vm10, %v2415_v58, %v2411_v21  ;;  %v2332_v41 = vadd.f32 %v6898_v13, %v2331_v55  ;;  %vm2383_vm3 = vcmp.eq.f32.partialorder %v2382_v16, 8.507059e+37  ;;  %v7073_v58 = vpop.f32.mrf.mxu3  ;;  %vm7079_vm11 = vmor %vm2333_vm15, %vm2334_vm8 }
 0x44f   : > { %4646 = vrcp.f32 %v6975_v17  ;;  %v2386_v60 = vsel %vm2383_vm3, %v2385_v5, %v2381_v40  ;;  %v2427_v55 = vand.u32 2147483647, %v6858_v4  ;;  %v2399_v31 = vand.u32 2147483648, %v6866_v51  ;;  %8954 = vst [vmem:[#allocation41_spill] sm:$0xff] %v7073_v58 }
 0x450   : > { %v2214_v46 = vpop.f32.mrf.mxu2  ;;  %v2392_v35 = vadd.f32 %v6944_v1, %v2391_v38  ;;  %vm2394_vm14 = vweird.f32 %v6944_v1  ;;  %v2397_v16 = vand.u32 2147483647, %v6866_v51  ;;  %v2430_v21 = vor.u32 1.1754944e-38, %v2429_v30 }
 0x451   : > { %v4643_v34 = vpop.eup %4642  ;;  %v2233_v3 = vadd.f32 %v2214_v46, %v6839_v12  ;;  %v7020_v12 = vstv %s6973_s25  ;;  %v2426_v46 = vsel %vm7036_vm12, %v6931_v20, %v2422_v37  ;;  %v2337_v20 = vand.u32 2147483647, %v6835_v26  ;;  %vm7064_vm4 = vmor %vm2393_vm7, %vm2394_vm14  ;;  %s3948_s25 = sshll.u32 %s361_s24, 4  ;;  %s3949_s25 = int_to_ptr.vmem [resolvable:$true] %s3948_s25 }
 0x452   : > { %v2472_v63 = vmul.f32 %v4643_v34, %v2311_v45  ;;  %v2435_v45 = vsub.f32 1.0, %v2434_v22  ;;  %v2469_v22 = vmul.f32 %v2386_v60, %v6634_v7  ;;  %vm2428_vm9 = vcmp.eq.f32.partialorder %v2427_v55, 8.507059e+37 }
 0x453   : > { %4648 = vtanh.f32 %v2233_v3  ;;  %v2431_v40 = vsel %vm2428_vm9, %v2430_v21, %v2426_v46  ;;  %vm2439_vm5 = vweird.f32 %v6984_v15  ;;  %vm2398_vm1 = vcmp.eq.f32.partialorder %v2397_v16, 8.507059e+37 }
 0x454   : > { %v4645_v59 = vpop.eup %4644  ;;  %v7022_v14 = vadd.f32 %v2472_v63, %v2468_v9  ;;  %v2436_v49 = vmul.f32 %v6984_v15, %v2435_v45  ;;  %v2340_v9 = vor.u32 1.1754944e-38, %v2339_v24  ;;  %vm2438_vm0 = vweird.f32 %v6924_v29 }
 0x455   : > { %v7028_v43 = vmul.f32 %v4645_v59, %v2416_v25  ;;  %v7030_v6 = vpop.eup %4646  ;;  %v2444_v25 = vand.u32 2147483648, %v6924_v29  ;;  %v2442_v37 = vand.u32 2147483647, %v6924_v29  ;;  %vm2338_vm8 = vcmp.eq.f32.partialorder %v2337_v20, 8.507059e+37  ;;  %vm2440_vm10 = vmor %vm2438_vm0, %vm2439_vm5 }
 0x456   : > { %4650 = vtanh.f32 %v7022_v14  ;;  %v2449_v4 = vmul.f32 %v7030_v6, %v6975_v17  ;;  %v2437_v38 = vadd.f32 %v6984_v15, %v2436_v49  ;;  %vm2454_vm2 = vweird.f32 %v7030_v6 }
 0x457   : > { %v2489_v33 = vmul.f32 %v7020_v12, %v7028_v43  ;;  %vm2443_vm15 = vcmp.eq.f32.partialorder %v2442_v37, 8.507059e+37  ;;  %vm2453_vm3 = vweird.f32 %v6975_v17  ;;  %v8974_v37 = vld [vmem:[#allocation40_spill] sm:$0xff] }
 0x458   : > { %v2216_v47 = vpop.f32.mrf.mxu2  ;;  %v2450_v24 = vsub.f32 1.0, %v2449_v4  ;;  %v2441_v27 = vsel %vm2440_vm10, %v6984_v15, %v2437_v38  ;;  %v2459_v15 = vand.u32 2147483648, %v6975_v17  ;;  %vm2455_vm6 = vmor %vm2453_vm3, %vm2454_vm2 }
 0x459   : > { %v4649_v53 = vpop.eup %4648  ;;  %v2234_v34 = vadd.f32 %v2216_v47, %v6842_v23  ;;  %v7054_v52 = vadd.f32 %v2489_v33, %v6620_v48  ;;  %v2396_v23 = vsel %vm7064_vm4, %v6944_v1, %v2392_v35  ;;  %v2336_v1 = vsel %vm7079_vm11, %v6898_v13, %v2332_v41 }
 0x45a   : > { %v2473_v3 = vmul.f32 %v4649_v53, %v6970_v19  ;;  %v2400_v19 = vor.u32 1.1754944e-38, %v2399_v31  ;;  %v2451_v30 = vmul.f32 %v7030_v6, %v2450_v24  ;;  %v2341_v60 = vsel %vm2338_vm8, %v2340_v9, %v2336_v1 }
 0x45b   : > { %4652 = vtanh.f32 %v2234_v34  ;;  %v2445_v33 = vor.u32 1.1754944e-38, %v2444_v25  ;;  %v2460_v34 = vor.u32 1.1754944e-38, %v2459_v15 }
 0x45c   : > { %v4651_v48 = vpop.eup %4650  ;;  %v7068_v7 = vadd.f32 %v2473_v3, %v2469_v22  ;;  %v2401_v26 = vsel %vm2398_vm1, %v2400_v19, %v2396_v23  ;;  %v2452_v35 = vadd.f32 %v7030_v6, %v2451_v30 }
 0x45d   : > { %v2484_v59 = vmul.f32 %v4651_v48, %v2431_v40  ;;  %v2470_v41 = vmul.f32 %v2401_v26, %v6665_v42  ;;  %v2446_v47 = vsel %vm2443_vm15, %v2445_v33, %v2441_v27  ;;  %v2457_v42 = vand.u32 2147483647, %v6975_v17  ;;  %v8972_v40 = vld [vmem:[#allocation32_spill] sm:$0xff] }
 0x45e   : > { %4654 = vtanh.f32 %v7068_v7  ;;  %v2456_v49 = vsel %vm2455_vm6, %v7030_v6, %v2452_v35  ;;  %v854_v24 = vadd.f32 %v8972_v40, %v5353_v56  ;;  %v8980_v40 = vld [vmem:[#allocation44_spill] sm:$0xff] }
 0x45f   : > { %v2490_v5 = vmul.f32 %v7020_v12, %v2484_v59  ;;  %vm2458_vm7 = vcmp.eq.f32.partialorder %v2457_v42, 8.507059e+37  ;;  %v2513_v63 = vpack.c.bf16 %v2484_v59, %v7028_v43  ;;  %v8973_v59 = vld [vmem:[#allocation36_spill] sm:$0xff] }
 0x460   : > { %v2461_v3 = vsel %vm2458_vm7, %v2460_v34, %v2456_v49  ;;  %v859_v1 = vadd.f32 %v8973_v59, %v5355_v57  ;;  %v8982_v59 = vld [vmem:[#allocation38_spill] sm:$0xff] }
 0x461   : > { %v4653_v45 = vpop.eup %4652  ;;  %v7096_v13 = vadd.f32 %v2490_v5, %v6662_v2  ;;  %v7105_v2 = vpop.f32.mrf.mxu3  ;;  %v864_v5 = vadd.f32 %v8974_v37, %v5380_v8 }
 0x462   : > { %v2474_v55 = vmul.f32 %v4653_v45, %v2341_v60  ;;  %8957 = vst [vmem:[#allocation45_spill] sm:$0xff] %v7105_v2  ;;  %v8975_v60 = vld [vmem:[#allocation34_spill] sm:$0xff] }
 0x463   : > { %v856_v27 = vadd.f32 %v8975_v60, %v5362_v62  ;;  %v8983_v60 = vld [vmem:[#allocation18_spill] sm:$0xff] }
 0x464   : > { %v4655_v31 = vpop.eup %4654  ;;  %v7099_v29 = vadd.f32 %v2474_v55, %v2470_v41 }
 0x465   : > { %v2485_v46 = vmul.f32 %v4655_v31, %v2446_v47 }
 0x466   : > { %4656 = vtanh.f32 %v7099_v29 }
 0x467   : > { %v2491_v53 = vmul.f32 %v7020_v12, %v2485_v46 }
 0x469   : > { %v7112_v4 = vadd.f32 %v2491_v53, %v6678_v32  ;;  %v7115_v9 = vpop.f32.mrf.mxu3 }
 0x46a   : > { %8958 = vst [vmem:[#allocation49_spill] sm:$0xff] %v7115_v9 }
 0x46c   : > { %v4657_v22 = vpop.eup %4656 }
 0x46d   : > { %v2486_v16 = vmul.f32 %v4657_v22, %v2461_v3  ;;  %v8977_v3 = vld [vmem:[#allocation23_spill] sm:$0xff] }
 0x46f   : > { %v2492_v21 = vmul.f32 %v7020_v12, %v2486_v16  ;;  %v2514_v20 = vpack.c.bf16 %v2486_v16, %v2485_v46  ;;  %v8976_v46 = vld [vmem:[#allocation42_spill] sm:$0xff]  ;;  %v8978_v16 = vld [vmem:[#allocation48_spill] sm:$0xff] }
 0x470   : > { %v866_v15 = vadd.f32 %v8976_v46, %v8860_v11  ;;  %v8985_v46 = vld [vmem:[#allocation13_spill] sm:$0xff] }
 0x471   : > { %v7118_v17 = vadd.f32 %v2492_v21, %v6684_v39  ;;  %2521 = vmatpush.bf16.msrb.mxu3 %v2514_v20  ;;  %v7123_v32 = vpop.f32.mrf.mxu3  ;;  %v874_v21 = vadd.f32 %v8978_v16, %v8977_v3 }
 0x472   : > { %8959 = vst [vmem:[#allocation43_spill] sm:$0xff] %v7123_v32 }
 0x475   : > { %2522 = vmatpush.bf16.msrb.mxu3 %v2513_v63  ;;  %v8979_v63 = vld [vmem:[#allocation11_spill] sm:$0xff] }
 0x478   : > { %4242 = vmatmul.msk.bf16.vlgmr.msrb.gmra.mxu3 %vm1455_vm13, %v6690_v28 }
 0x479   : > { %v7125_v6 = vpop.f32.mrf.mxu3 }
 0x47a   : > { %8960 = vst [vmem:[#allocation51_spill] sm:$0xff] %v7125_v6 }
 0x481   : > { %v7129_v12 = vpop.f32.mrf.mxu3 }
 0x482   : > { %8961 = vst [vmem:[#allocation53_spill] sm:$0xff] %v7129_v12 }
 0x488   : > { %4243 = vmatmul.msk.bf16.gmra.mxu3 %vm1455_vm13, %v6701_v61 }
 0x489   : > { %v7133_v39 = vpop.f32.mrf.mxu3 }
 0x48a   : > { %8962 = vst [vmem:[#allocation47_spill] sm:$0xff] %v7133_v39 }
 0x491   : > { %v7135_v48 = vpop.f32.mrf.mxu3 }
 0x492   : > { %8963 = vst [vmem:[#allocation55_spill] sm:$0xff] %v7135_v48 }
 0x498   : > { %4244 = vmatmul.msk.bf16.gmra.mxu3 %vm1455_vm13, %v6710_v18 }
 0x499   : > { %v7139_v28 = vpop.f32.mrf.mxu3 }
 0x49a   : > { %8964 = vst [vmem:[#allocation78_spill] sm:$0xff] %v7139_v28 }
 0x4a1   : > { %v7141_v43 = vpop.f32.mrf.mxu3 }
 0x4a2   : > { %8965 = vst [vmem:[#allocation79_spill] sm:$0xff] %v7141_v43 }
 0x4a8   : > { %4245 = vmatmul.msk.bf16.gmra.mxu3 %vm1455_vm13, %v6721_v54 }
 0x4a9   : > { %v7145_v61 = vpop.f32.mrf.mxu3 }
 0x4aa   : > { %8966 = vst [vmem:[#allocation80_spill] sm:$0xff] %v7145_v61 }
 0x4b1   : > { %v7149_v18 = vpop.f32.mrf.mxu3 }
 0x4b2   : > { %8967 = vst [vmem:[#allocation81_spill] sm:$0xff] %v7149_v18 }
 0x4b8   : > { %4246 = vmatmul.msk.bf16.gmra.mxu3 %vm1455_vm13, %v6732_v0 }
 0x4b9   : > { %v7151_v23 = vpop.f32.mrf.mxu3 }
 0x4ba   : > { %8968 = vst [vmem:[#allocation82_spill] sm:$0xff] %v7151_v23  ;;  %v8998_v23 = vld [vmem:[#allocation59_spill] sm:$0xff] }
 0x4c1   : > { %v7155_v54 = vpop.f32.mrf.mxu3 }
 0x4c2   : > { %8969 = vst [vmem:[#allocation83_spill] sm:$0xff] %v7155_v54  ;;  %v8997_v54 = vld [vmem:[#allocation27_spill] sm:$0xff] }
 0x4c8   : > { %4247 = vmatmul.msk.bf16.gmra.mxu3 %vm1455_vm13, %v6741_v44 }
 0x4c9   : > { %v7159_v19 = vpop.f32.mrf.mxu3 }
 0x4ca   : > { %8970 = vst [vmem:[#allocation84_spill] sm:$0xff] %v7159_v19  ;;  %v8995_v19 = vld [vmem:[#allocation21_spill] sm:$0xff] }
 0x4d1   : > { %v7161_v0 = vpop.f32.mrf.mxu3 }
 0x4d2   : > { %8971 = vst [vmem:[#allocation85_spill] sm:$0xff] %v7161_v0  ;;  %v8994_v0 = vld [vmem:[#allocation57_spill] sm:$0xff] }
 0x4d8   : > { %4248 = vmatmul.msk.bf16.gmra.mxu3 %vm1455_vm13, %v6752_v36 }
 0x4e8   : > { %4249 = vmatmul.msk.bf16.gmra.mxu3 %vm1455_vm13, %v6761_v50 }
 0x4fb   : > { %v2524_v44 = vpop.f32.mrf.mxu3 }
 0x4fc   : > { %v2564_v51 = vadd.f32 %v2524_v44, %v854_v24  ;;  %v869_v24 = vadd.f32 %v8980_v40, %v8979_v63 }
 0x4fe   : > { %v4250_v33 = vmul.f32 -1.442695, %v2564_v51 }
 0x500   : > { %4658 = vpow2.f32 %v4250_v33 }
 0x503   : > { %v2526_v38 = vpop.f32.mrf.mxu3 }
 0x504   : > { %v2565_v55 = vadd.f32 %v2526_v38, %v856_v27  ;;  %v8981_v38 = vld [vmem:[#allocation12_spill] sm:$0xff]  ;;  %v8984_v27 = vld [vmem:[#allocation50_spill] sm:$0xff] }
 0x506   : > { %v4251_v31 = vmul.f32 -1.442695, %v2565_v55  ;;  %v4659_v53 = vpop.eup %4658  ;;  %v876_v55 = vadd.f32 %v8984_v27, %v8983_v60 }
 0x507   : > { %v7175_v20 = vadd.f32 1.0, %v4659_v53 }
 0x508   : > { %4660 = vpow2.f32 %v4251_v31 }
 0x509   : > { %vm2633_vm14 = vweird.f32 %v7175_v20 }
 0x50b   : > { %v2529_v25 = vpop.f32.mrf.mxu3 }
 0x50c   : > { %v2566_v36 = vadd.f32 %v2529_v25, %v859_v1  ;;  %v861_v1 = vadd.f32 %v8982_v59, %v8981_v38 }
 0x50e   : > { %v4252_v42 = vmul.f32 -1.442695, %v2566_v36  ;;  %v4661_v34 = vpop.eup %4660 }
 0x50f   : > { %v7181_v25 = vadd.f32 1.0, %v4661_v34 }
 0x511   : > { %v2654_v32 = vand.u32 2147483648, %v7181_v25  ;;  %vm2648_vm5 = vweird.f32 %v7181_v25 }
 0x513   : > { %v2531_v26 = vpop.f32.mrf.mxu3 }
 0x51b   : > { %v2534_v50 = vpop.f32.mrf.mxu3 }
 0x51c   : > { %v2568_v45 = vadd.f32 %v2534_v50, %v864_v5  ;;  %v2567_v5 = vadd.f32 %v2531_v26, %v861_v1 }
 0x51e   : > { %v4254_v35 = vmul.f32 -1.442695, %v2568_v45 }
 0x520   : > { %4662 = vpow2.f32 %v4254_v35  ;;  %v4253_v35 = vmul.f32 -1.442695, %v2567_v5 }
 0x521   : > { %4664 = vpow2.f32 %v4252_v42 }
 0x522   : > { %4666 = vrcp.f32 %v7175_v20 }
 0x523   : > { %v2536_v30 = vpop.f32.mrf.mxu3 }
 0x524   : > { %v2569_v49 = vadd.f32 %v2536_v30, %v866_v15  ;;  %v8986_v15 = vld [vmem:[#allocation46_spill] sm:$0xff] }
 0x525   : > { %v871_v42 = vadd.f32 %v8986_v15, %v8985_v46  ;;  %v8989_v15 = vld [vmem:[#allocation17_spill] sm:$0xff] }
 0x526   : > { %v4255_v44 = vmul.f32 -1.442695, %v2569_v49  ;;  %v4663_v51 = vpop.eup %4662 }
 0x527   : > { %v7184_v50 = vadd.f32 1.0, %v4663_v51  ;;  %v4665_v45 = vpop.eup %4664 }
 0x528   : > { %4668 = vpow2.f32 %v4255_v44  ;;  %v7194_v53 = vpop.eup %4666 }
 0x529   : > { %4670 = vrcp.f32 %v7181_v25  ;;  %v2629_v16 = vmul.f32 %v7194_v53, %v7175_v20  ;;  %vm2634_vm12 = vweird.f32 %v7194_v53  ;;  %v2699_v9 = vand.u32 2147483648, %v7184_v50 }
 0x52a   : > { %4672 = vrcp.f32 %v7184_v50  ;;  %vm7263_vm9 = vmor %vm2633_vm14, %vm2634_vm12  ;;  %vm2693_vm10 = vweird.f32 %v7184_v50 }
 0x52b   : > { %v2539_v41 = vpop.f32.mrf.mxu3 }
 0x52c   : > { %v2570_v37 = vadd.f32 %v2539_v41, %v869_v24  ;;  %v7191_v41 = vadd.f32 1.0, %v4665_v45  ;;  %v2630_v45 = vsub.f32 1.0, %v2629_v16  ;;  %v8992_v16 = vld [vmem:[#allocation56_spill] sm:$0xff] }
 0x52e   : > { %v4256_v33 = vmul.f32 -1.442695, %v2570_v37  ;;  %v4669_v49 = vpop.eup %4668  ;;  %vm2663_vm3 = vweird.f32 %v7191_v41 }
 0x52f   : > { %v7201_v40 = vadd.f32 1.0, %v4669_v49 }
 0x533   : > { %v2541_v47 = vpop.f32.mrf.mxu3 }
 0x534   : > { %v2571_v34 = vadd.f32 %v2541_v47, %v871_v42  ;;  %v8987_v47 = vld [vmem:[#allocation15_spill] sm:$0xff]  ;;  %v8990_v42 = vld [vmem:[#allocation54_spill] sm:$0xff] }
 0x536   : > { %v4257_v51 = vmul.f32 -1.442695, %v2571_v34  ;;  %v8991_v34 = vld [vmem:[#allocation22_spill] sm:$0xff] }
 0x53b   : > { %v2544_v22 = vpop.f32.mrf.mxu3 }
 0x53c   : > { %v2572_v36 = vadd.f32 %v2544_v22, %v874_v21  ;;  %v7196_v22 = vpop.eup %4670 }
 0x53d   : > { %v7203_v24 = vpop.eup %4672  ;;  %v2644_v44 = vmul.f32 %v7196_v22, %v7181_v25  ;;  %vm2649_vm4 = vweird.f32 %v7196_v22 }
 0x53e   : > { %v4258_v30 = vmul.f32 -1.442695, %v2572_v36  ;;  %v8988_v36 = vld [vmem:[#allocation52_spill] sm:$0xff]  ;;  %vm7284_vm0 = vmor %vm2648_vm5, %vm2649_vm4  ;;  %vm2694_vm8 = vweird.f32 %v7203_v24  ;;  %vm2708_vm4 = vweird.f32 %v7201_v40 }
 0x53f   : > { %v879_v37 = vadd.f32 %v8988_v36, %v8987_v47  ;;  %v8993_v36 = vld [vmem:[#allocation26_spill] sm:$0xff]  ;;  %vm7310_vm15 = vmor %vm2693_vm10, %vm2694_vm8 }
 0x540   : > { %4674 = vpow2.f32 %v4258_v30 }
 0x541   : > { %4676 = vpow2.f32 %v4256_v33  ;;  %v2645_v33 = vsub.f32 1.0, %v2644_v44  ;;  %v2631_v44 = vmul.f32 %v7194_v53, %v2630_v45 }
 0x542   : > { %4678 = vpow2.f32 %v4253_v35 }
 0x543   : > { %v2546_v31 = vpop.f32.mrf.mxu3  ;;  %4680 = vrcp.f32 %v7191_v41  ;;  %v2646_v45 = vmul.f32 %v7196_v22, %v2645_v33  ;;  %v2632_v43 = vadd.f32 %v7194_v53, %v2631_v44 }
 0x544   : > { %v2573_v26 = vadd.f32 %v2546_v31, %v876_v55  ;;  %v2689_v31 = vmul.f32 %v7203_v24, %v7184_v50 }
 0x545   : > { %v2647_v6 = vadd.f32 %v7196_v22, %v2646_v45  ;;  %v2655_v45 = vor.u32 1.1754944e-38, %v2654_v32 }
 0x546   : > { %v4259_v21 = vmul.f32 -1.442695, %v2573_v26  ;;  %v4675_v1 = vpop.eup %4674  ;;  %v881_v26 = vadd.f32 %v8990_v42, %v8989_v15  ;;  %v7235_v42 = vadd.f32 %v8998_v23, %v8997_v54  ;;  %v2690_v61 = vsub.f32 1.0, %v2689_v31 }
 0x547   : > { %v4677_v5 = vpop.eup %4676  ;;  %v7214_v35 = vadd.f32 1.0, %v4675_v1  ;;  %v2639_v23 = vand.u32 2147483648, %v7175_v20  ;;  %v2651_v44 = vsel %vm7284_vm0, %v7196_v22, %v2647_v6 }
 0x548   : > { %4682 = vpow2.f32 %v4259_v21  ;;  %v4679_v30 = vpop.eup %4678  ;;  %v7218_v49 = vadd.f32 1.0, %v4677_v5  ;;  %v884_v21 = vadd.f32 %v8992_v16, %v8991_v34  ;;  %v2691_v28 = vmul.f32 %v7203_v24, %v2690_v61 }
 0x549   : > { %4684 = vrcp.f32 %v7201_v40  ;;  %v7210_v55 = vpop.eup %4680  ;;  %v2640_v61 = vor.u32 1.1754944e-38, %v2639_v23  ;;  %v2667_v23 = vand.u32 2147483647, %v7191_v41  ;;  %vm2753_vm0 = vweird.f32 %v7214_v35 }
 0x54a   : > { %4686 = vpow2.f32 %v4257_v51  ;;  %v8996_v51 = vld [vmem:[#allocation58_spill] sm:$0xff]  ;;  %v2659_v5 = vmul.f32 %v7210_v55, %v7191_v41  ;;  %vm2664_vm2 = vweird.f32 %v7210_v55  ;;  %vm2723_vm8 = vweird.f32 %v7218_v49 }
 0x54b   : > { %v2549_v59 = vpop.f32.mrf.mxu3  ;;  %v7231_v1 = vadd.f32 %v8996_v51, %v8995_v19  ;;  %4688 = vrcp.f32 %v7214_v35  ;;  %v2652_v51 = vand.u32 2147483647, %v7181_v25  ;;  %v2700_v19 = vor.u32 1.1754944e-38, %v2699_v9  ;;  %vm7333_vm12 = vmor %vm2663_vm3, %vm2664_vm2 }
 0x54c   : > { %v2574_v27 = vadd.f32 %v2549_v59, %v879_v37  ;;  %v7224_v59 = vadd.f32 %v8994_v0, %v8993_v36  ;;  %v7226_v37 = vadd.f32 1.0, %v4679_v30  ;;  %v2637_v30 = vand.u32 2147483647, %v7175_v20 }
 0x54d   : > { %4690 = vrcp.f32 %v7218_v49  ;;  %v2660_v39 = vsub.f32 1.0, %v2659_v5  ;;  %vm7277_vm1 = vcmp.eq.f32.partialorder %v2652_v51, 8.507059e+37  ;;  %v2692_v51 = vadd.f32 %v7203_v24, %v2691_v28 }
 0x54e   : > { %v4260_v16 = vmul.f32 -1.442695, %v2574_v27  ;;  %v4683_v18 = vpop.eup %4682  ;;  %4692 = vrcp.f32 %v7226_v37  ;;  %vm7267_vm11 = vcmp.eq.f32.partialorder %v2637_v30, 8.507059e+37  ;;  %v2697_v28 = vand.u32 2147483647, %v7184_v50 }
 0x54f   : > { %v7242_v48 = vpop.eup %4684  ;;  %v7251_v33 = vadd.f32 1.0, %v4683_v18  ;;  %v2661_v25 = vmul.f32 %v7210_v55, %v2660_v39  ;;  %vm7327_vm6 = vcmp.eq.f32.partialorder %v2667_v23, 8.507059e+37  ;;  %v2684_v23 = vand.u32 2147483648, %v7226_v37 }
 0x550   : > { %v4687_v27 = vpop.eup %4686  ;;  %4694 = vpow2.f32 %v4260_v16  ;;  %v2704_v12 = vmul.f32 %v7242_v48, %v7201_v40  ;;  %v2636_v16 = vsel %vm7263_vm9, %v7194_v53, %v2632_v43  ;;  %vm2698_vm7 = vcmp.eq.f32.partialorder %v2697_v28, 8.507059e+37 }
 0x551   : > { %v7272_v20 = vpop.eup %4688  ;;  %4696 = vrcp.f32 %v7251_v33  ;;  %v2641_v50 = vsel %vm7267_vm11, %v2640_v61, %v2636_v16  ;;  %vm2709_vm14 = vweird.f32 %v7242_v48 }
 0x552   : > { %v2705_v53 = vsub.f32 1.0, %v2704_v12  ;;  %v2749_v39 = vmul.f32 %v7272_v20, %v7214_v35  ;;  %vm7355_vm9 = vmor %vm2708_vm4, %vm2709_vm14  ;;  %vm2754_vm5 = vweird.f32 %v7272_v20  ;;  %vm2768_vm14 = vweird.f32 %v7251_v33 }
 0x553   : > { %v2551_v0 = vpop.f32.mrf.mxu3  ;;  %vm7388_vm10 = vmor %vm2753_vm0, %vm2754_vm5 }
 0x554   : > { %v2575_v31 = vadd.f32 %v2551_v0, %v881_v26  ;;  %v7259_v26 = vadd.f32 1.0, %v4687_v27  ;;  %v7281_v27 = vpop.eup %4690  ;;  %v2706_v30 = vmul.f32 %v7242_v48, %v2705_v53  ;;  %v2750_v36 = vsub.f32 1.0, %v2749_v39 }
 0x555   : > { %v7291_v43 = vpop.eup %4692  ;;  %v2719_v12 = vmul.f32 %v7281_v27, %v7218_v49 }
 0x556   : > { %v4261_v5 = vmul.f32 -1.442695, %v2575_v31  ;;  %v2669_v31 = vand.u32 2147483648, %v7191_v41  ;;  %v4695_v2 = vpop.eup %4694  ;;  %4698 = vrcp.f32 %v7259_v26  ;;  %v2674_v6 = vmul.f32 %v7291_v43, %v7226_v37 }
 0x557   : > { %v7324_v54 = vpop.eup %4696  ;;  %v2751_v39 = vmul.f32 %v7272_v20, %v2750_v36  ;;  %vm2679_vm2 = vweird.f32 %v7291_v43  ;;  %vm2738_vm4 = vweird.f32 %v7259_v26 }
 0x558   : > { %4700 = vpow2.f32 %v4261_v5  ;;  %v2696_v5 = vsel %vm7310_vm15, %v7203_v24, %v2692_v51  ;;  %v2670_v24 = vor.u32 1.1754944e-38, %v2669_v31  ;;  %v2675_v9 = vsub.f32 1.0, %v2674_v6 }
 0x559   : > { %v2701_v16 = vsel %vm2698_vm7, %v2700_v19, %v2696_v5  ;;  %v2764_v0 = vmul.f32 %v7324_v54, %v7251_v33  ;;  %v2707_v31 = vadd.f32 %v7242_v48, %v2706_v30  ;;  %v2714_v19 = vand.u32 2147483648, %v7201_v40 }
 0x55a   : > { %v2812_v28 = vmul.f32 %v2701_v16, %v6977_v10  ;;  %v2676_v36 = vmul.f32 %v7291_v43, %v2675_v9  ;;  %vm2769_vm7 = vweird.f32 %v7324_v54 }
 0x55b   : > { %v2554_v32 = vpop.f32.mrf.mxu3  ;;  %v2715_v5 = vor.u32 1.1754944e-38, %v2714_v19 }
 0x55c   : > { %v2576_v58 = vadd.f32 %v2554_v32, %v884_v21  ;;  %v2662_v21 = vadd.f32 %v7210_v55, %v2661_v25  ;;  %v7317_v32 = vadd.f32 1.0, %v4695_v2  ;;  %v2720_v25 = vsub.f32 1.0, %v2719_v12  ;;  %v7337_v61 = vpop.eup %4698 }
 0x55d   : > { %v2656_v2 = vsel %vm7277_vm1, %v2655_v45, %v2651_v44  ;;  %vm2724_vm1 = vweird.f32 %v7281_v27 }
 0x55e   : > { %4702 = vtanh.f32 %v2576_v58  ;;  %v2666_v41 = vsel %vm7333_vm12, %v7210_v55, %v2662_v21  ;;  %v4701_v53 = vpop.eup %4700  ;;  %v2712_v55 = vand.u32 2147483647, %v7201_v40  ;;  %v2721_v12 = vmul.f32 %v7281_v27, %v2720_v25  ;;  %vm7395_vm15 = vmor %vm2723_vm8, %vm2724_vm1 }
 0x55f   : > { %4704 = vrcp.f32 %v7317_v32  ;;  %v2734_v21 = vmul.f32 %v7337_v61, %v7259_v26  ;;  %v2765_v40 = vsub.f32 1.0, %v2764_v0  ;;  %v7368_v30 = vadd.f32 1.0, %v4701_v53 }
 0x560   : > { %vm2713_vm11 = vcmp.eq.f32.partialorder %v2712_v55, 8.507059e+37  ;;  %v2752_v25 = vadd.f32 %v7272_v20, %v2751_v39  ;;  %v2722_v18 = vadd.f32 %v7281_v27, %v2721_v12 }
 0x561   : > { %v2735_v9 = vsub.f32 1.0, %v2734_v21 }
 0x562   : > { %v2756_v55 = vsel %vm7388_vm10, %v7272_v20, %v2752_v25  ;;  %v2774_v25 = vand.u32 2147483648, %v7251_v33 }
 0x563   : > { %v2556_v45 = vpop.f32.mrf.mxu3  ;;  %v2736_v22 = vmul.f32 %v7337_v61, %v2735_v9 }
 0x564   : > { %v4703_v51 = vpop.eup %4702  ;;  %v2577_v44 = vadd.f32 %v2556_v45, %v7224_v59  ;;  %v7363_v59 = vsel %vm7327_vm6, %v2670_v24, %v2666_v41  ;;  %v2759_v24 = vand.u32 2147483648, %v7214_v35  ;;  %v2729_v41 = vand.u32 2147483648, %v7218_v49 }
 0x565   : > { %v2816_v6 = vmul.f32 %v4703_v51, %v2641_v50  ;;  %v2711_v50 = vsel %vm7355_vm9, %v7242_v48, %v2707_v31  ;;  %v7377_v58 = vpop.eup %4704  ;;  %v2757_v48 = vand.u32 2147483647, %v7214_v35  ;;  %v2766_v45 = vmul.f32 %v7324_v54, %v2765_v40  ;;  %vm7429_vm9 = vmor %vm2768_vm14, %vm2769_vm7 }
 0x566   : > { %4706 = vtanh.f32 %v2577_v44  ;;  %v2716_v16 = vsel %vm2713_vm11, %v2715_v5, %v2711_v50  ;;  %v2779_v35 = vmul.f32 %v7377_v58, %v7317_v32  ;;  %v2727_v44 = vand.u32 2147483647, %v7218_v49 }
 0x567   : > { %v7370_v10 = vadd.f32 %v2816_v6, %v2812_v28  ;;  %v2813_v39 = vmul.f32 %v2716_v16, %v7022_v14  ;;  %v2726_v28 = vsel %vm7395_vm15, %v7281_v27, %v2722_v18  ;;  %v2760_v6 = vor.u32 1.1754944e-38, %v2759_v24 }
 0x568   : > { %vm2758_vm3 = vcmp.eq.f32.partialorder %v2757_v48, 8.507059e+37  ;;  %vm2678_vm6 = vweird.f32 %v7226_v37  ;;  %v2767_v20 = vadd.f32 %v7324_v54, %v2766_v45  ;;  %v2730_v27 = vor.u32 1.1754944e-38, %v2729_v41 }
 0x569   : > { %4708 = vtanh.f32 %v7370_v10  ;;  %v2761_v14 = vsel %vm2758_vm3, %v2760_v6, %v2756_v55  ;;  %v2677_v40 = vadd.f32 %v7291_v43, %v2676_v36  ;;  %vm2728_vm12 = vcmp.eq.f32.partialorder %v2727_v44, 8.507059e+37  ;;  %vm7470_vm0 = vmor %vm2678_vm6, %vm2679_vm2  ;;  %v9026_v6 = vld [vmem:[#allocation24_spill] sm:$0xff] }
 0x56a   : > { %4710 = vrcp.f32 %v7368_v30  ;;  %v2731_v18 = vsel %vm2728_vm12, %v2730_v27, %v2726_v28  ;;  %v2772_v36 = vand.u32 2147483647, %v7251_v33  ;;  %vm2739_vm11 = vweird.f32 %v7337_v61 }
 0x56b   : > { %v2559_v53 = vpop.f32.mrf.mxu3  ;;  %v2744_v16 = vand.u32 2147483648, %v7259_v26  ;;  %v2737_v41 = vadd.f32 %v7337_v61, %v2736_v22  ;;  %v2742_v44 = vand.u32 2147483647, %v7259_v26  ;;  %v2775_v55 = vor.u32 1.1754944e-38, %v2774_v25  ;;  %vm7454_vm5 = vmor %vm2738_vm4, %vm2739_vm11 }
 0x56c   : > { %v4707_v31 = vpop.eup %4706  ;;  %v2578_v19 = vadd.f32 %v2559_v53, %v7231_v1  ;;  %v7413_v1 = vstv %s7366_s30  ;;  %v2771_v53 = vsel %vm7429_vm9, %v7324_v54, %v2767_v20  ;;  %vm2773_vm1 = vcmp.eq.f32.partialorder %v2772_v36, 8.507059e+37  ;;  %v7546_v54 = vld [vmem:[%s8665_s2 + $0x28] sm:$0xff]  ;;  %s3950_s30 = sshll.u32 %s3946_s23, 4  ;;  %s3951_s30 = int_to_ptr.hbm [resolvable:$true] %s3950_s30 }
 0x56d   : > { %v2817_v12 = vmul.f32 %v4707_v31, %v2656_v2  ;;  %v2780_v2 = vsub.f32 1.0, %v2779_v35  ;;  %v2814_v35 = vmul.f32 %v2731_v18, %v7068_v7  ;;  %v2745_v7 = vor.u32 1.1754944e-38, %v2744_v16  ;;  %s4971_s10 = sshra.s32 %s3951_s30, 4  ;;  %s4972_s10 = int_to_ptr.hbm [resolvable:$true] %s4971_s10 }
 0x56e   : > { %4712 = vtanh.f32 %v2578_v19  ;;  %v2776_v26 = vsel %vm2773_vm1, %v2775_v55, %v2771_v53  ;;  %vm2784_vm8 = vweird.f32 %v7377_v58  ;;  %vm2743_vm10 = vcmp.eq.f32.partialorder %v2742_v44, 8.507059e+37  ;;  %s4973_s15 = scalar_lea.hbm %s4972_s10, 1  ;;  %p4978_p5 = scmp.lt.s32.totalorder %s4972_s10, %s8670_s7 }
 0x56f   : > { %v4709_v49 = vpop.eup %4708  ;;  %v7415_v21 = vadd.f32 %v2817_v12, %v2813_v39  ;;  %v2781_v45 = vmul.f32 %v7377_v58, %v2780_v2  ;;  %v2682_v39 = vand.u32 2147483647, %v7226_v37  ;;  %vm2783_vm15 = vweird.f32 %v7317_v32  ;;  %p4974_p2 = scmp.ne.s32.totalorder %s4972_s10, %s4973_s15  ;;  %p4979_p7 = scmp.lt.s32.totalorder %s4977_s18, %s4973_s15 }
 0x570   : > { %v7421_v50 = vmul.f32 %v4709_v49, %v2761_v14  ;;  %v7423_v5 = vpop.eup %4710  ;;  %v2789_v49 = vand.u32 2147483648, %v7317_v32  ;;  %v2787_v14 = vand.u32 2147483647, %v7317_v32  ;;  %vm2785_vm3 = vmor %vm2783_vm15, %vm2784_vm8  ;;  %vm2798_vm12 = vweird.f32 %v7368_v30 }
 0x571   : > { %4714 = vtanh.f32 %v7415_v21  ;;  %v2794_v33 = vmul.f32 %v7423_v5, %v7368_v30  ;;  %vm2683_vm2 = vcmp.eq.f32.partialorder %v2682_v39, 8.507059e+37  ;;  %vm2799_vm7 = vweird.f32 %v7423_v5  ;;  %v7553_v39 = vld [vmem:[%s8665_s2 + $0x30] sm:$0xff]  ;;  %p4975_p3 = pnand %p4974_p2, %p5113_p6  ;;  %p4980_p8 = por %p4979_p7, %p4978_p5 }
 0x572   : > { %v2834_v9 = vmul.f32 %v7413_v1, %v7421_v50  ;;  %v2790_v36 = vor.u32 1.1754944e-38, %v2789_v49  ;;  %vm2788_vm6 = vcmp.eq.f32.partialorder %v2787_v14, 8.507059e+37  ;;  %vm2800_vm14 = vmor %vm2798_vm12, %vm2799_vm7 }
 0x573   : > { %v2561_v48 = vpop.f32.mrf.mxu3  ;;  %v2795_v28 = vsub.f32 1.0, %v2794_v33  ;;  %p4976_p4 = pneg %p4975_p3 }
 0x574   : > { %v4713_v0 = vpop.eup %4712  ;;  %v2579_v31 = vadd.f32 %v2561_v48, %v7235_v42  ;;  %v7447_v51 = vadd.f32 %v2834_v9, %v7054_v52  ;;  %v2685_v42 = vor.u32 1.1754944e-38, %v2684_v23  ;;  %v2782_v23 = vadd.f32 %v7377_v58, %v2781_v45 }
 0x575   : > { %v2818_v19 = vmul.f32 %v4713_v0, %v7363_v59  ;;  %v2741_v59 = vsel %vm7454_vm5, %v7337_v61, %v2737_v41  ;;  %v2681_v61 = vsel %vm7470_vm0, %v7291_v43, %v2677_v40  ;;  %v2796_v2 = vmul.f32 %v7423_v5, %v2795_v28  ;;  %p4981_p9 = pnand %p4980_p8, %p4976_p4 }
 0x576   : > { %4716 = vtanh.f32 %v2579_v31  ;;  %v2746_v37 = vsel %vm2743_vm10, %v2745_v7, %v2741_v59  ;;  %v2686_v25 = vsel %vm2683_vm2, %v2685_v42, %v2681_v61  ;;  %v2786_v18 = vsel %vm2785_vm3, %v7377_v58, %v2782_v23  ;;  %v7560_v42 = vld [vmem:[%s8665_s2 + $0x38] sm:$0xff] }
 0x577   : > { %v4715_v52 = vpop.eup %4714  ;;  %v7461_v12 = vadd.f32 %v2818_v19, %v2814_v35  ;;  %v2815_v40 = vmul.f32 %v2746_v37, %v7099_v29  ;;  %v2791_v16 = vsel %vm2788_vm6, %v2790_v36, %v2786_v18  ;;  %v2797_v48 = vadd.f32 %v7423_v5, %v2796_v2  ;;  %v9027_v37 = vld [vmem:[#allocation31_spill] sm:$0xff] }
 0x578   : > { %v2829_v22 = vmul.f32 %v4715_v52, %v2776_v26  ;;  %v2804_v58 = vand.u32 2147483648, %v7368_v30  ;;  %v9025_v52 = vld [vmem:[#allocation29_spill] sm:$0xff]  ;;  %v930_v23 = vadd.f32 %v9026_v6, %v5355_v57  ;;  %v935_v14 = vadd.f32 %v9027_v37, %v5380_v8 }
 0x579   : > { %4718 = vtanh.f32 %v7461_v12  ;;  %v2801_v53 = vsel %vm2800_vm14, %v7423_v5, %v2797_v48  ;;  %v7539_v5 = vld [vmem:[%s8665_s2 + $0x20] sm:$0xff]  ;;  %v925_v7 = vadd.f32 %v9025_v52, %v5353_v56 }
 0x57a   : > { %v2835_v20 = vmul.f32 %v7413_v1, %v2829_v22  ;;  %v2805_v45 = vor.u32 1.1754944e-38, %v2804_v58 }
 0x57c   : > { %v4717_v27 = vpop.eup %4716  ;;  %v7487_v43 = vadd.f32 %v2835_v20, %v7096_v13  ;;  %v2802_v13 = vand.u32 2147483647, %v7368_v30  ;;  %v2858_v30 = vpack.c.bf16 %v2829_v22, %v7421_v50  ;;  %v7532_v50 = vld [vmem:[%s8665_s2 + $0x18] sm:$0xff] }
 0x57d   : > { %v2819_v24 = vmul.f32 %v4717_v27, %v2686_v25  ;;  %v9028_v25 = vld [vmem:[#allocation19_spill] sm:$0xff] }
 0x57e   : > { %vm2803_vm4 = vcmp.eq.f32.partialorder %v2802_v13, 8.507059e+37  ;;  %v927_v18 = vadd.f32 %v9028_v25, %v5362_v62 }
 0x57f   : > { %v4719_v9 = vpop.eup %4718  ;;  %v7490_v32 = vadd.f32 %v2819_v24, %v2815_v40  ;;  %v2806_v31 = vsel %vm2803_vm4, %v2805_v45, %v2801_v53 }
 0x580   : > { %v2830_v41 = vmul.f32 %v4719_v9, %v2791_v16 }
 0x581   : > { %4720 = vtanh.f32 %v7490_v32 }
 0x582   : > { %v2836_v29 = vmul.f32 %v7413_v1, %v2830_v41 }
 0x584   : > { %v7501_v0 = vadd.f32 %v2836_v29, %v7112_v4  ;;  %v7511_v4 = vld [vmem:[%s8665_s2] sm:$0xff] }
 0x587   : > { %v4721_v33 = vpop.eup %4720 }
 0x588   : > { %v2831_v35 = vmul.f32 %v4721_v33, %v2806_v31  ;;  %v9030_v31 = vld [vmem:[#allocation63_spill] sm:$0xff] }
 0x58a   : > { %v2837_v19 = vmul.f32 %v7413_v1, %v2831_v35  ;;  %v2859_v44 = vpack.c.bf16 %v2831_v35, %v2830_v41  ;;  %v7518_v1 = vld [vmem:[%s8665_s2 + $0x8] sm:$0xff]  ;;  %v945_v35 = vadd.f32 %v9030_v31, %v8977_v3 }
 0x58b   : > { %v9029_v41 = vld [vmem:[#allocation60_spill] sm:$0xff] }
 0x58c   : > { %v7505_v55 = vadd.f32 %v2837_v19, %v7118_v17  ;;  %2866 = vmatpush.bf16.msrb.mxu0 %v2859_v44  ;;  %v7525_v17 = vld [vmem:[%s8665_s2 + $0x10] sm:$0xff]  ;;  %v937_v58 = vadd.f32 %v9029_v41, %v8860_v11 }
 0x58d   : > { %v9031_v44 = vld [vmem:[#allocation61_spill] sm:$0xff] }
 0x590   : > { %2867 = vmatpush.bf16.msrb.mxu0 %v2858_v30  ;;  %v940_v30 = vadd.f32 %v9031_v44, %v8979_v63 }
 0x593   : > { %4263 = vmatmul.msk.bf16.vlgmr.msrb.gmra.mxu0 %vm1455_vm13, %v7511_v4 }
 0x5a3   : > { %4264 = vmatmul.msk.bf16.gmra.mxu0 %vm1455_vm13, %v7518_v1 }
 0x5b3   : > { %4265 = vmatmul.msk.bf16.gmra.mxu0 %vm1455_vm13, %v7525_v17 }
 0x5c3   : > { %4266 = vmatmul.msk.bf16.gmra.mxu0 %vm1455_vm13, %v7532_v50 }
 0x5d3   : > { %4267 = vmatmul.msk.bf16.gmra.mxu0 %vm1455_vm13, %v7539_v5 }
 0x5e3   : > { %4268 = vmatmul.msk.bf16.gmra.mxu0 %vm1455_vm13, %v7546_v54 }
 0x5f3   : > { %4269 = vmatmul.msk.bf16.gmra.mxu0 %vm1455_vm13, %v7553_v39 }
 0x603   : > { %4270 = vmatmul.msk.bf16.gmra.mxu0 %vm1455_vm13, %v7560_v42 }
 0x610   : > { %v2869_v59 = vpop.f32.mrf.mxu0 }
 0x611   : > { %v2909_v26 = vadd.f32 %v2869_v59, %v925_v7  ;;  %v9032_v59 = vld [vmem:[#allocation28_spill] sm:$0xff] }
 0x613   : > { %v4271_v36 = vmul.f32 -1.442695, %v2909_v26  ;;  %v932_v26 = vadd.f32 %v9032_v59, %v8981_v38 }
 0x615   : > { %4722 = vpow2.f32 %v4271_v36 }
 0x618   : > { %v2871_v28 = vpop.f32.mrf.mxu0 }
 0x619   : > { %v2910_v24 = vadd.f32 %v2871_v28, %v927_v18 }
 0x61b   : > { %v4272_v9 = vmul.f32 -1.442695, %v2910_v24  ;;  %v4723_v29 = vpop.eup %4722  ;;  %v9034_v24 = vld [vmem:[#allocation62_spill] sm:$0xff] }
 0x61c   : > { %v7576_v19 = vadd.f32 1.0, %v4723_v29  ;;  %v942_v36 = vadd.f32 %v9034_v24, %v8985_v46  ;;  %v9039_v24 = vld [vmem:[#allocation68_spill] sm:$0xff] }
 0x61d   : > { %4724 = vpow2.f32 %v4272_v9 }
 0x61e   : > { %vm2978_vm11 = vweird.f32 %v7576_v19 }
 0x620   : > { %v2874_v22 = vpop.f32.mrf.mxu0 }
 0x621   : > { %v2911_v61 = vadd.f32 %v2874_v22, %v930_v23 }
 0x623   : > { %v4273_v13 = vmul.f32 -1.442695, %v2911_v61  ;;  %v4725_v45 = vpop.eup %4724 }
 0x624   : > { %v7582_v28 = vadd.f32 1.0, %v4725_v45 }
 0x626   : > { %vm2993_vm8 = vweird.f32 %v7582_v28 }
 0x628   : > { %v2876_v49 = vpop.f32.mrf.mxu0 }
 0x629   : > { %v2912_v22 = vadd.f32 %v2876_v49, %v932_v26 }
 0x62b   : > { %v4274_v18 = vmul.f32 -1.442695, %v2912_v22 }
 0x630   : > { %v2879_v20 = vpop.f32.mrf.mxu0 }
 0x631   : > { %v2913_v27 = vadd.f32 %v2879_v20, %v935_v14  ;;  %v9033_v20 = vld [vmem:[#allocation64_spill] sm:$0xff] }
 0x633   : > { %v4275_v48 = vmul.f32 -1.442695, %v2913_v27  ;;  %v947_v27 = vadd.f32 %v9033_v20, %v8983_v60 }
 0x635   : > { %4726 = vpow2.f32 %v4275_v48 }
 0x636   : > { %4728 = vpow2.f32 %v4273_v13 }
 0x637   : > { %4730 = vrcp.f32 %v7576_v19 }
 0x638   : > { %v2881_v2 = vpop.f32.mrf.mxu0 }
 0x639   : > { %v2914_v53 = vadd.f32 %v2881_v2, %v937_v58 }
 0x63b   : > { %v4276_v52 = vmul.f32 -1.442695, %v2914_v53  ;;  %v4727_v7 = vpop.eup %4726 }
 0x63c   : > { %v7585_v61 = vadd.f32 1.0, %v4727_v7  ;;  %v4729_v37 = vpop.eup %4728 }
 0x63d   : > { %4732 = vpow2.f32 %v4276_v52  ;;  %v7595_v9 = vpop.eup %4730 }
 0x63e   : > { %4734 = vrcp.f32 %v7582_v28  ;;  %v2974_v13 = vmul.f32 %v7595_v9, %v7576_v19  ;;  %vm2979_vm9 = vweird.f32 %v7595_v9  ;;  %v3044_v46 = vand.u32 2147483648, %v7585_v61 }
 0x63f   : > { %4736 = vrcp.f32 %v7585_v61  ;;  %vm7664_vm1 = vmor %vm2978_vm11, %vm2979_vm9  ;;  %vm3038_vm3 = vweird.f32 %v7585_v61 }
 0x640   : > { %v2884_v40 = vpop.f32.mrf.mxu0  ;;  %v2975_v7 = vsub.f32 1.0, %v2974_v13  ;;  %v9041_v13 = vld [vmem:[#allocation69_spill] sm:$0xff]  ;;  %v3045_v63 = vor.u32 1.1754944e-38, %v3044_v46 }
 0x641   : > { %v2915_v23 = vadd.f32 %v2884_v40, %v940_v30  ;;  %v7592_v40 = vadd.f32 1.0, %v4729_v37 }
 0x643   : > { %v4277_v2 = vmul.f32 -1.442695, %v2915_v23  ;;  %v4733_v48 = vpop.eup %4732  ;;  %vm3008_vm12 = vweird.f32 %v7592_v40 }
 0x644   : > { %v7597_v58 = vpop.eup %4734  ;;  %v7602_v53 = vadd.f32 1.0, %v4733_v48  ;;  %v2976_v48 = vmul.f32 %v7595_v9, %v2975_v7 }
 0x645   : > { %v7604_v45 = vpop.eup %4736  ;;  %vm2994_vm5 = vweird.f32 %v7597_v58 }
 0x646   : > { %v3034_v22 = vmul.f32 %v7604_v45, %v7585_v61  ;;  %vm7685_vm15 = vmor %vm2993_vm8, %vm2994_vm5  ;;  %vm3039_vm2 = vweird.f32 %v7604_v45  ;;  %vm3053_vm5 = vweird.f32 %v7602_v53 }
 0x647   : > { %vm7711_vm6 = vmor %vm3038_vm3, %vm3039_vm2 }
 0x648   : > { %v2886_v16 = vpop.f32.mrf.mxu0 }
 0x649   : > { %v2916_v41 = vadd.f32 %v2886_v16, %v942_v36  ;;  %v9035_v16 = vld [vmem:[#allocation65_spill] sm:$0xff] }
 0x64a   : > { %v950_v30 = vadd.f32 %v9035_v16, %v8987_v47 }
 0x64b   : > { %v4278_v31 = vmul.f32 -1.442695, %v2916_v41  ;;  %v9040_v41 = vld [vmem:[#allocation21_spill] sm:$0xff] }
 0x650   : > { %v2889_v33 = vpop.f32.mrf.mxu0 }
 0x651   : > { %v2917_v6 = vadd.f32 %v2889_v33, %v945_v35  ;;  %v2989_v33 = vmul.f32 %v7597_v58, %v7582_v28 }
 0x653   : > { %v4279_v14 = vmul.f32 -1.442695, %v2917_v6  ;;  %v2990_v23 = vsub.f32 1.0, %v2989_v33  ;;  %v9042_v33 = vld [vmem:[#allocation27_spill] sm:$0xff] }
 0x655   : > { %4738 = vpow2.f32 %v4279_v14  ;;  %v9036_v14 = vld [vmem:[#allocation66_spill] sm:$0xff]  ;;  %v2991_v7 = vmul.f32 %v7597_v58, %v2990_v23 }
 0x656   : > { %4740 = vpow2.f32 %v4277_v2  ;;  %v952_v20 = vadd.f32 %v9036_v14, %v8989_v15  ;;  %v9037_v2 = vld [vmem:[#allocation67_spill] sm:$0xff]  ;;  %v2982_v14 = vand.u32 2147483647, %v7576_v19 }
 0x657   : > { %4742 = vpow2.f32 %v4274_v18  ;;  %v9038_v18 = vld [vmem:[#allocation26_spill] sm:$0xff]  ;;  %v2992_v15 = vadd.f32 %v7597_v58, %v2991_v7 }
 0x658   : > { %v2891_v25 = vpop.f32.mrf.mxu0  ;;  %4744 = vrcp.f32 %v7592_v40  ;;  %v7625_v36 = vadd.f32 %v9039_v24, %v9038_v18  ;;  %v2984_v24 = vand.u32 2147483648, %v7576_v19  ;;  %vm7668_vm0 = vcmp.eq.f32.partialorder %v2982_v14, 8.507059e+37 }
 0x659   : > { %v2918_v49 = vadd.f32 %v2891_v25, %v947_v27  ;;  %v955_v25 = vadd.f32 %v9037_v2, %v8991_v34 }
 0x65a   : > { %v2985_v19 = vor.u32 1.1754944e-38, %v2984_v24  ;;  %v3012_v24 = vand.u32 2147483647, %v7592_v40 }
 0x65b   : > { %v4280_v29 = vmul.f32 -1.442695, %v2918_v49  ;;  %v4739_v44 = vpop.eup %4738 }
 0x65c   : > { %v4741_v52 = vpop.eup %4740  ;;  %v7615_v37 = vadd.f32 1.0, %v4739_v44  ;;  %vm7728_vm14 = vcmp.eq.f32.partialorder %v3012_v24, 8.507059e+37 }
 0x65d   : > { %4746 = vpow2.f32 %v4280_v29  ;;  %v4743_v59 = vpop.eup %4742  ;;  %v7619_v27 = vadd.f32 1.0, %v4741_v52  ;;  %v7632_v29 = vadd.f32 %v9041_v13, %v9040_v41  ;;  %v3035_v52 = vsub.f32 1.0, %v3034_v22 }
 0x65e   : > { %4748 = vrcp.f32 %v7602_v53  ;;  %v7611_v6 = vpop.eup %4744  ;;  %v7627_v49 = vadd.f32 1.0, %v4743_v59  ;;  %v2997_v13 = vand.u32 2147483647, %v7582_v28 }
 0x65f   : > { %4750 = vpow2.f32 %v4278_v31  ;;  %v9043_v31 = vld [vmem:[#allocation70_spill] sm:$0xff]  ;;  %v3004_v44 = vmul.f32 %v7611_v6, %v7592_v40  ;;  %v3036_v18 = vmul.f32 %v7604_v45, %v3035_v52  ;;  %vm3009_vm7 = vweird.f32 %v7611_v6 }
 0x660   : > { %v2894_v35 = vpop.f32.mrf.mxu0  ;;  %4752 = vrcp.f32 %v7615_v37  ;;  %vm7678_vm10 = vcmp.eq.f32.partialorder %v2997_v13, 8.507059e+37  ;;  %vm7734_vm9 = vmor %vm3008_vm12, %vm3009_vm7  ;;  %v3029_v24 = vand.u32 2147483648, %v7627_v49  ;;  %vm3068_vm2 = vweird.f32 %v7619_v27 }
 0x661   : > { %v2919_v26 = vadd.f32 %v2894_v35, %v950_v30  ;;  %v7636_v35 = vadd.f32 %v9043_v31, %v9042_v33  ;;  %4754 = vrcp.f32 %v7619_v27  ;;  %v2977_v31 = vadd.f32 %v7595_v9, %v2976_v48 }
 0x662   : > { %4756 = vrcp.f32 %v7627_v49  ;;  %v2999_v33 = vand.u32 2147483648, %v7582_v28  ;;  %v3005_v41 = vsub.f32 1.0, %v3004_v44  ;;  %v2996_v48 = vsel %vm7685_vm15, %v7597_v58, %v2992_v15 }
 0x663   : > { %v4281_v16 = vmul.f32 -1.442695, %v2919_v26  ;;  %v4747_v30 = vpop.eup %4746  ;;  %v2981_v52 = vsel %vm7664_vm1, %v7595_v9, %v2977_v31  ;;  %v3037_v31 = vadd.f32 %v7604_v45, %v3036_v18  ;;  %v3042_v18 = vand.u32 2147483647, %v7585_v61 }
 0x664   : > { %v7643_v2 = vpop.eup %4748  ;;  %v7652_v23 = vadd.f32 1.0, %v4747_v30  ;;  %v3000_v7 = vor.u32 1.1754944e-38, %v2999_v33  ;;  %v3006_v28 = vmul.f32 %v7611_v6, %v3005_v41  ;;  %v2986_v61 = vsel %vm7668_vm0, %v2985_v19, %v2981_v52 }
 0x665   : > { %v4751_v26 = vpop.eup %4750  ;;  %4758 = vpow2.f32 %v4281_v16  ;;  %v3049_v34 = vmul.f32 %v7643_v2, %v7602_v53  ;;  %vm3043_vm4 = vcmp.eq.f32.partialorder %v3042_v18, 8.507059e+37  ;;  %vm3054_vm11 = vweird.f32 %v7643_v2 }
 0x666   : > { %v7673_v16 = vpop.eup %4752  ;;  %4760 = vrcp.f32 %v7652_v23  ;;  %vm7756_vm1 = vmor %vm3053_vm5, %vm3054_vm11  ;;  %vm3098_vm15 = vweird.f32 %v7615_v37  ;;  %vm3113_vm11 = vweird.f32 %v7652_v23 }
 0x667   : > { %v3050_v13 = vsub.f32 1.0, %v3049_v34  ;;  %v3094_v41 = vmul.f32 %v7673_v16, %v7615_v37  ;;  %vm3099_vm8 = vweird.f32 %v7673_v16 }
 0x668   : > { %v2896_v59 = vpop.f32.mrf.mxu0  ;;  %vm7789_vm3 = vmor %vm3098_vm15, %vm3099_vm8 }
 0x669   : > { %v2920_v22 = vadd.f32 %v2896_v59, %v952_v20  ;;  %v7660_v20 = vadd.f32 1.0, %v4751_v26  ;;  %v7682_v26 = vpop.eup %4754  ;;  %v3051_v14 = vmul.f32 %v7643_v2, %v3050_v13  ;;  %v3095_v3 = vsub.f32 1.0, %v3094_v41 }
 0x66a   : > { %v7692_v9 = vpop.eup %4756  ;;  %v3064_v34 = vmul.f32 %v7682_v26, %v7619_v27 }
 0x66b   : > { %v4282_v30 = vmul.f32 -1.442695, %v2920_v22  ;;  %v3014_v22 = vand.u32 2147483648, %v7592_v40  ;;  %v4759_v47 = vpop.eup %4758  ;;  %4762 = vrcp.f32 %v7660_v20  ;;  %v3019_v15 = vmul.f32 %v7692_v9, %v7627_v49 }
 0x66c   : > { %v7725_v38 = vpop.eup %4760  ;;  %v3096_v41 = vmul.f32 %v7673_v16, %v3095_v3  ;;  %vm3024_vm7 = vweird.f32 %v7692_v9  ;;  %vm3083_vm5 = vweird.f32 %v7660_v20 }
 0x66d   : > { %4764 = vpow2.f32 %v4282_v30  ;;  %v3041_v30 = vsel %vm7711_vm6, %v7604_v45, %v3037_v31  ;;  %v3015_v45 = vor.u32 1.1754944e-38, %v3014_v22  ;;  %v3020_v46 = vsub.f32 1.0, %v3019_v15 }
 0x66e   : > { %v3046_v52 = vsel %vm3043_vm4, %v3045_v63, %v3041_v30  ;;  %v3109_v59 = vmul.f32 %v7725_v38, %v7652_v23  ;;  %v3052_v22 = vadd.f32 %v7643_v2, %v3051_v14  ;;  %v3059_v63 = vand.u32 2147483648, %v7602_v53 }
 0x66f   : > { %v3157_v18 = vmul.f32 %v3046_v52, %v7370_v10  ;;  %v3021_v3 = vmul.f32 %v7692_v9, %v3020_v46  ;;  %vm3114_vm4 = vweird.f32 %v7725_v38 }
 0x670   : > { %v2899_v33 = vpop.f32.mrf.mxu0  ;;  %v3060_v30 = vor.u32 1.1754944e-38, %v3059_v63 }
 0x671   : > { %v2921_v60 = vadd.f32 %v2899_v33, %v955_v25  ;;  %v3007_v25 = vadd.f32 %v7611_v6, %v3006_v28  ;;  %v7718_v33 = vadd.f32 1.0, %v4759_v47  ;;  %v3065_v28 = vsub.f32 1.0, %v3064_v34  ;;  %v7738_v19 = vpop.eup %4762 }
 0x672   : > { %v3001_v47 = vsel %vm7678_vm10, %v3000_v7, %v2996_v48  ;;  %vm3069_vm10 = vweird.f32 %v7682_v26 }
 0x673   : > { %4766 = vtanh.f32 %v2921_v60  ;;  %v3011_v40 = vsel %vm7734_vm9, %v7611_v6, %v3007_v25  ;;  %v4765_v13 = vpop.eup %4764  ;;  %v3057_v6 = vand.u32 2147483647, %v7602_v53  ;;  %v3066_v34 = vmul.f32 %v7682_v26, %v3065_v28  ;;  %vm7796_vm6 = vmor %vm3068_vm2, %vm3069_vm10 }
 0x674   : > { %4768 = vrcp.f32 %v7718_v33  ;;  %v3079_v25 = vmul.f32 %v7738_v19, %v7660_v20  ;;  %v3110_v53 = vsub.f32 1.0, %v3109_v59  ;;  %v7769_v14 = vadd.f32 1.0, %v4765_v13 }
 0x675   : > { %vm3058_vm0 = vcmp.eq.f32.partialorder %v3057_v6, 8.507059e+37  ;;  %v3097_v28 = vadd.f32 %v7673_v16, %v3096_v41  ;;  %v3067_v44 = vadd.f32 %v7682_v26, %v3066_v34 }
 0x676   : > { %v3080_v46 = vsub.f32 1.0, %v3079_v25 }
 0x677   : > { %v3101_v6 = vsel %vm7789_vm3, %v7673_v16, %v3097_v28  ;;  %v3119_v28 = vand.u32 2147483648, %v7652_v23 }
 0x678   : > { %v2901_v7 = vpop.f32.mrf.mxu0  ;;  %v3081_v58 = vmul.f32 %v7738_v19, %v3080_v46 }
 0x679   : > { %v4767_v31 = vpop.eup %4766  ;;  %v2922_v48 = vadd.f32 %v2901_v7, %v7625_v36  ;;  %v7764_v36 = vsel %vm7728_vm14, %v3015_v45, %v3011_v40  ;;  %v3104_v45 = vand.u32 2147483648, %v7615_v37  ;;  %v3074_v40 = vand.u32 2147483648, %v7619_v27 }
 0x67a   : > { %v3161_v15 = vmul.f32 %v4767_v31, %v2986_v61  ;;  %v3056_v61 = vsel %vm7756_vm1, %v7643_v2, %v3052_v22  ;;  %v7778_v60 = vpop.eup %4768  ;;  %v3102_v2 = vand.u32 2147483647, %v7615_v37  ;;  %v3111_v7 = vmul.f32 %v7725_v38, %v3110_v53  ;;  %vm7830_vm1 = vmor %vm3113_vm11, %vm3114_vm4 }
 0x67b   : > { %4770 = vtanh.f32 %v2922_v48  ;;  %v3061_v52 = vsel %vm3058_vm0, %v3060_v30, %v3056_v61  ;;  %v3124_v37 = vmul.f32 %v7778_v60, %v7718_v33  ;;  %v3072_v48 = vand.u32 2147483647, %v7619_v27 }
 0x67c   : > { %v7771_v10 = vadd.f32 %v3161_v15, %v3157_v18  ;;  %v3158_v41 = vmul.f32 %v3061_v52, %v7415_v21  ;;  %v3071_v18 = vsel %vm7796_vm6, %v7682_v26, %v3067_v44  ;;  %v3105_v15 = vor.u32 1.1754944e-38, %v3104_v45 }
 0x67d   : > { %vm3103_vm12 = vcmp.eq.f32.partialorder %v3102_v2, 8.507059e+37  ;;  %vm3023_vm14 = vweird.f32 %v7627_v49  ;;  %v3112_v16 = vadd.f32 %v7725_v38, %v3111_v7  ;;  %v3075_v26 = vor.u32 1.1754944e-38, %v3074_v40 }
 0x67e   : > { %4772 = vtanh.f32 %v7771_v10  ;;  %v3106_v21 = vsel %vm3103_vm12, %v3105_v15, %v3101_v6  ;;  %v3022_v53 = vadd.f32 %v7692_v9, %v3021_v3  ;;  %vm3073_vm9 = vcmp.eq.f32.partialorder %v3072_v48, 8.507059e+37  ;;  %vm7871_vm15 = vmor %vm3023_vm14, %vm3024_vm7 }
 0x67f   : > { %4774 = vrcp.f32 %v7769_v14  ;;  %v3076_v44 = vsel %vm3073_vm9, %v3075_v26, %v3071_v18  ;;  %v3117_v3 = vand.u32 2147483647, %v7652_v23  ;;  %vm3084_vm0 = vweird.f32 %v7738_v19 }
 0x680   : > { %v2904_v13 = vpop.f32.mrf.mxu0  ;;  %v3089_v52 = vand.u32 2147483648, %v7660_v20  ;;  %v3082_v40 = vadd.f32 %v7738_v19, %v3081_v58  ;;  %v3087_v48 = vand.u32 2147483647, %v7660_v20  ;;  %v3120_v6 = vor.u32 1.1754944e-38, %v3119_v28  ;;  %vm7855_vm8 = vmor %vm3083_vm5, %vm3084_vm0 }
 0x681   : > { %v4771_v22 = vpop.eup %4770  ;;  %v2923_v63 = vadd.f32 %v2904_v13, %v7632_v29  ;;  %v7814_v29 = vstv %s7767_s16  ;;  %v3116_v13 = vsel %vm7830_vm1, %v7725_v38, %v3112_v16  ;;  %vm3118_vm10 = vcmp.eq.f32.partialorder %v3117_v3, 8.507059e+37 }
 0x682   : > { %v3162_v34 = vmul.f32 %v4771_v22, %v3001_v47  ;;  %v3125_v47 = vsub.f32 1.0, %v3124_v37  ;;  %v3159_v37 = vmul.f32 %v3076_v44, %v7461_v12  ;;  %v3090_v12 = vor.u32 1.1754944e-38, %v3089_v52 }
 0x683   : > { %4776 = vtanh.f32 %v2923_v63  ;;  %v3121_v20 = vsel %vm3118_vm10, %v3120_v6, %v3116_v13  ;;  %vm3129_vm2 = vweird.f32 %v7778_v60  ;;  %vm3088_vm3 = vcmp.eq.f32.partialorder %v3087_v48, 8.507059e+37 }
 0x684   : > { %v4773_v27 = vpop.eup %4772  ;;  %v7816_v25 = vadd.f32 %v3162_v34, %v3158_v41  ;;  %v3126_v7 = vmul.f32 %v7778_v60, %v3125_v47  ;;  %v3027_v41 = vand.u32 2147483647, %v7627_v49  ;;  %vm3128_vm6 = vweird.f32 %v7718_v33 }
 0x685   : > { %v7822_v61 = vmul.f32 %v4773_v27, %v3106_v21  ;;  %v7824_v30 = vpop.eup %4774  ;;  %v3134_v27 = vand.u32 2147483648, %v7718_v33  ;;  %v3132_v21 = vand.u32 2147483647, %v7718_v33  ;;  %vm3130_vm12 = vmor %vm3128_vm6, %vm3129_vm2  ;;  %vm3143_vm9 = vweird.f32 %v7769_v14 }
 0x686   : > { %4778 = vtanh.f32 %v7816_v25  ;;  %v3139_v23 = vmul.f32 %v7824_v30, %v7769_v14  ;;  %vm3028_vm7 = vcmp.eq.f32.partialorder %v3027_v41, 8.507059e+37  ;;  %vm3144_vm4 = vweird.f32 %v7824_v30 }
 0x687   : > { %v3179_v46 = vmul.f32 %v7814_v29, %v7822_v61  ;;  %v3135_v3 = vor.u32 1.1754944e-38, %v3134_v27  ;;  %vm3133_vm14 = vcmp.eq.f32.partialorder %v3132_v21, 8.507059e+37  ;;  %vm3145_vm11 = vmor %vm3143_vm9, %vm3144_vm4 }
 0x688   : > { %v2906_v2 = vpop.f32.mrf.mxu0  ;;  %v3140_v18 = vsub.f32 1.0, %v3139_v23 }
 0x689   : > { %v4777_v59 = vpop.eup %4776  ;;  %v2924_v22 = vadd.f32 %v2906_v2, %v7636_v35  ;;  %v7848_v31 = vadd.f32 %v3179_v46, %v7447_v51  ;;  %v3030_v35 = vor.u32 1.1754944e-38, %v3029_v24  ;;  %v3127_v24 = vadd.f32 %v7778_v60, %v3126_v7 }
 0x68a   : > { %v3163_v63 = vmul.f32 %v4777_v59, %v7764_v36  ;;  %v3086_v36 = vsel %vm7855_vm8, %v7738_v19, %v3082_v40  ;;  %v3026_v19 = vsel %vm7871_vm15, %v7692_v9, %v3022_v53  ;;  %v3141_v47 = vmul.f32 %v7824_v30, %v3140_v18 }
 0x68b   : > { %4780 = vtanh.f32 %v2924_v22  ;;  %v3091_v49 = vsel %vm3088_vm3, %v3090_v12, %v3086_v36  ;;  %v3031_v28 = vsel %vm3028_vm7, %v3030_v35, %v3026_v19  ;;  %v3131_v44 = vsel %vm3130_vm12, %v7778_v60, %v3127_v24 }
 0x68c   : > { %v4779_v51 = vpop.eup %4778  ;;  %v7862_v34 = vadd.f32 %v3163_v63, %v3159_v37  ;;  %v3160_v53 = vmul.f32 %v3091_v49, %v7490_v32  ;;  %v3136_v52 = vsel %vm3133_vm14, %v3135_v3, %v3131_v44  ;;  %v3142_v2 = vadd.f32 %v7824_v30, %v3141_v47  ;;  %v9075_v47 = vld [vmem:[#allocation23_spill] sm:$0xff] }
 0x68d   : > { %v3174_v58 = vmul.f32 %v4779_v51, %v3121_v20  ;;  %v3149_v60 = vand.u32 2147483648, %v7769_v14  ;;  %v9078_v3 = vld [vmem:[#allocation35_spill] sm:$0xff] }
 0x68e   : > { %4782 = vtanh.f32 %v7862_v34  ;;  %v3146_v13 = vsel %vm3145_vm11, %v7824_v30, %v3142_v2 }
 0x68f   : > { %v3180_v16 = vmul.f32 %v7814_v29, %v3174_v58  ;;  %v3150_v7 = vor.u32 1.1754944e-38, %v3149_v60  ;;  %v9080_v60 = vld [vmem:[#allocation14_spill] sm:$0xff] }
 0x691   : > { %v4781_v26 = vpop.eup %4780  ;;  %v7888_v9 = vadd.f32 %v3180_v16, %v7487_v43  ;;  %v3147_v43 = vand.u32 2147483647, %v7769_v14  ;;  %v3203_v14 = vpack.c.bf16 %v3174_v58, %v7822_v61  ;;  %v9074_v58 = vld [vmem:[#allocation33_spill] sm:$0xff] }
 0x692   : > { %v3164_v45 = vmul.f32 %v4781_v26, %v3031_v28  ;;  %v1008_v19 = vadd.f32 %v9074_v58, %v8860_v11  ;;  %v9076_v28 = vld [vmem:[#allocation39_spill] sm:$0xff] }
 0x693   : > { %vm3148_vm5 = vcmp.eq.f32.partialorder %v3147_v43, 8.507059e+37  ;;  %v1016_v44 = vadd.f32 %v9076_v28, %v9075_v47 }
 0x694   : > { %v4783_v46 = vpop.eup %4782  ;;  %v7891_v33 = vadd.f32 %v3164_v45, %v3160_v53  ;;  %v3151_v22 = vsel %vm3148_vm5, %v3150_v7, %v3146_v13  ;;  %v9077_v45 = vld [vmem:[#allocation11_spill] sm:$0xff] }
 0x695   : > { %v3175_v40 = vmul.f32 %v4783_v46, %v3136_v52  ;;  %v1011_v46 = vadd.f32 %v9078_v3, %v9077_v45  ;;  %v9087_v3 = vld [vmem:[#allocation17_spill] sm:$0xff] }
 0x696   : > { %4784 = vtanh.f32 %v7891_v33 }
 0x697   : > { %v3181_v32 = vmul.f32 %v7814_v29, %v3175_v40 }
 0x699   : > { %v7902_v59 = vadd.f32 %v3181_v32, %v7501_v0  ;;  %v9070_v0 = vld [vmem:[#allocation16_spill] sm:$0xff] }
 0x69c   : > { %v4785_v23 = vpop.eup %4784 }
 0x69d   : > { %v3176_v37 = vmul.f32 %v4785_v23, %v3151_v22 }
 0x69f   : > { %v3182_v63 = vmul.f32 %v7814_v29, %v3176_v37  ;;  %v3204_v48 = vpack.c.bf16 %v3176_v37, %v3175_v40  ;;  %v9079_v40 = vld [vmem:[#allocation12_spill] sm:$0xff] }
 0x6a0   : > { %v1003_v43 = vadd.f32 %v9080_v60, %v9079_v40  ;;  %v9089_v60 = vld [vmem:[#allocation22_spill] sm:$0xff] }
 0x6a1   : > { %v7906_v6 = vadd.f32 %v3182_v63, %v7505_v55  ;;  %3211 = vmatpush.bf16.msrb.mxu1 %v3204_v48  ;;  %v996_v55 = vadd.f32 %v9070_v0, %v5353_v56  ;;  %v9081_v48 = vld [vmem:[#allocation18_spill] sm:$0xff] }
 0x6a5   : > { %3212 = vmatpush.bf16.msrb.mxu1 %v3203_v14  ;;  %v9082_v14 = vld [vmem:[#allocation71_spill] sm:$0xff] }
 0x6a6   : > { %v1018_v0 = vadd.f32 %v9082_v14, %v9081_v48 }
 0x6a8   : > { %4284 = vmatmul.msk.bf16.vlgmr.msrb.gmra.mxu1 %vm1455_vm13, %v7511_v4 }
 0x6b8   : > { %4285 = vmatmul.msk.bf16.gmra.mxu1 %vm1455_vm13, %v7518_v1 }
 0x6c8   : > { %4286 = vmatmul.msk.bf16.gmra.mxu1 %vm1455_vm13, %v7525_v17 }
 0x6d8   : > { %4287 = vmatmul.msk.bf16.gmra.mxu1 %vm1455_vm13, %v7532_v50  ;;  %v9071_v50 = vld [vmem:[#allocation20_spill] sm:$0xff] }
 0x6d9   : > { %v1001_v29 = vadd.f32 %v9071_v50, %v5355_v57  ;;  %v9084_v50 = vld [vmem:[#allocation37_spill] sm:$0xff] }
 0x6e8   : > { %4288 = vmatmul.msk.bf16.gmra.mxu1 %vm1455_vm13, %v7539_v5 }
 0x6f8   : > { %4289 = vmatmul.msk.bf16.gmra.mxu1 %vm1455_vm13, %v7546_v54  ;;  %v9072_v54 = vld [vmem:[#allocation30_spill] sm:$0xff] }
 0x6f9   : > { %v1006_v38 = vadd.f32 %v9072_v54, %v5380_v8 }
 0x708   : > { %4290 = vmatmul.msk.bf16.gmra.mxu1 %vm1455_vm13, %v7553_v39 }
 0x718   : > { %4291 = vmatmul.msk.bf16.gmra.mxu1 %vm1455_vm13, %v7560_v42  ;;  %v9073_v42 = vld [vmem:[#allocation25_spill] sm:$0xff] }
 0x719   : > { %v998_v51 = vadd.f32 %v9073_v42, %v5362_v62 }
 0x725   : > { %v3214_v4 = vpop.f32.mrf.mxu1 }
 0x726   : > { %v3254_v1 = vadd.f32 %v3214_v4, %v996_v55 }
 0x728   : > { %v4292_v20 = vmul.f32 -1.442695, %v3254_v1 }
 0x72a   : > { %4786 = vpow2.f32 %v4292_v20 }
 0x72d   : > { %v3216_v17 = vpop.f32.mrf.mxu1 }
 0x72e   : > { %v3255_v36 = vadd.f32 %v3216_v17, %v998_v51  ;;  %v9083_v17 = vld [vmem:[#allocation13_spill] sm:$0xff] }
 0x730   : > { %v4293_v18 = vmul.f32 -1.442695, %v3255_v36  ;;  %v4787_v49 = vpop.eup %4786 }
 0x731   : > { %v7937_v53 = vadd.f32 1.0, %v4787_v49 }
 0x732   : > { %4788 = vpow2.f32 %v4293_v18 }
 0x733   : > { %vm3323_vm0 = vweird.f32 %v7937_v53 }
 0x735   : > { %v3219_v61 = vpop.f32.mrf.mxu1 }
 0x736   : > { %v3256_v5 = vadd.f32 %v3219_v61, %v1001_v29  ;;  %v1013_v29 = vadd.f32 %v9084_v50, %v9083_v17  ;;  %v9096_v50 = vld [vmem:[#allocation77_spill] sm:$0xff] }
 0x738   : > { %v4294_v27 = vmul.f32 -1.442695, %v3256_v5  ;;  %v4789_v16 = vpop.eup %4788 }
 0x739   : > { %v7943_v32 = vadd.f32 1.0, %v4789_v16 }
 0x73b   : > { %vm3338_vm2 = vweird.f32 %v7943_v32 }
 0x73d   : > { %v3221_v30 = vpop.f32.mrf.mxu1 }
 0x73e   : > { %v3257_v23 = vadd.f32 %v3221_v30, %v1003_v43  ;;  %v9090_v43 = vld [vmem:[#allocation74_spill] sm:$0xff] }
 0x740   : > { %v4295_v1 = vmul.f32 -1.442695, %v3257_v23  ;;  %v9092_v23 = vld [vmem:[#allocation75_spill] sm:$0xff] }
 0x745   : > { %v3224_v41 = vpop.f32.mrf.mxu1 }
 0x746   : > { %v3258_v39 = vadd.f32 %v3224_v41, %v1006_v38 }
 0x748   : > { %v4296_v24 = vmul.f32 -1.442695, %v3258_v39 }
 0x74a   : > { %4790 = vpow2.f32 %v4296_v24  ;;  %v9086_v24 = vld [vmem:[#allocation72_spill] sm:$0xff] }
 0x74b   : > { %4792 = vpow2.f32 %v4294_v27 }
 0x74c   : > { %4794 = vrcp.f32 %v7937_v53 }
 0x74d   : > { %v3226_v35 = vpop.f32.mrf.mxu1 }
 0x74e   : > { %v3259_v21 = vadd.f32 %v3226_v35, %v1008_v19 }
 0x750   : > { %v4297_v52 = vmul.f32 -1.442695, %v3259_v21  ;;  %v4791_v2 = vpop.eup %4790 }
 0x751   : > { %v7946_v22 = vadd.f32 1.0, %v4791_v2  ;;  %v4793_v37 = vpop.eup %4792 }
 0x752   : > { %4796 = vpow2.f32 %v4297_v52  ;;  %v7953_v61 = vadd.f32 1.0, %v4793_v37  ;;  %v7956_v30 = vpop.eup %4794 }
 0x753   : > { %4798 = vrcp.f32 %v7943_v32  ;;  %v3319_v39 = vmul.f32 %v7956_v30, %v7937_v53  ;;  %vm3324_vm1 = vweird.f32 %v7956_v30  ;;  %vm3383_vm12 = vweird.f32 %v7946_v22 }
 0x754   : > { %4800 = vrcp.f32 %v7946_v22  ;;  %vm8025_vm10 = vmor %vm3323_vm0, %vm3324_vm1  ;;  %vm3353_vm9 = vweird.f32 %v7953_v61 }
 0x755   : > { %v3229_v12 = vpop.f32.mrf.mxu1  ;;  %v3320_v27 = vsub.f32 1.0, %v3319_v39 }
 0x756   : > { %v3260_v7 = vadd.f32 %v3229_v12, %v1011_v46  ;;  %v9088_v46 = vld [vmem:[#allocation73_spill] sm:$0xff] }
 0x757   : > { %v1023_v52 = vadd.f32 %v9088_v46, %v9087_v3  ;;  %v3321_v14 = vmul.f32 %v7956_v30, %v3320_v27 }
 0x758   : > { %v4298_v55 = vmul.f32 -1.442695, %v3260_v7  ;;  %v4797_v54 = vpop.eup %4796  ;;  %v9091_v7 = vld [vmem:[#allocation26_spill] sm:$0xff] }
 0x759   : > { %v7958_v41 = vpop.eup %4798  ;;  %v7963_v42 = vadd.f32 1.0, %v4797_v54  ;;  %v7986_v37 = vadd.f32 %v9092_v23, %v9091_v7  ;;  %v3322_v27 = vadd.f32 %v7956_v30, %v3321_v14 }
 0x75a   : > { %v7965_v51 = vpop.eup %4800  ;;  %v3334_v12 = vmul.f32 %v7958_v41, %v7943_v32  ;;  %vm3339_vm8 = vweird.f32 %v7958_v41 }
 0x75b   : > { %v3379_v28 = vmul.f32 %v7965_v51, %v7946_v22  ;;  %vm8046_vm6 = vmor %vm3338_vm2, %vm3339_vm8  ;;  %vm3384_vm7 = vweird.f32 %v7965_v51  ;;  %vm3398_vm8 = vweird.f32 %v7963_v42 }
 0x75c   : > { %vm8072_vm14 = vmor %vm3383_vm12, %vm3384_vm7 }
 0x75d   : > { %v3231_v15 = vpop.f32.mrf.mxu1  ;;  %v3380_v39 = vsub.f32 1.0, %v3379_v28 }
 0x75e   : > { %v3261_v38 = vadd.f32 %v3231_v15, %v1013_v29  ;;  %v9085_v15 = vld [vmem:[#allocation15_spill] sm:$0xff] }
 0x75f   : > { %v1021_v58 = vadd.f32 %v9086_v24, %v9085_v15  ;;  %v3342_v24 = vand.u32 2147483647, %v7943_v32  ;;  %v3381_v28 = vmul.f32 %v7965_v51, %v3380_v39 }
 0x760   : > { %v4299_v36 = vmul.f32 -1.442695, %v3261_v38 }
 0x761   : > { %vm8039_vm3 = vcmp.eq.f32.partialorder %v3342_v24, 8.507059e+37 }
 0x765   : > { %v3234_v26 = vpop.f32.mrf.mxu1 }
 0x766   : > { %v3262_v13 = vadd.f32 %v3234_v26, %v1016_v44  ;;  %v3335_v26 = vsub.f32 1.0, %v3334_v12  ;;  %v3327_v12 = vand.u32 2147483647, %v7937_v53 }
 0x768   : > { %v4300_v63 = vmul.f32 -1.442695, %v3262_v13  ;;  %v1026_v13 = vadd.f32 %v9090_v43, %v9089_v60  ;;  %vm8029_vm15 = vcmp.eq.f32.partialorder %v3327_v12, 8.507059e+37  ;;  %v3357_v12 = vand.u32 2147483647, %v7953_v61 }
 0x76a   : > { %4802 = vpow2.f32 %v4300_v63  ;;  %vm8089_vm11 = vcmp.eq.f32.partialorder %v3357_v12, 8.507059e+37 }
 0x76b   : > { %4804 = vpow2.f32 %v4298_v55  ;;  %v9094_v55 = vld [vmem:[#allocation76_spill] sm:$0xff] }
 0x76c   : > { %4806 = vpow2.f32 %v4295_v1  ;;  %v9095_v1 = vld [vmem:[#allocation27_spill] sm:$0xff] }
 0x76d   : > { %v3236_v4 = vpop.f32.mrf.mxu1  ;;  %4808 = vrcp.f32 %v7953_v61  ;;  %v7997_v29 = vadd.f32 %v9096_v50, %v9095_v1 }
 0x76e   : > { %v3263_v5 = vadd.f32 %v3236_v4, %v1018_v0  ;;  %v9093_v0 = vld [vmem:[#allocation21_spill] sm:$0xff] }
 0x76f   : > { %v7993_v4 = vadd.f32 %v9094_v55, %v9093_v0 }
 0x770   : > { %v4301_v35 = vmul.f32 -1.442695, %v3263_v5  ;;  %v4803_v18 = vpop.eup %4802 }
 0x771   : > { %v4805_v19 = vpop.eup %4804  ;;  %v7976_v44 = vadd.f32 1.0, %v4803_v18  ;;  %v3329_v18 = vand.u32 2147483648, %v7937_v53 }
 0x772   : > { %4810 = vpow2.f32 %v4301_v35  ;;  %v4807_v49 = vpop.eup %4806  ;;  %v7980_v2 = vadd.f32 1.0, %v4805_v19 }
 0x773   : > { %4812 = vrcp.f32 %v7963_v42  ;;  %v7972_v16 = vpop.eup %4808  ;;  %v7988_v63 = vadd.f32 1.0, %v4807_v49  ;;  %v3344_v49 = vand.u32 2147483648, %v7943_v32  ;;  %v3330_v53 = vor.u32 1.1754944e-38, %v3329_v18 }
 0x774   : > { %4814 = vpow2.f32 %v4299_v36  ;;  %v3349_v5 = vmul.f32 %v7972_v16, %v7953_v61  ;;  %v3336_v36 = vmul.f32 %v7958_v41, %v3335_v26  ;;  %vm3354_vm4 = vweird.f32 %v7972_v16 }
 0x775   : > { %v3239_v20 = vpop.f32.mrf.mxu1  ;;  %4816 = vrcp.f32 %v7976_v44  ;;  %vm8095_vm1 = vmor %vm3353_vm9, %vm3354_vm4  ;;  %v3374_v12 = vand.u32 2147483648, %v7988_v63  ;;  %vm3413_vm7 = vweird.f32 %v7980_v2 }
 0x776   : > { %v3264_v21 = vadd.f32 %v3239_v20, %v1021_v58  ;;  %4818 = vrcp.f32 %v7980_v2  ;;  %v3337_v43 = vadd.f32 %v7958_v41, %v3336_v36  ;;  %v3359_v36 = vand.u32 2147483648, %v7953_v61 }
 0x777   : > { %4820 = vrcp.f32 %v7988_v63 }
 0x778   : > { %v4302_v54 = vmul.f32 -1.442695, %v3264_v21  ;;  %v4811_v38 = vpop.eup %4810  ;;  %v3350_v21 = vsub.f32 1.0, %v3349_v5  ;;  %v3326_v5 = vsel %vm8025_vm10, %v7956_v30, %v3322_v27 }
 0x779   : > { %v8004_v20 = vpop.eup %4812  ;;  %v8013_v26 = vadd.f32 1.0, %v4811_v38  ;;  %v3345_v38 = vor.u32 1.1754944e-38, %v3344_v49  ;;  %v3389_v49 = vand.u32 2147483648, %v7946_v22 }
 0x77a   : > { %v4815_v58 = vpop.eup %4814  ;;  %4822 = vpow2.f32 %v4302_v54  ;;  %v3394_v46 = vmul.f32 %v8004_v20, %v7963_v42  ;;  %v3351_v32 = vmul.f32 %v7972_v16, %v3350_v21  ;;  %vm3399_vm0 = vweird.f32 %v8004_v20 }
 0x77b   : > { %v8034_v55 = vpop.eup %4816  ;;  %4824 = vrcp.f32 %v8013_v26  ;;  %v3390_v0 = vor.u32 1.1754944e-38, %v3389_v49  ;;  %vm8117_vm10 = vmor %vm3398_vm8, %vm3399_vm0  ;;  %vm3458_vm0 = vweird.f32 %v8013_v26 }
 0x77c   : > { %v8043_v39 = vpop.eup %4818  ;;  %v3395_v18 = vsub.f32 1.0, %v3394_v46  ;;  %v3439_v21 = vmul.f32 %v8034_v55, %v7976_v44  ;;  %vm3444_vm2 = vweird.f32 %v8034_v55 }
 0x77d   : > { %v3241_v35 = vpop.f32.mrf.mxu1  ;;  %v8053_v30 = vpop.eup %4820  ;;  %v3409_v46 = vmul.f32 %v8043_v39, %v7980_v2 }
 0x77e   : > { %v3265_v19 = vadd.f32 %v3241_v35, %v1023_v52  ;;  %v8021_v52 = vadd.f32 1.0, %v4815_v58  ;;  %v3382_v58 = vadd.f32 %v7965_v51, %v3381_v28  ;;  %v3387_v28 = vand.u32 2147483647, %v7946_v22 }
 0x77f   : > { %v3396_v35 = vmul.f32 %v8004_v20, %v3395_v18  ;;  %v3331_v22 = vsel %vm8029_vm15, %v3330_v53, %v3326_v5  ;;  %v3440_v7 = vsub.f32 1.0, %v3439_v21  ;;  %v3410_v18 = vsub.f32 1.0, %v3409_v46 }
 0x780   : > { %v4303_v50 = vmul.f32 -1.442695, %v3265_v19  ;;  %v3341_v19 = vsel %vm8046_vm6, %v7958_v41, %v3337_v43  ;;  %v4823_v27 = vpop.eup %4822  ;;  %4826 = vrcp.f32 %v8021_v52  ;;  %v3364_v41 = vmul.f32 %v8053_v30, %v7988_v63 }
 0x781   : > { %v8086_v1 = vpop.eup %4824  ;;  %vm3388_vm5 = vcmp.eq.f32.partialorder %v3387_v28, 8.507059e+37  ;;  %v3346_v14 = vsel %vm8039_vm3, %v3345_v38, %v3341_v19  ;;  %v3411_v46 = vmul.f32 %v8043_v39, %v3410_v18  ;;  %vm3414_vm3 = vweird.f32 %v8043_v39 }
 0x782   : > { %4828 = vpow2.f32 %v4303_v50  ;;  %v3386_v50 = vsel %vm8072_vm14, %v7965_v51, %v3382_v58  ;;  %v3360_v51 = vor.u32 1.1754944e-38, %v3359_v36  ;;  %v3365_v58 = vsub.f32 1.0, %v3364_v41  ;;  %vm8157_vm14 = vmor %vm3413_vm7, %vm3414_vm3 }
 0x783   : > { %v3454_v54 = vmul.f32 %v8086_v1, %v8013_v26  ;;  %v3397_v36 = vadd.f32 %v8004_v20, %v3396_v35  ;;  %v3412_v53 = vadd.f32 %v8043_v39, %v3411_v46  ;;  %vm3443_vm6 = vweird.f32 %v7976_v44 }
 0x784   : > { %vm8150_vm12 = vmor %vm3443_vm6, %vm3444_vm2  ;;  %vm3369_vm4 = vweird.f32 %v8053_v30  ;;  %vm3428_vm8 = vweird.f32 %v8021_v52 }
 0x785   : > { %v3244_v24 = vpop.f32.mrf.mxu1 }
 0x786   : > { %v3266_v23 = vadd.f32 %v3244_v24, %v1026_v13  ;;  %v3352_v13 = vadd.f32 %v7972_v16, %v3351_v32  ;;  %v8079_v24 = vadd.f32 1.0, %v4823_v27  ;;  %v8099_v5 = vpop.eup %4826  ;;  %v3391_v27 = vsel %vm3388_vm5, %v3390_v0, %v3386_v50 }
 0x787   : > { %v3404_v0 = vand.u32 2147483648, %v7963_v42  ;;  %v3502_v28 = vmul.f32 %v3391_v27, %v7771_v10  ;;  %vm3459_vm5 = vweird.f32 %v8086_v1 }
 0x788   : > { %4830 = vtanh.f32 %v3266_v23  ;;  %v3356_v61 = vsel %vm8095_vm1, %v7972_v16, %v3352_v13  ;;  %v4829_v49 = vpop.eup %4828  ;;  %v3402_v16 = vand.u32 2147483647, %v7963_v42  ;;  %v3441_v23 = vmul.f32 %v8034_v55, %v3440_v7 }
 0x789   : > { %4832 = vrcp.f32 %v8079_v24  ;;  %v3424_v13 = vmul.f32 %v8099_v5, %v8021_v52  ;;  %v3366_v7 = vmul.f32 %v8053_v30, %v3365_v58  ;;  %v3455_v42 = vsub.f32 1.0, %v3454_v54 }
 0x78a   : > { %v8130_v35 = vadd.f32 1.0, %v4829_v49  ;;  %v3405_v50 = vor.u32 1.1754944e-38, %v3404_v0  ;;  %vm3403_vm15 = vcmp.eq.f32.partialorder %v3402_v16, 8.507059e+37  ;;  %v3442_v18 = vadd.f32 %v8034_v55, %v3441_v23 }
 0x78b   : > { %v3425_v58 = vsub.f32 1.0, %v3424_v13 }
 0x78c   : > { %v3446_v16 = vsel %vm8150_vm12, %v8034_v55, %v3442_v18  ;;  %v3464_v18 = vand.u32 2147483648, %v8013_v26 }
 0x78d   : > { %v3246_v38 = vpop.f32.mrf.mxu1  ;;  %v3426_v43 = vmul.f32 %v8099_v5, %v3425_v58 }
 0x78e   : > { %v4831_v19 = vpop.eup %4830  ;;  %v3267_v21 = vadd.f32 %v3246_v38, %v7986_v37  ;;  %v8125_v37 = vsel %vm8089_vm11, %v3360_v51, %v3356_v61  ;;  %v3449_v51 = vand.u32 2147483648, %v7976_v44  ;;  %v3419_v61 = vand.u32 2147483648, %v7980_v2 }
 0x78f   : > { %v3506_v41 = vmul.f32 %v4831_v19, %v3331_v22  ;;  %v3401_v22 = vsel %vm8117_vm10, %v8004_v20, %v3397_v36  ;;  %v8139_v32 = vpop.eup %4832  ;;  %v3447_v20 = vand.u32 2147483647, %v7976_v44  ;;  %v3456_v38 = vmul.f32 %v8086_v1, %v3455_v42  ;;  %vm8191_vm10 = vmor %vm3458_vm0, %vm3459_vm5 }
 0x790   : > { %4834 = vtanh.f32 %v3267_v21  ;;  %v3406_v27 = vsel %vm3403_vm15, %v3405_v50, %v3401_v22  ;;  %v3469_v44 = vmul.f32 %v8139_v32, %v8079_v24  ;;  %v3417_v21 = vand.u32 2147483647, %v7980_v2 }
 0x791   : > { %v8132_v10 = vadd.f32 %v3506_v41, %v3502_v28  ;;  %v3503_v23 = vmul.f32 %v3406_v27, %v7816_v25  ;;  %v3416_v28 = vsel %vm8157_vm14, %v8043_v39, %v3412_v53  ;;  %v3450_v41 = vor.u32 1.1754944e-38, %v3449_v51 }
 0x792   : > { %vm3448_vm9 = vcmp.eq.f32.partialorder %v3447_v20, 8.507059e+37  ;;  %vm3368_vm11 = vweird.f32 %v7988_v63  ;;  %v3457_v55 = vadd.f32 %v8086_v1, %v3456_v38  ;;  %v3420_v39 = vor.u32 1.1754944e-38, %v3419_v61 }
 0x793   : > { %4836 = vtanh.f32 %v8132_v10  ;;  %v3451_v25 = vsel %vm3448_vm9, %v3450_v41, %v3446_v16  ;;  %v3367_v42 = vadd.f32 %v8053_v30, %v3366_v7  ;;  %vm3418_vm1 = vcmp.eq.f32.partialorder %v3417_v21, 8.507059e+37  ;;  %vm8232_vm6 = vmor %vm3368_vm11, %vm3369_vm4  ;;  %v9124_v41 = vld [vmem:[#allocation49_spill] sm:$0xff] }
 0x794   : > { %4838 = vrcp.f32 %v8130_v35  ;;  %v3421_v53 = vsel %vm3418_vm1, %v3420_v39, %v3416_v28  ;;  %v3462_v7 = vand.u32 2147483647, %v8013_v26  ;;  %vm3429_vm15 = vweird.f32 %v8099_v5 }
 0x795   : > { %v3249_v49 = vpop.f32.mrf.mxu1  ;;  %v3434_v27 = vand.u32 2147483648, %v8021_v52  ;;  %v3427_v61 = vadd.f32 %v8099_v5, %v3426_v43  ;;  %v3432_v21 = vand.u32 2147483647, %v8021_v52  ;;  %v3465_v16 = vor.u32 1.1754944e-38, %v3464_v18  ;;  %vm8216_vm2 = vmor %vm3428_vm8, %vm3429_vm15 }
 0x796   : > { %v4835_v36 = vpop.eup %4834  ;;  %v3268_v0 = vadd.f32 %v3249_v49, %v7993_v4  ;;  %v8175_v4 = vstv %s8128_s17  ;;  %v3461_v49 = vsel %vm8191_vm10, %v8086_v1, %v3457_v55  ;;  %vm3463_vm3 = vcmp.eq.f32.partialorder %v3462_v7, 8.507059e+37  ;;  %v4939_v1 = vld [vmem:[%s8665_s2 + $0x28] sm:$0xff] }
 0x797   : > { %v3507_v46 = vmul.f32 %v4835_v36, %v3346_v14  ;;  %v3470_v14 = vsub.f32 1.0, %v3469_v44  ;;  %v3504_v44 = vmul.f32 %v3421_v53, %v7862_v34  ;;  %v3435_v34 = vor.u32 1.1754944e-38, %v3434_v27 }
 0x798   : > { %4840 = vtanh.f32 %v3268_v0  ;;  %v3466_v52 = vsel %vm3463_vm3, %v3465_v16, %v3461_v49  ;;  %vm3474_vm7 = vweird.f32 %v8139_v32  ;;  %vm3433_vm12 = vcmp.eq.f32.partialorder %v3432_v21, 8.507059e+37 }
 0x799   : > { %v4837_v2 = vpop.eup %4836  ;;  %v8177_v13 = vadd.f32 %v3507_v46, %v3503_v23  ;;  %v3471_v38 = vmul.f32 %v8139_v32, %v3470_v14  ;;  %v3372_v23 = vand.u32 2147483647, %v7988_v63  ;;  %vm3473_vm14 = vweird.f32 %v8079_v24 }
 0x79a   : > { %v8183_v22 = vmul.f32 %v4837_v2, %v3451_v25  ;;  %v8185_v50 = vpop.eup %4838  ;;  %v3479_v2 = vand.u32 2147483648, %v8079_v24  ;;  %v3477_v25 = vand.u32 2147483647, %v8079_v24  ;;  %vm3475_vm9 = vmor %vm3473_vm14, %vm3474_vm7  ;;  %vm3488_vm1 = vweird.f32 %v8130_v35 }
 0x79b   : > { %4842 = vtanh.f32 %v8177_v13  ;;  %v3484_v26 = vmul.f32 %v8185_v50, %v8130_v35  ;;  %vm3373_vm4 = vcmp.eq.f32.partialorder %v3372_v23, 8.507059e+37  ;;  %vm3489_vm5 = vweird.f32 %v8185_v50  ;;  %v4940_v23 = vld [vmem:[%s8665_s2 + $0x30] sm:$0xff] }
 0x79c   : > { %v3524_v58 = vmul.f32 %v8175_v4, %v8183_v22  ;;  %v3480_v7 = vor.u32 1.1754944e-38, %v3479_v2  ;;  %vm3478_vm11 = vcmp.eq.f32.partialorder %v3477_v25, 8.507059e+37  ;;  %vm3490_vm0 = vmor %vm3488_vm1, %vm3489_vm5 }
 0x79d   : > { %v3251_v20 = vpop.f32.mrf.mxu1  ;;  %v3485_v28 = vsub.f32 1.0, %v3484_v26 }
 0x79e   : > { %v4841_v54 = vpop.eup %4840  ;;  %v3269_v36 = vadd.f32 %v3251_v20, %v7997_v29  ;;  %v8209_v19 = vadd.f32 %v3524_v58, %v7848_v31  ;;  %v3375_v29 = vor.u32 1.1754944e-38, %v3374_v12  ;;  %v3472_v12 = vadd.f32 %v8139_v32, %v3471_v38 }
 0x79f   : > { %v3508_v0 = vmul.f32 %v4841_v54, %v8125_v37  ;;  %v3431_v37 = vsel %vm8216_vm2, %v8099_v5, %v3427_v61  ;;  %v3371_v5 = vsel %vm8232_vm6, %v8053_v30, %v3367_v42  ;;  %v3486_v14 = vmul.f32 %v8185_v50, %v3485_v28 }
 0x7a0   : > { %4844 = vtanh.f32 %v3269_v36  ;;  %v3436_v63 = vsel %vm3433_vm12, %v3435_v34, %v3431_v37  ;;  %v3376_v18 = vsel %vm3373_vm4, %v3375_v29, %v3371_v5  ;;  %v3476_v53 = vsel %vm3475_vm9, %v8139_v32, %v3472_v12  ;;  %v4941_v29 = vld [vmem:[%s8665_s2 + $0x38] sm:$0xff] }
 0x7a1   : > { %v4843_v31 = vpop.eup %4842  ;;  %v8223_v46 = vadd.f32 %v3508_v0, %v3504_v44  ;;  %v3505_v42 = vmul.f32 %v3436_v63, %v7891_v33  ;;  %v3481_v27 = vsel %vm3478_vm11, %v3480_v7, %v3476_v53  ;;  %v3487_v20 = vadd.f32 %v8185_v50, %v3486_v14  ;;  %v9126_v53 = vld [vmem:[#allocation51_spill] sm:$0xff] }
 0x7a2   : > { %v3519_v43 = vmul.f32 %v4843_v31, %v3466_v52  ;;  %v3494_v32 = vand.u32 2147483648, %v8130_v35  ;;  %v9123_v31 = vld [vmem:[#allocation41_spill] sm:$0xff]  ;;  %v1072_v12 = vadd.f32 %v9124_v41, %v5355_v57 }
 0x7a3   : > { %4846 = vtanh.f32 %v8223_v46  ;;  %v3491_v49 = vsel %vm3490_vm0, %v8185_v50, %v3487_v20  ;;  %v4935_v50 = vld [vmem:[%s8665_s2 + $0x8] sm:$0xff]  ;;  %v1067_v34 = vadd.f32 %v9123_v31, %v5353_v56  ;;  %v9127_v57 = vld [vmem:[#allocation53_spill] sm:$0xff] }
 0x7a4   : > { %v3525_v55 = vmul.f32 %v8175_v4, %v3519_v43  ;;  %v3495_v38 = vor.u32 1.1754944e-38, %v3494_v32  ;;  %v1079_v20 = vadd.f32 %v9127_v57, %v8860_v11  ;;  %v9132_v31 = vld [vmem:[#allocation55_spill] sm:$0xff] }
 0x7a6   : > { %v4845_v39 = vpop.eup %4844  ;;  %v8249_v30 = vadd.f32 %v3525_v55, %v7888_v9  ;;  %v3492_v9 = vand.u32 2147483647, %v8130_v35  ;;  %v3548_v35 = vpack.c.bf16 %v3519_v43, %v8183_v22  ;;  %v4938_v22 = vld [vmem:[%s8665_s2 + $0x20] sm:$0xff]  ;;  %v9125_v55 = vld [vmem:[#allocation45_spill] sm:$0xff] }
 0x7a7   : > { %v3509_v51 = vmul.f32 %v4845_v39, %v3376_v18  ;;  %v1069_v39 = vadd.f32 %v9125_v55, %v5362_v62 }
 0x7a8   : > { %vm3493_vm8 = vcmp.eq.f32.partialorder %v3492_v9, 8.507059e+37 }
 0x7a9   : > { %v4847_v58 = vpop.eup %4846  ;;  %v8252_v24 = vadd.f32 %v3509_v51, %v3505_v42  ;;  %v3496_v36 = vsel %vm3493_vm8, %v3495_v38, %v3491_v49  ;;  %v1077_v42 = vadd.f32 %v9126_v53, %v5380_v8  ;;  %v9128_v49 = vld [vmem:[#allocation78_spill] sm:$0xff] }
 0x7aa   : > { %v3520_v61 = vmul.f32 %v4847_v58, %v3481_v27  ;;  %v1087_v38 = vadd.f32 %v9128_v49, %v9075_v47 }
 0x7ab   : > { %4848 = vtanh.f32 %v8252_v24 }
 0x7ac   : > { %v3526_v33 = vmul.f32 %v8175_v4, %v3520_v61 }
 0x7ae   : > { %v8263_v54 = vadd.f32 %v3526_v33, %v7902_v59  ;;  %v4934_v59 = vld [vmem:[%s8665_s2] sm:$0xff] }
 0x7b1   : > { %v4849_v26 = vpop.eup %4848 }
 0x7b2   : > { %v3521_v44 = vmul.f32 %v4849_v26, %v3496_v36  ;;  %v9129_v26 = vld [vmem:[#allocation47_spill] sm:$0xff] }
 0x7b3   : > { %v1082_v36 = vadd.f32 %v9129_v26, %v9077_v45  ;;  %v9131_v45 = vld [vmem:[#allocation79_spill] sm:$0xff] }
 0x7b4   : > { %v3527_v0 = vmul.f32 %v8175_v4, %v3521_v44  ;;  %v3549_v21 = vpack.c.bf16 %v3521_v44, %v3520_v61  ;;  %v4937_v4 = vld [vmem:[%s8665_s2 + $0x18] sm:$0xff] }
 0x7b6   : > { %v8267_v16 = vadd.f32 %v3527_v0, %v7906_v6  ;;  %3556 = vmatpush.bf16.msrb.mxu2 %v3549_v21  ;;  %v4936_v6 = vld [vmem:[%s8665_s2 + $0x10] sm:$0xff]  ;;  %v9130_v21 = vld [vmem:[#allocation43_spill] sm:$0xff] }
 0x7b7   : > { %v1074_v11 = vadd.f32 %v9130_v21, %v9079_v40  ;;  %v9140_v21 = vld [vmem:[#allocation27_spill] sm:$0xff] }
 0x7ba   : > { %3557 = vmatpush.bf16.msrb.mxu2 %v3548_v35 }
 0x7bd   : > { %4305 = vmatmul.msk.bf16.vlgmr.msrb.gmra.mxu2 %vm1455_vm13, %v4934_v59 }
 0x7cd   : > { %4306 = vmatmul.msk.bf16.gmra.mxu2 %vm1455_vm13, %v4935_v50 }
 0x7dd   : > { %4307 = vmatmul.msk.bf16.gmra.mxu2 %vm1455_vm13, %v4936_v6 }
 0x7ed   : > { %4308 = vmatmul.msk.bf16.gmra.mxu2 %vm1455_vm13, %v4937_v4 }
 0x7fd   : > { %4309 = vmatmul.msk.bf16.gmra.mxu2 %vm1455_vm13, %v4938_v22 }
 0x80d   : > { %4310 = vmatmul.msk.bf16.gmra.mxu2 %vm1455_vm13, %v4939_v1  ;;  %v1089_v1 = vadd.f32 %v9131_v45, %v9081_v48 }
 0x81d   : > { %4311 = vmatmul.msk.bf16.gmra.mxu2 %vm1455_vm13, %v4940_v23 }
 0x82d   : > { %4312 = vmatmul.msk.bf16.gmra.mxu2 %vm1455_vm13, %v4941_v29 }
 0x840   : > { %v3559_v37 = vpop.f32.mrf.mxu2 }
 0x841   : > { %v3599_v52 = vadd.f32 %v3559_v37, %v1067_v34  ;;  %v1084_v34 = vadd.f32 %v9132_v31, %v9083_v17 }
 0x843   : > { %v4313_v56 = vmul.f32 -1.442695, %v3599_v52 }
 0x845   : > { %4850 = vpow2.f32 %v4313_v56 }
 0x848   : > { %v3561_v28 = vpop.f32.mrf.mxu2 }
 0x849   : > { %v3600_v18 = vadd.f32 %v3561_v28, %v1069_v39 }
 0x84b   : > { %v4314_v7 = vmul.f32 -1.442695, %v3600_v18  ;;  %v4851_v32 = vpop.eup %4850 }
 0x84c   : > { %v8314_v8 = vadd.f32 1.0, %v4851_v32  ;;  %v9135_v32 = vld [vmem:[#allocation82_spill] sm:$0xff] }
 0x84d   : > { %4852 = vpow2.f32 %v4314_v7 }
 0x84e   : > { %vm3668_vm10 = vweird.f32 %v8314_v8 }
 0x850   : > { %v3564_v43 = vpop.f32.mrf.mxu2 }
 0x851   : > { %v3601_v5 = vadd.f32 %v3564_v43, %v1072_v12 }
 0x853   : > { %v4315_v61 = vmul.f32 -1.442695, %v3601_v5  ;;  %v4853_v62 = vpop.eup %4852 }
 0x854   : > { %v8320_v35 = vadd.f32 1.0, %v4853_v62  ;;  %v9136_v62 = vld [vmem:[#allocation26_spill] sm:$0xff] }
 0x856   : > { %vm3683_vm6 = vweird.f32 %v8320_v35 }
 0x858   : > { %v3566_v2 = vpop.f32.mrf.mxu2 }
 0x859   : > { %v3602_v6 = vadd.f32 %v3566_v2, %v1074_v11  ;;  %v9141_v11 = vld [vmem:[#allocation85_spill] sm:$0xff] }
 0x85b   : > { %v4316_v40 = vmul.f32 -1.442695, %v3602_v6 }
 0x860   : > { %v3569_v63 = vpop.f32.mrf.mxu2 }
 0x861   : > { %v3603_v51 = vadd.f32 %v3569_v63, %v1077_v42 }
 0x863   : > { %v4317_v27 = vmul.f32 -1.442695, %v3603_v51 }
 0x865   : > { %4854 = vpow2.f32 %v4317_v27 }
 0x866   : > { %4856 = vpow2.f32 %v4315_v61 }
 0x867   : > { %4858 = vrcp.f32 %v8314_v8 }
 0x868   : > { %v3571_v25 = vpop.f32.mrf.mxu2 }
 0x869   : > { %v3604_v9 = vadd.f32 %v3571_v25, %v1079_v20  ;;  %v9134_v20 = vld [vmem:[#allocation81_spill] sm:$0xff] }
 0x86a   : > { %v1094_v61 = vadd.f32 %v9134_v20, %v9087_v3  ;;  %v8374_v3 = vadd.f32 %v9141_v11, %v9140_v21 }
 0x86b   : > { %v4318_v44 = vmul.f32 -1.442695, %v3604_v9  ;;  %v4855_v0 = vpop.eup %4854  ;;  %v1097_v9 = vadd.f32 %v9135_v32, %v9089_v60 }
 0x86c   : > { %v8323_v4 = vadd.f32 1.0, %v4855_v0  ;;  %v4857_v47 = vpop.eup %4856 }
 0x86d   : > { %4860 = vpow2.f32 %v4318_v44  ;;  %v8330_v37 = vadd.f32 1.0, %v4857_v47  ;;  %v8333_v28 = vpop.eup %4858  ;;  %v9139_v44 = vld [vmem:[#allocation84_spill] sm:$0xff] }
 0x86e   : > { %4862 = vrcp.f32 %v8320_v35  ;;  %v3664_v48 = vmul.f32 %v8333_v28, %v8314_v8  ;;  %vm3669_vm13 = vweird.f32 %v8333_v28  ;;  %vm3728_vm4 = vweird.f32 %v8323_v4 }
 0x86f   : > { %4864 = vrcp.f32 %v8323_v4  ;;  %vm8402_vm2 = vmor %vm3668_vm10, %vm3669_vm13  ;;  %v3704_v20 = vand.u32 2147483648, %v8330_v37  ;;  %vm3698_vm5 = vweird.f32 %v8330_v37 }
 0x870   : > { %v3574_v14 = vpop.f32.mrf.mxu2  ;;  %v3665_v42 = vsub.f32 1.0, %v3664_v48 }
 0x871   : > { %v3605_v50 = vadd.f32 %v3574_v14, %v1082_v36  ;;  %v9133_v14 = vld [vmem:[#allocation80_spill] sm:$0xff]  ;;  %v9138_v36 = vld [vmem:[#allocation21_spill] sm:$0xff] }
 0x872   : > { %v1092_v18 = vadd.f32 %v9133_v14, %v9085_v15  ;;  %v3666_v26 = vmul.f32 %v8333_v28, %v3665_v42  ;;  %v8370_v0 = vadd.f32 %v9139_v44, %v9138_v36  ;;  %v3734_v36 = vand.u32 2147483648, %v8323_v4 }
 0x873   : > { %v4319_v23 = vmul.f32 -1.442695, %v3605_v50  ;;  %v4861_v41 = vpop.eup %4860 }
 0x874   : > { %v8335_v43 = vpop.eup %4862  ;;  %v8340_v5 = vadd.f32 1.0, %v4861_v41 }
 0x875   : > { %v8342_v2 = vpop.eup %4864  ;;  %v3679_v63 = vmul.f32 %v8335_v43, %v8320_v35  ;;  %vm3684_vm15 = vweird.f32 %v8335_v43 }
 0x876   : > { %v3724_v27 = vmul.f32 %v8342_v2, %v8323_v4  ;;  %vm8423_vm12 = vmor %vm3683_vm6, %vm3684_vm15  ;;  %vm3729_vm14 = vweird.f32 %v8342_v2  ;;  %vm3743_vm10 = vweird.f32 %v8340_v5 }
 0x877   : > { %vm8449_vm9 = vmor %vm3728_vm4, %vm3729_vm14 }
 0x878   : > { %v3576_v58 = vpop.f32.mrf.mxu2  ;;  %v3725_v6 = vsub.f32 1.0, %v3724_v27  ;;  %v3702_v27 = vand.u32 2147483647, %v8330_v37 }
 0x879   : > { %v3606_v12 = vadd.f32 %v3576_v58, %v1084_v34  ;;  %v3680_v58 = vsub.f32 1.0, %v3679_v63  ;;  %v3667_v34 = vadd.f32 %v8333_v28, %v3666_v26 }
 0x87a   : > { %v3726_v48 = vmul.f32 %v8342_v2, %v3725_v6  ;;  %vm8466_vm1 = vcmp.eq.f32.partialorder %v3702_v27, 8.507059e+37 }
 0x87b   : > { %v4320_v25 = vmul.f32 -1.442695, %v3606_v12  ;;  %v3681_v45 = vmul.f32 %v8335_v43, %v3680_v58 }
 0x87d   : > { %v3682_v63 = vadd.f32 %v8335_v43, %v3681_v45  ;;  %v3735_v45 = vor.u32 1.1754944e-38, %v3734_v36 }
 0x880   : > { %v3579_v33 = vpop.f32.mrf.mxu2 }
 0x881   : > { %v3607_v59 = vadd.f32 %v3579_v33, %v1087_v38  ;;  %v9137_v33 = vld [vmem:[#allocation83_spill] sm:$0xff] }
 0x882   : > { %v8363_v49 = vadd.f32 %v9137_v33, %v9136_v62  ;;  %v3727_v62 = vadd.f32 %v8342_v2, %v3726_v48  ;;  %v3686_v33 = vsel %vm8423_vm12, %v8335_v43, %v3682_v63 }
 0x883   : > { %v4321_v22 = vmul.f32 -1.442695, %v3607_v59 }
 0x885   : > { %4866 = vpow2.f32 %v4321_v22  ;;  %v3672_v22 = vand.u32 2147483647, %v8314_v8 }
 0x886   : > { %4868 = vpow2.f32 %v4319_v23  ;;  %v3674_v23 = vand.u32 2147483648, %v8314_v8 }
 0x887   : > { %4870 = vpow2.f32 %v4316_v40  ;;  %vm8406_vm3 = vcmp.eq.f32.partialorder %v3672_v22, 8.507059e+37 }
 0x888   : > { %v3581_v29 = vpop.f32.mrf.mxu2  ;;  %4872 = vrcp.f32 %v8330_v37  ;;  %v3675_v8 = vor.u32 1.1754944e-38, %v3674_v23 }
 0x889   : > { %v3608_v52 = vadd.f32 %v3581_v29, %v1089_v1  ;;  %v3687_v29 = vand.u32 2147483647, %v8320_v35 }
 0x88b   : > { %v4322_v17 = vmul.f32 -1.442695, %v3608_v52  ;;  %v4867_v39 = vpop.eup %4866  ;;  %v3689_v52 = vand.u32 2147483648, %v8320_v35  ;;  %vm8416_vm7 = vcmp.eq.f32.partialorder %v3687_v29, 8.507059e+37 }
 0x88c   : > { %v4869_v53 = vpop.eup %4868  ;;  %v8353_v57 = vadd.f32 1.0, %v4867_v39 }
 0x88d   : > { %4874 = vpow2.f32 %v4322_v17  ;;  %v4871_v56 = vpop.eup %4870  ;;  %v8357_v15 = vadd.f32 1.0, %v4869_v53  ;;  %v3671_v53 = vsel %vm8402_vm2, %v8333_v28, %v3667_v34 }
 0x88e   : > { %4876 = vrcp.f32 %v8340_v5  ;;  %v8349_v7 = vpop.eup %4872  ;;  %v8365_v38 = vadd.f32 1.0, %v4871_v56  ;;  %v3690_v56 = vor.u32 1.1754944e-38, %v3689_v52 }
 0x88f   : > { %4878 = vpow2.f32 %v4320_v25  ;;  %v3694_v59 = vmul.f32 %v8349_v7, %v8330_v37  ;;  %vm3699_vm11 = vweird.f32 %v8349_v7  ;;  %vm3758_vm12 = vweird.f32 %v8357_v15 }
 0x890   : > { %v3584_v55 = vpop.f32.mrf.mxu2  ;;  %4880 = vrcp.f32 %v8353_v57  ;;  %vm8472_vm8 = vmor %vm3698_vm5, %vm3699_vm11 }
 0x891   : > { %v3609_v51 = vadd.f32 %v3584_v55, %v1092_v18  ;;  %4882 = vrcp.f32 %v8357_v15  ;;  %v3695_v41 = vsub.f32 1.0, %v3694_v59  ;;  %v3732_v59 = vand.u32 2147483647, %v8323_v4 }
 0x892   : > { %4884 = vrcp.f32 %v8365_v38  ;;  %v3676_v4 = vsel %vm8406_vm3, %v3675_v8, %v3671_v53  ;;  %v3749_v53 = vand.u32 2147483648, %v8340_v5 }
 0x893   : > { %v4323_v60 = vmul.f32 -1.442695, %v3609_v51  ;;  %v4875_v50 = vpop.eup %4874  ;;  %v3696_v35 = vmul.f32 %v8349_v7, %v3695_v41  ;;  %vm3733_vm0 = vcmp.eq.f32.partialorder %v3732_v59, 8.507059e+37 }
 0x894   : > { %v8381_v1 = vpop.eup %4876  ;;  %v8390_v12 = vadd.f32 1.0, %v4875_v50 }
 0x895   : > { %v4879_v40 = vpop.eup %4878  ;;  %4886 = vpow2.f32 %v4323_v60  ;;  %v3739_v17 = vmul.f32 %v8381_v1, %v8340_v5  ;;  %vm3744_vm13 = vweird.f32 %v8381_v1  ;;  %v3764_v60 = vand.u32 2147483648, %v8357_v15 }
 0x896   : > { %v8398_v25 = vadd.f32 1.0, %v4879_v40  ;;  %v8411_v14 = vpop.eup %4880  ;;  %4888 = vrcp.f32 %v8390_v12  ;;  %vm8494_vm15 = vmor %vm3743_vm10, %vm3744_vm13 }
 0x897   : > { %v8420_v51 = vpop.eup %4882  ;;  %v3784_v44 = vmul.f32 %v8411_v14, %v8353_v57  ;;  %vm3789_vm2 = vweird.f32 %v8411_v14 }
 0x898   : > { %v3586_v47 = vpop.f32.mrf.mxu2  ;;  %v8430_v28 = vpop.eup %4884  ;;  %4890 = vrcp.f32 %v8398_v25  ;;  %v3754_v11 = vmul.f32 %v8420_v51, %v8357_v15  ;;  %vm3759_vm6 = vweird.f32 %v8420_v51  ;;  %vm3773_vm13 = vweird.f32 %v8398_v25 }
 0x899   : > { %v3610_v31 = vadd.f32 %v3586_v47, %v1094_v61  ;;  %v3740_v61 = vsub.f32 1.0, %v3739_v17  ;;  %v3709_v43 = vmul.f32 %v8430_v28, %v8365_v38  ;;  %v3731_v47 = vsel %vm8449_vm9, %v8342_v2, %v3727_v62  ;;  %vm8531_vm4 = vmor %vm3758_vm12, %vm3759_vm6 }
 0x89a   : > { %v3785_v23 = vsub.f32 1.0, %v3784_v44  ;;  %v3755_v40 = vsub.f32 1.0, %v3754_v11  ;;  %v3705_v2 = vor.u32 1.1754944e-38, %v3704_v20  ;;  %v3736_v48 = vsel %vm3733_vm0, %v3735_v45, %v3731_v47 }
 0x89b   : > { %v4324_v18 = vmul.f32 -1.442695, %v3610_v31  ;;  %v4887_v26 = vpop.eup %4886  ;;  %v3741_v50 = vmul.f32 %v8381_v1, %v3740_v61  ;;  %v3691_v31 = vsel %vm8416_vm7, %v3690_v56, %v3686_v33  ;;  %v3710_v41 = vsub.f32 1.0, %v3709_v43 }
 0x89c   : > { %v8456_v6 = vadd.f32 1.0, %v4887_v26  ;;  %v8463_v22 = vpop.eup %4888  ;;  %v3719_v17 = vand.u32 2147483648, %v8365_v38  ;;  %v3786_v42 = vmul.f32 %v8411_v14, %v3785_v23  ;;  %v3747_v56 = vand.u32 2147483647, %v8340_v5 }
 0x89d   : > { %4892 = vpow2.f32 %v4324_v18  ;;  %v3799_v55 = vmul.f32 %v8463_v22, %v8390_v12  ;;  %v3742_v8 = vadd.f32 %v8381_v1, %v3741_v50  ;;  %v3756_v58 = vmul.f32 %v8420_v51, %v3755_v40 }
 0x89e   : > { %v8476_v52 = vpop.eup %4890  ;;  %v3711_v5 = vmul.f32 %v8430_v28, %v3710_v41  ;;  %v3750_v26 = vor.u32 1.1754944e-38, %v3749_v53  ;;  %v3787_v36 = vadd.f32 %v8411_v14, %v3786_v42  ;;  %vm3748_vm3 = vcmp.eq.f32.partialorder %v3747_v56, 8.507059e+37 }
 0x89f   : > { %v3769_v61 = vmul.f32 %v8476_v52, %v8398_v25  ;;  %v3746_v33 = vsel %vm8494_vm15, %v8381_v1, %v3742_v8  ;;  %v3757_v11 = vadd.f32 %v8420_v51, %v3756_v58  ;;  %vm3788_vm7 = vweird.f32 %v8353_v57 }
 0x8a0   : > { %v3589_v32 = vpop.f32.mrf.mxu2  ;;  %v3792_v1 = vand.u32 2147483647, %v8353_v57  ;;  %v3751_v43 = vsel %vm3748_vm3, %v3750_v26, %v3746_v33  ;;  %vm8523_vm14 = vmor %vm3788_vm7, %vm3789_vm2  ;;  %v3762_v40 = vand.u32 2147483647, %v8357_v15  ;;  %vm3714_vm9 = vweird.f32 %v8430_v28 }
 0x8a1   : > { %v3611_v21 = vadd.f32 %v3589_v32, %v1097_v9  ;;  %v3697_v9 = vadd.f32 %v8349_v7, %v3696_v35  ;;  %v3847_v35 = vmul.f32 %v3736_v48, %v8132_v10  ;;  %v3800_v32 = vsub.f32 1.0, %v3799_v55 }
 0x8a2   : > { %v3770_v59 = vsub.f32 1.0, %v3769_v61  ;;  %v3791_v45 = vsel %vm8523_vm14, %v8411_v14, %v3787_v36  ;;  %v3761_v48 = vsel %vm8531_vm4, %v8420_v51, %v3757_v11  ;;  %vm3793_vm11 = vcmp.eq.f32.partialorder %v3792_v1, 8.507059e+37 }
 0x8a3   : > { %4894 = vtanh.f32 %v3611_v21  ;;  %v3701_v37 = vsel %vm8472_vm8, %v8349_v7, %v3697_v9  ;;  %v4893_v63 = vpop.eup %4892  ;;  %v3794_v21 = vand.u32 2147483648, %v8353_v57  ;;  %v3801_v50 = vmul.f32 %v8463_v22, %v3800_v32 }
 0x8a4   : > { %4896 = vrcp.f32 %v8456_v6  ;;  %v8507_v62 = vadd.f32 1.0, %v4893_v63  ;;  %v8549_v14 = vstv %s8500_s19  ;;  %vm3804_vm5 = vweird.f32 %v8463_v22 }
 0x8a5   : > { %v3795_v34 = vor.u32 1.1754944e-38, %v3794_v21  ;;  %vm3803_vm0 = vweird.f32 %v8390_v12  ;;  %vm3763_vm8 = vcmp.eq.f32.partialorder %v3762_v40, 8.507059e+37  ;;  %v3807_v42 = vand.u32 2147483647, %v8390_v12  ;;  %v3884_v40 = vpop.permute.xlu1 %3883 }
 0x8a6   : > { %vm8560_vm10 = vmor %vm3803_vm0, %vm3804_vm5  ;;  %vm3774_vm15 = vweird.f32 %v8476_v52  ;;  %v3779_v58 = vand.u32 2147483648, %v8398_v25  ;;  %v3717_v11 = vand.u32 2147483647, %v8365_v38  ;;  %v3824_v9 = vand.u32 2147483648, %v8456_v6 }
 0x8a7   : > { %v3796_v15 = vsel %vm3793_vm11, %v3795_v34, %v3791_v45  ;;  %vm8582_vm2 = vmor %vm3773_vm13, %vm3774_vm15  ;;  %vm3808_vm3 = vcmp.eq.f32.partialorder %v3807_v42, 8.507059e+37  ;;  %vm3818_vm14 = vweird.f32 %v8456_v6 }
 0x8a8   : > { %v3591_v39 = vpop.f32.mrf.mxu2  ;;  %v3825_v34 = vor.u32 1.1754944e-38, %v3824_v9 }
 0x8a9   : > { %v4895_v18 = vpop.eup %4894  ;;  %v3612_v7 = vadd.f32 %v3591_v39, %v8363_v49  ;;  %v8504_v49 = vsel %vm8466_vm1, %v3705_v2, %v3701_v37  ;;  %v3848_v2 = vmul.f32 %v3751_v43, %v8177_v13  ;;  %v3771_v37 = vmul.f32 %v8476_v52, %v3770_v59 }
 0x8aa   : > { %v3851_v27 = vmul.f32 %v4895_v18, %v3676_v4  ;;  %v8514_v44 = vpop.eup %4896  ;;  %vm3713_vm1 = vweird.f32 %v8365_v38  ;;  %v3712_v39 = vadd.f32 %v8430_v28, %v3711_v5  ;;  %v3809_v18 = vand.u32 2147483648, %v8390_v12 }
 0x8ab   : > { %4898 = vtanh.f32 %v3612_v7  ;;  %v3814_v23 = vmul.f32 %v8514_v44, %v8456_v6  ;;  %v3772_v20 = vadd.f32 %v8476_v52, %v3771_v37  ;;  %v3780_v59 = vor.u32 1.1754944e-38, %v3779_v58  ;;  %vm8598_vm7 = vmor %vm3713_vm1, %vm3714_vm9 }
 0x8ac   : > { %v3855_v10 = vadd.f32 %v3851_v27, %v3847_v35  ;;  %v3810_v33 = vor.u32 1.1754944e-38, %v3809_v18  ;;  %vm3819_vm6 = vweird.f32 %v8514_v44  ;;  %vm3718_vm9 = vcmp.eq.f32.partialorder %v3717_v11, 8.507059e+37  ;;  %v3894_v18 = vpop.permute.xlu0 %3893 }
 0x8ad   : > { %v3815_v55 = vsub.f32 1.0, %v3814_v23  ;;  %vm8609_vm4 = vmor %vm3818_vm14, %vm3819_vm6  ;;  %vm3833_vm1 = vweird.f32 %v8507_v62 }
 0x8ae   : > { %4900 = vtanh.f32 %v3855_v10 }
 0x8af   : > { %4902 = vrcp.f32 %v8507_v62  ;;  %v3816_v5 = vmul.f32 %v8514_v44, %v3815_v55 }
 0x8b0   : > { %v3594_v4 = vpop.f32.mrf.mxu2 }
 0x8b1   : > { %v4899_v47 = vpop.eup %4898  ;;  %v3613_v29 = vadd.f32 %v3594_v4, %v8370_v0  ;;  %v3802_v0 = vadd.f32 %v8463_v22, %v3801_v50  ;;  %v3822_v50 = vand.u32 2147483647, %v8456_v6  ;;  %v3889_v6 = vpop.permute.xlu2 %3888 }
 0x8b2   : > { %v3852_v41 = vmul.f32 %v4899_v47, %v3691_v31  ;;  %v3765_v31 = vor.u32 1.1754944e-38, %v3764_v60 }
 0x8b3   : > { %4904 = vtanh.f32 %v3613_v29  ;;  %v3806_v35 = vsel %vm8560_vm10, %v8463_v22, %v3802_v0  ;;  %v3777_v22 = vand.u32 2147483647, %v8398_v25  ;;  %v3817_v25 = vadd.f32 %v8514_v44, %v3816_v5 }
 0x8b4   : > { %v4901_v63 = vpop.eup %4900  ;;  %v3856_v13 = vadd.f32 %v3852_v41, %v3848_v2  ;;  %v3766_v56 = vsel %vm3763_vm8, %v3765_v31, %v3761_v48  ;;  %vm3823_vm11 = vcmp.eq.f32.partialorder %v3822_v50, 8.507059e+37 }
 0x8b5   : > { %v3863_v51 = vmul.f32 %v4901_v63, %v3796_v15  ;;  %v8555_v8 = vpop.eup %4902  ;;  %v3849_v26 = vmul.f32 %v3766_v56, %v8223_v46  ;;  %v3811_v46 = vsel %vm3808_vm3, %v3810_v33, %v3806_v35  ;;  %vm3778_vm12 = vcmp.eq.f32.partialorder %v3777_v22, 8.507059e+37 }
 0x8b6   : > { %4906 = vtanh.f32 %v3856_v13  ;;  %v3829_v12 = vmul.f32 %v8555_v8, %v8507_v62  ;;  %v3821_v45 = vsel %vm8609_vm4, %v8514_v44, %v3817_v25  ;;  %vm3834_vm5 = vweird.f32 %v8555_v8 }
 0x8b7   : > { %v3869_v7 = vmul.f32 %v8549_v14, %v3863_v51  ;;  %v3826_v0 = vsel %vm3823_vm11, %v3825_v34, %v3821_v45  ;;  %vm3835_vm0 = vmor %vm3833_vm1, %vm3834_vm5  ;;  %v3915_v33 = vstv %s3914_s20 }
 0x8b8   : > { %v3596_v27 = vpop.f32.mrf.mxu2  ;;  %v3830_v43 = vsub.f32 1.0, %v3829_v12 }
 0x8b9   : > { %v4905_v61 = vpop.eup %4904  ;;  %v3873_v32 = vadd.f32 %v3869_v7, %v8209_v19  ;;  %v3614_v10 = vadd.f32 %v3596_v27, %v8374_v3  ;;  %v3720_v19 = vor.u32 1.1754944e-38, %v3719_v17 }
 0x8ba   : > { %v3853_v36 = vmul.f32 %v4905_v61, %v8504_v49  ;;  %v3776_v49 = vsel %vm8582_vm2, %v8476_v52, %v3772_v20  ;;  %v3716_v52 = vsel %vm8598_vm7, %v8430_v28, %v3712_v39  ;;  %v3831_v28 = vmul.f32 %v8555_v8, %v3830_v43 }
 0x8bb   : > { %4908 = vtanh.f32 %v3614_v10  ;;  %v3781_v47 = vsel %vm3778_vm12, %v3780_v59, %v3776_v49  ;;  %v3721_v29 = vsel %vm3718_vm9, %v3720_v19, %v3716_v52  ;;  %v3901_v48 = vmul.f32 %v3884_v40, %v3873_v32 }
 0x8bc   : > { %v4907_v3 = vpop.eup %4906  ;;  %v3857_v1 = vadd.f32 %v3853_v36, %v3849_v26  ;;  %v3850_v2 = vmul.f32 %v3781_v47, %v8252_v24  ;;  %v3832_v13 = vadd.f32 %v8555_v8, %v3831_v28  ;;  %v3837_v24 = vand.u32 2147483647, %v8507_v62 }
 0x8bd   : > { %v3864_v60 = vmul.f32 %v4907_v3, %v3811_v46 }
 0x8be   : > { %4910 = vtanh.f32 %v3857_v1  ;;  %v3836_v51 = vsel %vm3835_vm0, %v8555_v8, %v3832_v13  ;;  %vm3838_vm8 = vcmp.eq.f32.partialorder %v3837_v24, 8.507059e+37 }
 0x8bf   : > { %v3870_v4 = vmul.f32 %v8549_v14, %v3864_v60 }
 0x8c1   : > { %v4909_v57 = vpop.eup %4908  ;;  %v3874_v23 = vadd.f32 %v3870_v4, %v8249_v30  ;;  %v3839_v30 = vand.u32 2147483648, %v8507_v62  ;;  %v3899_v62 = vpop.permute.xlu1 %3898 }
 0x8c2   : > { %v3854_v41 = vmul.f32 %v4909_v57, %v3721_v29 }
 0x8c3   : > { %v3902_v37 = vmul.f32 %v3889_v6, %v3874_v23  ;;  %v3840_v53 = vor.u32 1.1754944e-38, %v3839_v30 }
 0x8c4   : > { %v4911_v63 = vpop.eup %4910  ;;  %v3858_v15 = vadd.f32 %v3854_v41, %v3850_v2 }
 0x8c5   : > { %v3905_v44 = vadd.f32 %v3902_v37, %v3901_v48  ;;  %v3865_v31 = vmul.f32 %v4911_v63, %v3826_v0  ;;  %v3841_v56 = vsel %vm3838_vm8, %v3840_v53, %v3836_v51 }
 0x8c6   : > { %4912 = vtanh.f32 %v3858_v15 }
 0x8c7   : > { %v3871_v55 = vmul.f32 %v8549_v14, %v3865_v31 }
 0x8c9   : > { %v3875_v39 = vadd.f32 %v3871_v55, %v8263_v54 }
 0x8cb   : > { %v3903_v42 = vmul.f32 %v3894_v18, %v3875_v39 }
 0x8cc   : > { %v4913_v7 = vpop.eup %4912 }
 0x8cd   : > { %v3906_v58 = vadd.f32 %v3905_v44, %v3903_v42  ;;  %v3866_v35 = vmul.f32 %v4913_v7, %v3841_v56 }
 0x8cf   : > { %v3872_v27 = vmul.f32 %v8549_v14, %v3866_v35 }
 0x8d1   : > { %v3876_v20 = vadd.f32 %v3872_v27, %v8267_v16 }
 0x8d3   : > { %v3904_v61 = vmul.f32 %v3899_v62, %v3876_v20 }
 0x8d5   : > { %v3907_v5 = vadd.f32 %v3906_v58, %v3904_v61 }
 0x8d7   : > { %v3908_v12 = vrot.slane %v3907_v5, 4 }
 0x8d9   : > { %v3909_v8 = vadd.f32 %v3908_v12, %v3907_v5 }
 0x8db   : > { %v3910_v54 = vrot.slane %v3909_v8, 2 }
 0x8dd   : > { %v3911_v32 = vadd.f32 %v3910_v54, %v3909_v8 }
 0x8df   : > { %v3912_v10 = vrot.slane %v3911_v32, 1 }
 0x8e1   : > { %v3913_v26 = vadd.f32 %v3912_v10, %v3911_v32 }
 0x8e3   : > { %v3916_v36 = vadd.f32 %v3915_v33, %v3913_v26 }
 0x8e5   : > { %v4326_v22 = vmul.f32 -1.442695, %v3916_v36 }
 0x8e7   : > { %4914 = vpow2.f32 %v4326_v22 }
 0x8ed   : > { %v4915_v21 = vpop.eup %4914 }
 0x8ee   : > { %v3920_v14 = vadd.f32 1.0, %v4915_v21 }
 0x8f0   : > { %4916 = vrcp.f32 %v3920_v14  ;;  %v3932_v3 = vand.u32 2147483648, %v3920_v14  ;;  %v3930_v46 = vand.u32 2147483647, %v3920_v14  ;;  %vm3926_vm10 = vweird.f32 %v3920_v14 }
 0x8f2   : > { %v3933_v49 = vor.u32 1.1754944e-38, %v3932_v3  ;;  %vm3931_vm2 = vcmp.eq.f32.partialorder %v3930_v46, 8.507059e+37 }
 0x8f6   : > { %v4917_v16 = vpop.eup %4916 }
 0x8f7   : > { %v3922_v11 = vmul.f32 %v4917_v16, %v3920_v14  ;;  %vm3927_vm13 = vweird.f32 %v4917_v16 }
 0x8f8   : > { %vm3928_vm15 = vmor %vm3926_vm10, %vm3927_vm13 }
 0x8f9   : > { %v3923_v19 = vsub.f32 1.0, %v3922_v11 }
 0x8fb   : > { %v3924_v59 = vmul.f32 %v4917_v16, %v3923_v19 }
 0x8fd   : > { %v3925_v1 = vadd.f32 %v4917_v16, %v3924_v59 }
 0x8ff   : > { %v3929_v25 = vsel %vm3928_vm15, %v4917_v16, %v3925_v1 }
 0x900   : > { %v3934_v43 = vsel %vm3931_vm2, %v3933_v49, %v3929_v25 }
 0x901   : > { %3936 = vst [vmem:[%s361_s24] sm:$0x1] %v3934_v43 }
 0x902   : > { %4984 = shalt.err (!%p4981_p9)
}
 0x903   : > { %4352 = dma.vmem_to_hbm [thread:$0]  (%p5113_p6), %s3949_s25, 16, %s3951_s30, %s3938_s6  }
 0x904 PF: > { %s3962_s9 = sand.u32 1, %s5011_s26   ;;  %p4359_p11 = pnand %p4026_p1, %p5119_p10 }
 0x905   : > { %s3963_s20 = scalar_lea.sflag [#allocation6], %s3962_s9 }
 0x906   : > { %p4360_p12 = pneg %p4359_p11 }
 0x908   : > { %5006 = dma.done.wait (%p4360_p12), %s3963_s20, 16  }
 0x909   : > { %5008 = vsyncadd (%p4360_p12), %s3963_s20, 4294967280  ;;  %p19_p13 = scmp.ge.s32.totalorder %s5095_s8, 4   ;;  %s9170_s26 = smov %s5015_s27 }
 0x90a   : > { %s9171_s27 = smov %s5019_s28  ;;  %s9172_s28 = smov %s5107_s11 }
 0x90b   : > { %s9173_s29 = smov %s5095_s8  ;;  %21 = sbr.rel (!%p19_p13) target bundleno = 6 (0x6), region = 148 }
 0x910   :  { %3968 = vsyncpa [#allocation6], 1 }
 0x911   :  { %3970 = vsyncpa [#allocation6 + $0x1], 1 }
 0x912   :  { %3971 = vsyncpa [#allocation7], 1 }
 0x913   :  { %3973 = vsyncpa [#allocation7 + $0x1], 1 }

</bundles_post_ra>
